<compile_context>
chip_gen: v6e
topology: v6e:2x2x1
jax: 0.10.0
libtpu: 0.0.40
codegen_flags: <defaults>
</compile_context>

<pallas_src>
import jax
import jax.numpy as jnp
from jax.experimental import pallas as pl
from jax.experimental.pallas import tpu as pltpu


LATENT_PAD = 128  # latent dim padded to one full lane tile


def vae_kernel(x_ref, eps_ref,
               w1_ref, b1_ref, w2_ref, b2_ref, w3_ref, b3_ref,
               w4_ref, b4_ref, w5_ref, b5_ref, w6_ref, b6_ref,
               recon_ref, stats_ref):
    bf16 = jnp.bfloat16
    x = x_ref[...]

    # ---------------- Encoder ----------------
    h = jnp.dot(x.astype(bf16), w1_ref[...],
                preferred_element_type=jnp.float32) + b1_ref[...]
    h = jnp.maximum(h, 0.0)                                   # ReLU
    h = jnp.dot(h.astype(bf16), w2_ref[...],
                preferred_element_type=jnp.float32) + b2_ref[...]
    h = jnp.maximum(h, 0.0)                                   # ReLU

    # fused fc31 || fc32 -> lane-packed (TM, 2*LATENT_PAD) stats
    stats = jnp.dot(h.astype(bf16), w3_ref[...],
                    preferred_element_type=jnp.float32) + b3_ref[...]
    mu = stats[:, :LATENT_PAD]
    log_var = stats[:, LATENT_PAD:]

    # ---------------- Reparameterization ----------------
    std = jnp.exp(0.5 * log_var)
    # eps is zero in padded lanes and w4's padded rows are zero, so padding
    # never leaks into the decoder.
    z = eps_ref[...] * std + mu

    # ---------------- Decoder ----------------
    d = jnp.dot(z.astype(bf16), w4_ref[...],
                preferred_element_type=jnp.float32) + b4_ref[...]
    d = jnp.maximum(d, 0.0)                                   # ReLU
    d = jnp.dot(d.astype(bf16), w5_ref[...],
                preferred_element_type=jnp.float32) + b5_ref[...]
    d = jnp.maximum(d, 0.0)                                   # ReLU
    logits = jnp.dot(d.astype(bf16), w6_ref[...],
                     preferred_element_type=jnp.float32) + b6_ref[...]
    recon = pl.reciprocal(1.0 + jnp.exp(-logits))             # Sigmoid (EUP)

    recon_ref[...] = recon.astype(recon_ref.dtype)
    stats_ref[...] = stats.astype(stats_ref.dtype)


def init_vae_params(key, input_dim, latent_dim, dtype=jnp.float32):
    """Deterministic synthetic init.  Weights stored as (in, out)."""
    dims = {
        "fc1":  (input_dim, 512),
        "fc2":  (512, 256),
        "fc31": (256, latent_dim),
        "fc32": (256, latent_dim),
        "fc4":  (latent_dim, 256),
        "fc5":  (256, 512),
        "fc6":  (512, input_dim),
    }
    params = {}
    for name, (fan_in, fan_out) in dims.items():
        key, kw, kb = jax.random.split(key, 3)
        bound = 1.0 / jnp.sqrt(fan_in)
        params[name + "_w"] = jax.random.uniform(
            kw, (fan_in, fan_out), dtype, minval=-bound, maxval=bound)
        # biases kept 2D (1, out) so they live cleanly in VMEM and broadcast.
        params[name + "_b"] = jax.random.uniform(
            kb, (1, fan_out), dtype, minval=-bound, maxval=bound)
    return params


def _pack_params(params, latent_dim):
    """bf16-cast weights; fuse/pad fc31||fc32 and pad fc4 to LATENT_PAD."""
    bf16 = jnp.bfloat16
    f32 = jnp.float32

    def pad_cols(w, target):
        return jnp.zeros((w.shape[0], target), w.dtype).at[:, :w.shape[1]].set(w)

    def pad_rows(w, target):
        return jnp.zeros((target, w.shape[1]), w.dtype).at[:w.shape[0], :].set(w)

    w3 = jnp.concatenate(
        [pad_cols(params["fc31_w"], LATENT_PAD),
         pad_cols(params["fc32_w"], LATENT_PAD)], axis=1).astype(bf16)
    b3 = jnp.concatenate(
        [pad_cols(params["fc31_b"], LATENT_PAD),
         pad_cols(params["fc32_b"], LATENT_PAD)], axis=1).astype(f32)
    w4 = pad_rows(params["fc4_w"], LATENT_PAD).astype(bf16)

    return (
        params["fc1_w"].astype(bf16), params["fc1_b"].astype(f32),
        params["fc2_w"].astype(bf16), params["fc2_b"].astype(f32),
        w3, b3,
        w4, params["fc4_b"].astype(f32),
        params["fc5_w"].astype(bf16), params["fc5_b"].astype(f32),
        params["fc6_w"].astype(bf16), params["fc6_b"].astype(f32),
    )


def vae_forward(x_nchw, eps, params):
    N = x_nchw.shape[0]
    input_dim = int(x_nchw.shape[1] * x_nchw.shape[2] * x_nchw.shape[3])
    latent_dim = eps.shape[-1]
    assert latent_dim <= LATENT_PAD

    # x.view(-1, input_dim)
    x = x_nchw.reshape(N, input_dim).astype(jnp.float32)

    # Batch tiling: pad M to a sublane multiple; tile with TM=128 when large.
    if N <= 128:
        m_pad = max(8, ((N + 7) // 8) * 8)
        tm = m_pad
    else:
        tm = 128
        m_pad = ((N + tm - 1) // tm) * tm
    grid = (m_pad // tm,)

    x_pad = jnp.zeros((m_pad, input_dim), jnp.float32).at[:N].set(x)
    eps_pad = jnp.zeros((m_pad, LATENT_PAD), jnp.float32).at[:N, :latent_dim].set(
        eps.astype(jnp.float32))

    packed = _pack_params(params, latent_dim)

    # Activations: blocked on the batch axis.  Weights/biases: full array,
    # constant block index -> stay resident in VMEM across grid steps.
    def resident_spec(a):
        return pl.BlockSpec(a.shape, lambda i: tuple(0 for _ in a.shape))

    in_specs = (
        [pl.BlockSpec((tm, input_dim), lambda i: (i, 0)),
         pl.BlockSpec((tm, LATENT_PAD), lambda i: (i, 0))]
        + [resident_spec(a) for a in packed]
    )

    out_shapes = (
        jax.ShapeDtypeStruct((m_pad, input_dim), jnp.float32),       # recon
        jax.ShapeDtypeStruct((m_pad, 2 * LATENT_PAD), jnp.float32),  # mu || logvar
    )
    out_specs = (
        pl.BlockSpec((tm, input_dim), lambda i: (i, 0)),
        pl.BlockSpec((tm, 2 * LATENT_PAD), lambda i: (i, 0)),
    )

    recon_full, stats = pl.pallas_call(
        vae_kernel,
        out_shape=out_shapes,
        grid=grid,
        in_specs=in_specs,
        out_specs=out_specs,
        compiler_params=pltpu.CompilerParams(
            dimension_semantics=("parallel",),
            vmem_limit_bytes=32 << 20,   # <= v7x's 64 MiB physical VMEM
        ),
    )(x_pad, eps_pad, *packed)

    recon = recon_full[:N]
    mu = stats[:N, :latent_dim]
    log_var = stats[:N, LATENT_PAD:LATENT_PAD + latent_dim]
    return recon, mu, log_var


def vae_forward_ref(x_nchw, eps, params):
    """Pure-JAX reference using the same bf16-weight / f32-accumulate recipe."""
    bf16 = jnp.bfloat16
    input_dim = int(x_nchw.shape[1] * x_nchw.shape[2] * x_nchw.shape[3])
    x = x_nchw.reshape(-1, input_dim).astype(jnp.float32)

    def lin(a, w, b):
        return jnp.dot(a.astype(bf16), w.astype(bf16),
                       preferred_element_type=jnp.float32) + b

    h = jax.nn.relu(lin(x, params["fc1_w"], params["fc1_b"]))
    h = jax.nn.relu(lin(h, params["fc2_w"], params["fc2_b"]))
    mu = lin(h, params["fc31_w"], params["fc31_b"])
    log_var = lin(h, params["fc32_w"], params["fc32_b"])
    z = eps * jnp.exp(0.5 * log_var) + mu
    d = jax.nn.relu(lin(z, params["fc4_w"], params["fc4_b"]))
    d = jax.nn.relu(lin(d, params["fc5_w"], params["fc5_b"]))
    logits = lin(d, params["fc6_w"], params["fc6_b"])
    recon = 1.0 / (1.0 + jnp.exp(-logits))
    return recon, mu, log_var


if __name__ == "__main__":
    key = jax.random.PRNGKey(0)
    k_x, k_eps, k_p = jax.random.split(key, 3)

    # Small shapes consistent with the module: x is NCHW, flattened internally.
    N, C, H, W = 2, 4, 16, 16
    input_dim = C * H * W          # 1024
    latent_dim = 32

    x = jax.random.normal(k_x, (N, C, H, W), jnp.float32)
    eps = jax.random.normal(k_eps, (N, latent_dim), jnp.float32)  # torch.randn_like(std)
    params = init_vae_params(k_p, input_dim, latent_dim)

    recon, mu, log_var = vae_forward(x, eps, params)
    jax.block_until_ready((recon, mu, log_var))

    r_ref, mu_ref, lv_ref = vae_forward_ref(x, eps, params)
    assert recon.shape == (N, input_dim)
    assert mu.shape == (N, latent_dim) and log_var.shape == (N, latent_dim)
    assert jnp.allclose(recon, r_ref, atol=5e-3, rtol=5e-3)
    assert jnp.allclose(mu, mu_ref, atol=5e-3, rtol=5e-3)
    assert jnp.allclose(log_var, lv_ref, atol=5e-3, rtol=5e-3)

    print("KERNEL_OK")
</pallas_src>

<mosaic_0001>
module attributes {stable_mosaic.version = 11 : i64} {
  func.func @vae_kernel(%arg0: i32, %arg1: memref<8x1024xf32, #tpu.memory_space<vmem>>, %arg2: memref<8x128xf32, #tpu.memory_space<vmem>>, %arg3: memref<1024x512xbf16, #tpu.memory_space<vmem>>, %arg4: memref<1x512xf32, #tpu.memory_space<vmem>>, %arg5: memref<512x256xbf16, #tpu.memory_space<vmem>>, %arg6: memref<1x256xf32, #tpu.memory_space<vmem>>, %arg7: memref<256x256xbf16, #tpu.memory_space<vmem>>, %arg8: memref<1x256xf32, #tpu.memory_space<vmem>>, %arg9: memref<128x256xbf16, #tpu.memory_space<vmem>>, %arg10: memref<1x256xf32, #tpu.memory_space<vmem>>, %arg11: memref<256x512xbf16, #tpu.memory_space<vmem>>, %arg12: memref<1x512xf32, #tpu.memory_space<vmem>>, %arg13: memref<512x1024xbf16, #tpu.memory_space<vmem>>, %arg14: memref<1x1024xf32, #tpu.memory_space<vmem>>, %arg15: memref<8x1024xf32, #tpu.memory_space<vmem>>, %arg16: memref<8x256xf32, #tpu.memory_space<vmem>>) attributes {dimension_semantics = [#tpu.dimension_semantics<parallel>], iteration_bounds = array<i64: 1>, scalar_prefetch = 0 : i64, scratch_operands = 0 : i64, tpu.core_type = #tpu.core_type<tc>, window_params = [{transform_indices = @transform_0, window_bounds = array<i64: 8, 1024>}, {transform_indices = @transform_1, window_bounds = array<i64: 8, 128>}, {pipeline_mode = #tpu.pipeline_mode<synchronous>, transform_indices = @transform_2, window_bounds = array<i64: 1024, 512>}, {pipeline_mode = #tpu.pipeline_mode<synchronous>, transform_indices = @transform_3, window_bounds = array<i64: 1, 512>}, {pipeline_mode = #tpu.pipeline_mode<synchronous>, transform_indices = @transform_4, window_bounds = array<i64: 512, 256>}, {pipeline_mode = #tpu.pipeline_mode<synchronous>, transform_indices = @transform_5, window_bounds = array<i64: 1, 256>}, {pipeline_mode = #tpu.pipeline_mode<synchronous>, transform_indices = @transform_6, window_bounds = array<i64: 256, 256>}, {pipeline_mode = #tpu.pipeline_mode<synchronous>, transform_indices = @transform_7, window_bounds = array<i64: 1, 256>}, {pipeline_mode = #tpu.pipeline_mode<synchronous>, transform_indices = @transform_8, window_bounds = array<i64: 128, 256>}, {pipeline_mode = #tpu.pipeline_mode<synchronous>, transform_indices = @transform_9, window_bounds = array<i64: 1, 256>}, {pipeline_mode = #tpu.pipeline_mode<synchronous>, transform_indices = @transform_10, window_bounds = array<i64: 256, 512>}, {pipeline_mode = #tpu.pipeline_mode<synchronous>, transform_indices = @transform_11, window_bounds = array<i64: 1, 512>}, {pipeline_mode = #tpu.pipeline_mode<synchronous>, transform_indices = @transform_12, window_bounds = array<i64: 512, 1024>}, {pipeline_mode = #tpu.pipeline_mode<synchronous>, transform_indices = @transform_13, window_bounds = array<i64: 1, 1024>}, {transform_indices = @transform_14, window_bounds = array<i64: 8, 1024>}, {transform_indices = @transform_15, window_bounds = array<i64: 8, 256>}]} {
    %c0 = arith.constant 0 : index
    %c0_0 = arith.constant 0 : index
    %0 = vector.load %arg1[%c0, %c0_0] : memref<8x1024xf32, #tpu.memory_space<vmem>>, vector<8x1024xf32>
    %1 = arith.truncf %0 : vector<8x1024xf32> to vector<8x1024xbf16>
    %c0_1 = arith.constant 0 : index
    %c0_2 = arith.constant 0 : index
    %2 = vector.load %arg3[%c0_1, %c0_2] : memref<1024x512xbf16, #tpu.memory_space<vmem>>, vector<1024x512xbf16>
    %cst = arith.constant dense<0.000000e+00> : vector<8x512xf32>
    %3 = tpu.matmul %1, %2, %cst {dimension_numbers = #tpu.dot_dimension_numbers<[1], [0], [0], [1], [0, 0, 1, 1], [], []>} : vector<8x1024xbf16>, vector<1024x512xbf16>, vector<8x512xf32> -> vector<8x512xf32>
    %c0_3 = arith.constant 0 : index
    %c0_4 = arith.constant 0 : index
    %4 = vector.load %arg4[%c0_3, %c0_4] : memref<1x512xf32, #tpu.memory_space<vmem>>, vector<1x512xf32>
    %5 = vector.broadcast %4 : vector<1x512xf32> to vector<8x512xf32>
    %6 = arith.addf %3, %5 : vector<8x512xf32>
    %cst_5 = arith.constant 0.000000e+00 : f32
    %7 = vector.broadcast %cst_5 : f32 to vector<8x512xf32>
    %8 = arith.maximumf %6, %7 : vector<8x512xf32>
    %9 = arith.truncf %8 : vector<8x512xf32> to vector<8x512xbf16>
    %c0_6 = arith.constant 0 : index
    %c0_7 = arith.constant 0 : index
    %10 = vector.load %arg5[%c0_6, %c0_7] : memref<512x256xbf16, #tpu.memory_space<vmem>>, vector<512x256xbf16>
    %cst_8 = arith.constant dense<0.000000e+00> : vector<8x256xf32>
    %11 = tpu.matmul %9, %10, %cst_8 {dimension_numbers = #tpu.dot_dimension_numbers<[1], [0], [0], [1], [0, 0, 1, 1], [], []>} : vector<8x512xbf16>, vector<512x256xbf16>, vector<8x256xf32> -> vector<8x256xf32>
    %c0_9 = arith.constant 0 : index
    %c0_10 = arith.constant 0 : index
    %12 = vector.load %arg6[%c0_9, %c0_10] : memref<1x256xf32, #tpu.memory_space<vmem>>, vector<1x256xf32>
    %13 = vector.broadcast %12 : vector<1x256xf32> to vector<8x256xf32>
    %14 = arith.addf %11, %13 : vector<8x256xf32>
    %cst_11 = arith.constant 0.000000e+00 : f32
    %15 = vector.broadcast %cst_11 : f32 to vector<8x256xf32>
    %16 = arith.maximumf %14, %15 : vector<8x256xf32>
    %17 = arith.truncf %16 : vector<8x256xf32> to vector<8x256xbf16>
    %c0_12 = arith.constant 0 : index
    %c0_13 = arith.constant 0 : index
    %18 = vector.load %arg7[%c0_12, %c0_13] : memref<256x256xbf16, #tpu.memory_space<vmem>>, vector<256x256xbf16>
    %cst_14 = arith.constant dense<0.000000e+00> : vector<8x256xf32>
    %19 = tpu.matmul %17, %18, %cst_14 {dimension_numbers = #tpu.dot_dimension_numbers<[1], [0], [0], [1], [0, 0, 1, 1], [], []>} : vector<8x256xbf16>, vector<256x256xbf16>, vector<8x256xf32> -> vector<8x256xf32>
    %c0_15 = arith.constant 0 : index
    %c0_16 = arith.constant 0 : index
    %20 = vector.load %arg8[%c0_15, %c0_16] : memref<1x256xf32, #tpu.memory_space<vmem>>, vector<1x256xf32>
    %21 = vector.broadcast %20 : vector<1x256xf32> to vector<8x256xf32>
    %22 = arith.addf %19, %21 : vector<8x256xf32>
    %23 = vector.extract_strided_slice %22 {offsets = [0, 0], sizes = [8, 128], strides = [1, 1]} : vector<8x256xf32> to vector<8x128xf32>
    %24 = vector.extract_strided_slice %22 {offsets = [0, 128], sizes = [8, 128], strides = [1, 1]} : vector<8x256xf32> to vector<8x128xf32>
    %cst_17 = arith.constant 5.000000e-01 : f32
    %25 = vector.broadcast %cst_17 : f32 to vector<8x128xf32>
    %26 = arith.mulf %25, %24 : vector<8x128xf32>
    %27 = math.exp %26 : vector<8x128xf32>
    %c0_18 = arith.constant 0 : index
    %c0_19 = arith.constant 0 : index
    %28 = vector.load %arg2[%c0_18, %c0_19] : memref<8x128xf32, #tpu.memory_space<vmem>>, vector<8x128xf32>
    %29 = arith.mulf %28, %27 : vector<8x128xf32>
    %30 = arith.addf %29, %23 : vector<8x128xf32>
    %31 = arith.truncf %30 : vector<8x128xf32> to vector<8x128xbf16>
    %c0_20 = arith.constant 0 : index
    %c0_21 = arith.constant 0 : index
    %32 = vector.load %arg9[%c0_20, %c0_21] : memref<128x256xbf16, #tpu.memory_space<vmem>>, vector<128x256xbf16>
    %cst_22 = arith.constant dense<0.000000e+00> : vector<8x256xf32>
    %33 = tpu.matmul %31, %32, %cst_22 {dimension_numbers = #tpu.dot_dimension_numbers<[1], [0], [0], [1], [0, 0, 1, 1], [], []>} : vector<8x128xbf16>, vector<128x256xbf16>, vector<8x256xf32> -> vector<8x256xf32>
    %c0_23 = arith.constant 0 : index
    %c0_24 = arith.constant 0 : index
    %34 = vector.load %arg10[%c0_23, %c0_24] : memref<1x256xf32, #tpu.memory_space<vmem>>, vector<1x256xf32>
    %35 = vector.broadcast %34 : vector<1x256xf32> to vector<8x256xf32>
    %36 = arith.addf %33, %35 : vector<8x256xf32>
    %cst_25 = arith.constant 0.000000e+00 : f32
    %37 = vector.broadcast %cst_25 : f32 to vector<8x256xf32>
    %38 = arith.maximumf %36, %37 : vector<8x256xf32>
    %39 = arith.truncf %38 : vector<8x256xf32> to vector<8x256xbf16>
    %c0_26 = arith.constant 0 : index
    %c0_27 = arith.constant 0 : index
    %40 = vector.load %arg11[%c0_26, %c0_27] : memref<256x512xbf16, #tpu.memory_space<vmem>>, vector<256x512xbf16>
    %cst_28 = arith.constant dense<0.000000e+00> : vector<8x512xf32>
    %41 = tpu.matmul %39, %40, %cst_28 {dimension_numbers = #tpu.dot_dimension_numbers<[1], [0], [0], [1], [0, 0, 1, 1], [], []>} : vector<8x256xbf16>, vector<256x512xbf16>, vector<8x512xf32> -> vector<8x512xf32>
    %c0_29 = arith.constant 0 : index
    %c0_30 = arith.constant 0 : index
    %42 = vector.load %arg12[%c0_29, %c0_30] : memref<1x512xf32, #tpu.memory_space<vmem>>, vector<1x512xf32>
    %43 = vector.broadcast %42 : vector<1x512xf32> to vector<8x512xf32>
    %44 = arith.addf %41, %43 : vector<8x512xf32>
    %cst_31 = arith.constant 0.000000e+00 : f32
    %45 = vector.broadcast %cst_31 : f32 to vector<8x512xf32>
    %46 = arith.maximumf %44, %45 : vector<8x512xf32>
    %47 = arith.truncf %46 : vector<8x512xf32> to vector<8x512xbf16>
    %c0_32 = arith.constant 0 : index
    %c0_33 = arith.constant 0 : index
    %48 = vector.load %arg13[%c0_32, %c0_33] : memref<512x1024xbf16, #tpu.memory_space<vmem>>, vector<512x1024xbf16>
    %cst_34 = arith.constant dense<0.000000e+00> : vector<8x1024xf32>
    %49 = tpu.matmul %47, %48, %cst_34 {dimension_numbers = #tpu.dot_dimension_numbers<[1], [0], [0], [1], [0, 0, 1, 1], [], []>} : vector<8x512xbf16>, vector<512x1024xbf16>, vector<8x1024xf32> -> vector<8x1024xf32>
    %c0_35 = arith.constant 0 : index
    %c0_36 = arith.constant 0 : index
    %50 = vector.load %arg14[%c0_35, %c0_36] : memref<1x1024xf32, #tpu.memory_space<vmem>>, vector<1x1024xf32>
    %51 = vector.broadcast %50 : vector<1x1024xf32> to vector<8x1024xf32>
    %52 = arith.addf %49, %51 : vector<8x1024xf32>
    %cst_37 = arith.constant 0.000000e+00 : f32
    %53 = vector.broadcast %cst_37 : f32 to vector<8x1024xf32>
    %54 = arith.subf %53, %52 : vector<8x1024xf32>
    %55 = math.exp %54 : vector<8x1024xf32>
    %cst_38 = arith.constant 1.000000e+00 : f32
    %56 = vector.broadcast %cst_38 : f32 to vector<8x1024xf32>
    %57 = arith.addf %56, %55 : vector<8x1024xf32>
    %58 = tpu.reciprocal %57 : vector<8x1024xf32> -> vector<8x1024xf32>
    %c0_39 = arith.constant 0 : index
    %c0_40 = arith.constant 0 : index
    %59 = vector.load %arg15[%c0_39, %c0_40] : memref<8x1024xf32, #tpu.memory_space<vmem>>, vector<8x1024xf32>
    tpu.vector_store %arg15[%c0_39, %c0_40], %58 {strides = array<i32>} : memref<8x1024xf32, #tpu.memory_space<vmem>>, vector<8x1024xf32>,
    %c0_41 = arith.constant 0 : index
    %c0_42 = arith.constant 0 : index
    %60 = vector.load %arg16[%c0_41, %c0_42] : memref<8x256xf32, #tpu.memory_space<vmem>>, vector<8x256xf32>
    tpu.vector_store %arg16[%c0_41, %c0_42], %22 {strides = array<i32>} : memref<8x256xf32, #tpu.memory_space<vmem>>, vector<8x256xf32>,
    return
  }
  func.func @transform_0(%arg0: i32) -> (i32, i32) {
    %c0_i32 = arith.constant 0 : i32
    %c0_i32_0 = arith.constant 0 : i32
    return %arg0, %c0_i32 : i32, i32
  }
  func.func @transform_1(%arg0: i32) -> (i32, i32) {
    %c0_i32 = arith.constant 0 : i32
    %c0_i32_0 = arith.constant 0 : i32
    return %arg0, %c0_i32 : i32, i32
  }
  func.func @transform_2(%arg0: i32) -> (i32, i32) {
    %c0_i32 = arith.constant 0 : i32
    %c0_i32_0 = arith.constant 0 : i32
    %c0_i32_1 = arith.constant 0 : i32
    return %c0_i32, %c0_i32_0 : i32, i32
  }
  func.func @transform_3(%arg0: i32) -> (i32, i32) {
    %c0_i32 = arith.constant 0 : i32
    %c0_i32_0 = arith.constant 0 : i32
    %c0_i32_1 = arith.constant 0 : i32
    return %c0_i32, %c0_i32_0 : i32, i32
  }
  func.func @transform_4(%arg0: i32) -> (i32, i32) {
    %c0_i32 = arith.constant 0 : i32
    %c0_i32_0 = arith.constant 0 : i32
    %c0_i32_1 = arith.constant 0 : i32
    return %c0_i32, %c0_i32_0 : i32, i32
  }
  func.func @transform_5(%arg0: i32) -> (i32, i32) {
    %c0_i32 = arith.constant 0 : i32
    %c0_i32_0 = arith.constant 0 : i32
    %c0_i32_1 = arith.constant 0 : i32
    return %c0_i32, %c0_i32_0 : i32, i32
  }
  func.func @transform_6(%arg0: i32) -> (i32, i32) {
    %c0_i32 = arith.constant 0 : i32
    %c0_i32_0 = arith.constant 0 : i32
    %c0_i32_1 = arith.constant 0 : i32
    return %c0_i32, %c0_i32_0 : i32, i32
  }
  func.func @transform_7(%arg0: i32) -> (i32, i32) {
    %c0_i32 = arith.constant 0 : i32
    %c0_i32_0 = arith.constant 0 : i32
    %c0_i32_1 = arith.constant 0 : i32
    return %c0_i32, %c0_i32_0 : i32, i32
  }
  func.func @transform_8(%arg0: i32) -> (i32, i32) {
    %c0_i32 = arith.constant 0 : i32
    %c0_i32_0 = arith.constant 0 : i32
    %c0_i32_1 = arith.constant 0 : i32
    return %c0_i32, %c0_i32_0 : i32, i32
  }
  func.func @transform_9(%arg0: i32) -> (i32, i32) {
    %c0_i32 = arith.constant 0 : i32
    %c0_i32_0 = arith.constant 0 : i32
    %c0_i32_1 = arith.constant 0 : i32
    return %c0_i32, %c0_i32_0 : i32, i32
  }
  func.func @transform_10(%arg0: i32) -> (i32, i32) {
    %c0_i32 = arith.constant 0 : i32
    %c0_i32_0 = arith.constant 0 : i32
    %c0_i32_1 = arith.constant 0 : i32
    return %c0_i32, %c0_i32_0 : i32, i32
  }
  func.func @transform_11(%arg0: i32) -> (i32, i32) {
    %c0_i32 = arith.constant 0 : i32
    %c0_i32_0 = arith.constant 0 : i32
    %c0_i32_1 = arith.constant 0 : i32
    return %c0_i32, %c0_i32_0 : i32, i32
  }
  func.func @transform_12(%arg0: i32) -> (i32, i32) {
    %c0_i32 = arith.constant 0 : i32
    %c0_i32_0 = arith.constant 0 : i32
    %c0_i32_1 = arith.constant 0 : i32
    return %c0_i32, %c0_i32_0 : i32, i32
  }
  func.func @transform_13(%arg0: i32) -> (i32, i32) {
    %c0_i32 = arith.constant 0 : i32
    %c0_i32_0 = arith.constant 0 : i32
    %c0_i32_1 = arith.constant 0 : i32
    return %c0_i32, %c0_i32_0 : i32, i32
  }
  func.func @transform_14(%arg0: i32) -> (i32, i32) {
    %c0_i32 = arith.constant 0 : i32
    %c0_i32_0 = arith.constant 0 : i32
    return %arg0, %c0_i32 : i32, i32
  }
  func.func @transform_15(%arg0: i32) -> (i32, i32) {
    %c0_i32 = arith.constant 0 : i32
    %c0_i32_0 = arith.constant 0 : i32
    return %arg0, %c0_i32 : i32, i32
  }
}

</mosaic_0001>

<bundles_post_ra>
// kernel: tpu_custom_call.1
= control target key start
LH: loop header
LB: loop body
LE: loop exit
PB: predicated region body
PF: predicated region fallthrough
CT: control target
= control target key end

     0   :  { %21 = vsyncpa [#allocation3], 0  ;;  %s7408_s0 = inlined_call_operand.hbm [shape: f32[8,1024], index: 0, kind: input, shape index: {}]   ;;  %s7409_s1 = inlined_call_operand.hbm [shape: f32[8,128], index: 1, kind: input, shape index: {}]   ;;  %s7410_s2 = inlined_call_operand.hbm [shape: bf16[1024,512], index: 2, kind: input, shape index: {}]   ;;  %s7411_s3 = inlined_call_operand.vmem [shape: f32[1,512], index: 3, kind: input, shape index: {}]   ;;  %s7412_s4 = inlined_call_operand.hbm [shape: bf16[512,256], index: 4, kind: input, shape index: {}]   ;;  %s7413_s5 = inlined_call_operand.hbm [shape: f32[1,256], index: 5, kind: input, shape index: {}]   ;;  %s7414_s6 = inlined_call_operand.hbm [shape: bf16[256,256], index: 6, kind: input, shape index: {}]   ;;  %s7415_s7 = inlined_call_operand.hbm [shape: f32[1,256], index: 7, kind: input, shape index: {}]   ;;  %s7416_s8 = inlined_call_operand.hbm [shape: bf16[128,256], index: 8, kind: input, shape index: {}]   ;;  %s7417_s9 = inlined_call_operand.hbm [shape: f32[1,256], index: 9, kind: input, shape index: {}]   ;;  %s7418_s10 = inlined_call_operand.hbm [shape: bf16[256,512], index: 10, kind: input, shape index: {}]   ;;  %s7419_s11 = inlined_call_operand.vmem [shape: f32[1,512], index: 11, kind: input, shape index: {}]   ;;  %s7420_s12 = inlined_call_operand.hbm [shape: bf16[512,1024], index: 12, kind: input, shape index: {}]   ;;  %s7421_s13 = inlined_call_operand.vmem [shape: f32[1,1024], index: 13, kind: input, shape index: {}]   ;;  %s7422_s14 = inlined_call_operand.hbm [shape: f32[8,1024], index: 14, kind: output, shape index: {0}]   ;;  %s7423_s15 = inlined_call_operand.hbm [shape: f32[8,256], index: 15, kind: output, shape index: {1}]  }
   0x1   :  { %22 = vsyncpa [#allocation6], 0 }
   0x2   :  { %23 = vsyncpa [#allocation9], 0 }
   0x3   :  { %24 = vsyncpa [#allocation12], 0 }
   0x4   :  { %25 = vsyncpa [#allocation15], 0 }
   0x5   :  { %26 = vsyncpa [#allocation18], 0 }
   0x6   :  { %27 = vsyncpa [#allocation4], 0 }
   0x7   :  { %28 = vsyncpa [#allocation22], 0  ;;  %s7140_s18 = smov [#allocation5]   ;;  %s7141_s20 = smov [#allocation8]  }
   0x8   :  { %s45_s19 = sshll.u32 %s7140_s18, 4  ;;  %s68_s21 = sshll.u32 %s7141_s20, 4  ;;  %s46_s19 = int_to_ptr.vmem [resolvable:$true] %s45_s19  ;;  %s69_s21 = int_to_ptr.vmem [resolvable:$true] %s68_s21 }
   0x9   :  { %s6872_s22 = scalar_lea.vmem %s46_s19, 128  ;;  %p6877_p1 = scmp.lt.s32.totalorder %s46_s19, %s46_s19 }
   0xa   :  { %p6873_p0 = scmp.ne.s32.totalorder %s46_s19, %s6872_s22  ;;  %p6878_p2 = scmp.lt.s32.totalorder %s6872_s22, %s6872_s22 }
   0xc   :  { %p6879_p3 = por %p6878_p2, %p6877_p1 }
   0xe   :  { %p6880_p4 = pnand %p6879_p3, %p6873_p0 }
  0x10   :  { %6883 = shalt.err (!%p6880_p4)
}
  0x11   :  { %48 = dma.hbm_to_vmem [thread:$0]  %s7409_s1, 128, %s46_s19, [#allocation6]  }
  0x12   :  { %s6892_s25 = scalar_lea.vmem %s69_s21, 8192  ;;  %p6897_p6 = scmp.lt.s32.totalorder %s69_s21, %s69_s21 }
  0x13   :  { %p6893_p5 = scmp.ne.s32.totalorder %s69_s21, %s6892_s25  ;;  %p6898_p7 = scmp.lt.s32.totalorder %s6892_s25, %s6892_s25 }
  0x15   :  { %p6899_p8 = por %p6898_p7, %p6897_p6 }
  0x17   :  { %p6900_p9 = pnand %p6899_p8, %p6893_p5 }
  0x19   :  { %6903 = shalt.err (!%p6900_p9)
}
  0x1a   :  { %s7142_s26 = smov 128   ;;  %s7143_s27 = smov 8  }
  0x1b   :  { %74 = dma.hbm_to_vmem [thread:$0]  %s7412_s4, 8192, %s69_s21, [#allocation9], %s7142_s26, %s7142_s26, %s7143_s27  }
  0x1c   :  { %s7144_s30 = smov [#allocation11]   ;;  %s7145_s17 = smov [#allocation14]  }
  0x1d   :  { %s90_s16 = sshll.u32 %s7144_s30, 4  ;;  %s112_s18 = sshll.u32 %s7145_s17, 4  ;;  %s91_s16 = int_to_ptr.vmem [resolvable:$true] %s90_s16  ;;  %s113_s18 = int_to_ptr.vmem [resolvable:$true] %s112_s18 }
  0x1e   :  { %s6912_s1 = scalar_lea.vmem %s91_s16, 4096  ;;  %p6917_p11 = scmp.lt.s32.totalorder %s91_s16, %s91_s16 }
  0x1f   :  { %p6913_p10 = scmp.ne.s32.totalorder %s91_s16, %s6912_s1  ;;  %p6918_p12 = scmp.lt.s32.totalorder %s6912_s1, %s6912_s1 }
  0x21   :  { %p6919_p13 = por %p6918_p12, %p6917_p11 }
  0x23   :  { %p6920_p0 = pnand %p6919_p13, %p6913_p10 }
  0x25   :  { %6923 = shalt.err (!%p6920_p0)
}
  0x26   :  { %96 = dma.hbm_to_vmem [thread:$0]  %s7414_s6, 4096, %s91_s16, [#allocation12], %s7142_s26, %s7142_s26, %s7143_s27  }
  0x27   :  { %s6932_s22 = scalar_lea.vmem %s113_s18, 2048  ;;  %p6937_p2 = scmp.lt.s32.totalorder %s113_s18, %s113_s18 }
  0x28   :  { %p6933_p1 = scmp.ne.s32.totalorder %s113_s18, %s6932_s22  ;;  %p6938_p3 = scmp.lt.s32.totalorder %s6932_s22, %s6932_s22 }
  0x2a   :  { %p6939_p4 = por %p6938_p3, %p6937_p2 }
  0x2c   :  { %p6940_p5 = pnand %p6939_p4, %p6933_p1 }
  0x2e   :  { %6943 = shalt.err (!%p6940_p5)
}
  0x2f   :  { %118 = dma.hbm_to_vmem [thread:$0]  %s7416_s8, 2048, %s113_s18, [#allocation15], %s7142_s26, %s7142_s26, %s7143_s27  }
  0x30   :  { %s7146_s23 = smov [#allocation17]   ;;  %s7147_s25 = smov [#allocation2]  }
  0x31   :  { %s134_s24 = sshll.u32 %s7146_s23, 4  ;;  %s35_s28 = sshll.u32 %s7147_s25, 4  ;;  %s135_s24 = int_to_ptr.vmem [resolvable:$true] %s134_s24  ;;  %s36_s28 = int_to_ptr.vmem [resolvable:$true] %s35_s28 }
  0x32   :  { %s6952_s29 = scalar_lea.vmem %s135_s24, 8192  ;;  %p6957_p7 = scmp.lt.s32.totalorder %s135_s24, %s135_s24 }
  0x33   :  { %p6953_p6 = scmp.ne.s32.totalorder %s135_s24, %s6952_s29  ;;  %p6958_p8 = scmp.lt.s32.totalorder %s6952_s29, %s6952_s29 }
  0x35   :  { %p6959_p9 = por %p6958_p8, %p6957_p7 }
  0x37   :  { %p6960_p10 = pnand %p6959_p9, %p6953_p6 }
  0x39   :  { %6963 = shalt.err (!%p6960_p10)
}
  0x3a   :  { %s7148_s6 = smov 256   ;;  %s7149_s30 = smov 16  }
  0x3b   :  { %140 = dma.hbm_to_vmem [thread:$0]  %s7418_s10, 8192, %s135_s24, [#allocation18], %s7148_s6, %s7148_s6, %s7149_s30  }
  0x3c   :  { %s6972_s8 = scalar_lea.vmem %s36_s28, 1024  ;;  %p6977_p12 = scmp.lt.s32.totalorder %s36_s28, %s36_s28 }
  0x3d   :  { %p6973_p11 = scmp.ne.s32.totalorder %s36_s28, %s6972_s8  ;;  %p6978_p13 = scmp.lt.s32.totalorder %s6972_s8, %s6972_s8 }
  0x3f   :  { %p6979_p0 = por %p6978_p13, %p6977_p12 }
  0x41   :  { %p6980_p1 = pnand %p6979_p0, %p6973_p11 }
  0x43   :  { %6983 = shalt.err (!%p6980_p1)
}
  0x44   :  { %38 = dma.hbm_to_vmem [thread:$0]  %s7408_s0, 1024, %s36_s28, [#allocation3]  }
  0x45   :  { %s7150_s18 = smov [#allocation7]   ;;  %s7151_s19 = smov [#allocation10]  }
  0x46   :  { %s54_s1 = sshll.u32 %s7150_s18, 4  ;;  %s81_s20 = sshll.u32 %s7151_s19, 4  ;;  %s55_s1 = int_to_ptr.vmem [resolvable:$true] %s54_s1  ;;  %s82_s20 = int_to_ptr.vmem [resolvable:$true] %s81_s20 }
  0x47   :  { %s6992_s22 = scalar_lea.vmem %s55_s1, 32768  ;;  %p6997_p3 = scmp.lt.s32.totalorder %s55_s1, %s55_s1 }
  0x48   :  { %p6993_p2 = scmp.ne.s32.totalorder %s55_s1, %s6992_s22  ;;  %p6998_p4 = scmp.lt.s32.totalorder %s6992_s22, %s6992_s22 }
  0x4a   :  { %p6999_p5 = por %p6998_p4, %p6997_p3 }
  0x4c   :  { %p7000_p6 = pnand %p6999_p5, %p6993_p2 }
  0x4e   :  { %7003 = shalt.err (!%p7000_p6)
}
  0x4f   :  { %60 = dma.hbm_to_vmem [thread:$0]  %s7410_s2, 32768, %s55_s1, [#allocation6], %s7148_s6, %s7148_s6, %s7149_s30  }
  0x50   :  { %s7012_s21 = scalar_lea.vmem %s82_s20, 32  ;;  %p7017_p8 = scmp.lt.s32.totalorder %s82_s20, %s82_s20 }
  0x51   :  { %p7013_p7 = scmp.ne.s32.totalorder %s82_s20, %s7012_s21  ;;  %p7018_p9 = scmp.lt.s32.totalorder %s7012_s21, %s7012_s21 }
  0x53   :  { %p7019_p10 = por %p7018_p9, %p7017_p8 }
  0x55   :  { %p7020_p11 = pnand %p7019_p10, %p7013_p7 }
  0x57   :  { %7023 = shalt.err (!%p7020_p11)
}
  0x58   :  { %84 = dma.hbm_to_vmem [thread:$0]  %s7413_s5, 32, %s82_s20, [#allocation9]  }
  0x59   :  { %s7152_s24 = smov [#allocation13]   ;;  %s7153_s28 = smov [#allocation16]  }
  0x5a   :  { %s103_s25 = sshll.u32 %s7152_s24, 4  ;;  %s125_s29 = sshll.u32 %s7153_s28, 4  ;;  %s104_s25 = int_to_ptr.vmem [resolvable:$true] %s103_s25  ;;  %s126_s29 = int_to_ptr.vmem [resolvable:$true] %s125_s29 }
  0x5b   :  { %s7032_s16 = scalar_lea.vmem %s104_s25, 32  ;;  %p7037_p13 = scmp.lt.s32.totalorder %s104_s25, %s104_s25 }
  0x5c   :  { %p7033_p12 = scmp.ne.s32.totalorder %s104_s25, %s7032_s16  ;;  %p7038_p0 = scmp.lt.s32.totalorder %s7032_s16, %s7032_s16 }
  0x5e   :  { %p7039_p1 = por %p7038_p0, %p7037_p13 }
  0x60   :  { %p7040_p2 = pnand %p7039_p1, %p7033_p12 }
  0x62   :  { %7043 = shalt.err (!%p7040_p2)
}
  0x63   :  { %106 = dma.hbm_to_vmem [thread:$0]  %s7415_s7, 32, %s104_s25, [#allocation12]  }
  0x64   :  { %s7052_s30 = scalar_lea.vmem %s126_s29, 32  ;;  %p7057_p4 = scmp.lt.s32.totalorder %s126_s29, %s126_s29 }
  0x65   :  { %p7053_p3 = scmp.ne.s32.totalorder %s126_s29, %s7052_s30  ;;  %p7058_p5 = scmp.lt.s32.totalorder %s7052_s30, %s7052_s30 }
  0x67   :  { %p7059_p6 = por %p7058_p5, %p7057_p4 }
  0x69   :  { %p7060_p7 = pnand %p7059_p6, %p7053_p3 }
  0x6b   :  { %7063 = shalt.err (!%p7060_p7)
}
  0x6c   :  { %128 = dma.hbm_to_vmem [thread:$0]  %s7417_s9, 32, %s126_s29, [#allocation15]  }
  0x6d   :  { %s7154_s8 = smov [#allocation19]  }
  0x6e   :  { %s148_s26 = sshll.u32 %s7154_s8, 4  ;;  %s149_s26 = int_to_ptr.vmem [resolvable:$true] %s148_s26 }
  0x6f   :  { %s7072_s27 = scalar_lea.vmem %s149_s26, 32768  ;;  %p7077_p9 = scmp.lt.s32.totalorder %s149_s26, %s149_s26 }
  0x70   :  { %p7073_p8 = scmp.ne.s32.totalorder %s149_s26, %s7072_s27  ;;  %p7078_p10 = scmp.lt.s32.totalorder %s7072_s27, %s7072_s27 }
  0x72   :  { %p7079_p11 = por %p7078_p10, %p7077_p9 }
  0x74   :  { %p7080_p12 = pnand %p7079_p11, %p7073_p8 }
  0x76   :  { %7083 = shalt.err (!%p7080_p12)
}
  0x77   :  { %s7155_s7 = smov 512   ;;  %s7156_s18 = smov 32  }
  0x78   :  { %154 = dma.hbm_to_vmem [thread:$0]  %s7420_s12, 32768, %s149_s26, [#allocation18], %s7155_s7, %s7155_s7, %s7156_s18  }
  0x79   :  { %7124 = dma.done.wait [#allocation3], 1024  }
  0x7a   :  { %7125 = vsyncadd [#allocation3], 4294966272 }
  0x7b   :  { %7126 = dma.done.wait [#allocation6], 32896  }
  0x7c   :  { %7127 = vsyncadd [#allocation6], 4294934400 }
  0x7d   :  { %7128 = dma.done.wait [#allocation9], 8224  }
  0x7e   :  { %7129 = vsyncadd [#allocation9], 4294959072 }
  0x7f   :  { %7130 = dma.done.wait [#allocation12], 4128  }
  0x80   :  { %7131 = vsyncadd [#allocation12], 4294963168 }
  0x81   :  { %7132 = dma.done.wait [#allocation15], 2080  }
  0x82   :  { %7133 = vsyncadd [#allocation15], 4294965216 }
  0x83   :  { %7134 = dma.done.wait [#allocation18], 40960  }
  0x84   :  { %7135 = vsyncadd [#allocation18], 4294926336  ;;  %v6182_v0 = vld [vmem:[#allocation7 + $0xe4] ss:$16 sps:$4 sm:$0xff]   ;;  %v6186_v2 = vld [vmem:[#allocation7 + $0xe0] ss:$16 sps:$4 sm:$0xff]  }
  0x85   :  { %v6184_v1 = vld [vmem:[#allocation7 + $0x2e4] ss:$16 sps:$4 sm:$0xff]   ;;  %1765 = vmatprep.subr.bf16.mxu0 %v6182_v0  ;;  %v6187_v3 = vld [vmem:[#allocation7 + $0x2e0] ss:$16 sps:$4 sm:$0xff]  }
  0x86   :  { %1806 = vmatprep.subr.bf16.mxu1 %v6184_v1  ;;  %v6188_v4 = vld [vmem:[#allocation7 + $0xc4] ss:$16 sps:$4 sm:$0xff]   ;;  %1766 = vmatpush1.bf16.msra.mxu0 %v6186_v2  ;;  %v6192_v6 = vld [vmem:[#allocation7 + $0xc0] ss:$16 sps:$4 sm:$0xff]  }
  0x87   :  { %1807 = vmatpush1.bf16.msra.mxu1 %v6187_v3  ;;  %v6190_v5 = vld [vmem:[#allocation7 + $0x2c4] ss:$16 sps:$4 sm:$0xff]   ;;  %1767 = vmatprep.subr.bf16.mxu0 %v6188_v4  ;;  %v6193_v7 = vld [vmem:[#allocation7 + $0x2c0] ss:$16 sps:$4 sm:$0xff]   ;;  %v191_v4 = vld [vmem:[#allocation2] sm:$0xff] }
  0x88   :  { %1808 = vmatprep.subr.bf16.mxu1 %v6190_v5  ;;  %v6194_v8 = vld [vmem:[#allocation7 + $0xa4] ss:$16 sps:$4 sm:$0xff]   ;;  %v6198_v10 = vld [vmem:[#allocation7 + $0xa0] ss:$16 sps:$4 sm:$0xff]   ;;  %v193_v5 = vld [vmem:[#allocation2 + $0x10] sm:$0xff] }
  0x89   :  { %v6196_v9 = vld [vmem:[#allocation7 + $0x2a4] ss:$16 sps:$4 sm:$0xff]   ;;  %v6199_v11 = vld [vmem:[#allocation7 + $0x2a0] ss:$16 sps:$4 sm:$0xff]  }
  0x8a   :  { %1768 = vmatpush1.bf16.msra.mxu0 %v6192_v6  ;;  %v6200_v12 = vld [vmem:[#allocation7 + $0x84] ss:$16 sps:$4 sm:$0xff]   ;;  %v6204_v14 = vld [vmem:[#allocation7 + $0x80] ss:$16 sps:$4 sm:$0xff]  }
  0x8b   :  { %1809 = vmatpush1.bf16.msra.mxu1 %v6193_v7  ;;  %1769 = vmatprep.subr.bf16.mxu0 %v6194_v8  ;;  %v6202_v13 = vld [vmem:[#allocation7 + $0x284] ss:$16 sps:$4 sm:$0xff]   ;;  %v6205_v15 = vld [vmem:[#allocation7 + $0x280] ss:$16 sps:$4 sm:$0xff]   ;;  %v7279_v8 = vpack.c.bf16 %v191_v4, %v191_v4 }
  0x8c   :  { %1810 = vmatprep.subr.bf16.mxu1 %v6196_v9  ;;  %v6206_v16 = vld [vmem:[#allocation7 + $0x64] ss:$16 sps:$4 sm:$0xff]   ;;  %v6210_v18 = vld [vmem:[#allocation7 + $0x60] ss:$16 sps:$4 sm:$0xff]   ;;  %v7281_v9 = vpack.c.bf16 %v193_v5, %v193_v5 }
  0x8d   :  { %v6208_v17 = vld [vmem:[#allocation7 + $0x264] ss:$16 sps:$4 sm:$0xff]   ;;  %v6211_v19 = vld [vmem:[#allocation7 + $0x260] ss:$16 sps:$4 sm:$0xff]  }
  0x8e   :  { %1770 = vmatpush1.bf16.msra.mxu0 %v6198_v10  ;;  %v6212_v20 = vld [vmem:[#allocation7 + $0x44] ss:$16 sps:$4 sm:$0xff]   ;;  %v6216_v22 = vld [vmem:[#allocation7 + $0x40] ss:$16 sps:$4 sm:$0xff]  }
  0x8f   :  { %1811 = vmatpush1.bf16.msra.mxu1 %v6199_v11  ;;  %1771 = vmatprep.subr.bf16.mxu0 %v6200_v12  ;;  %v6214_v21 = vld [vmem:[#allocation7 + $0x244] ss:$16 sps:$4 sm:$0xff]   ;;  %v6217_v23 = vld [vmem:[#allocation7 + $0x240] ss:$16 sps:$4 sm:$0xff]  }
  0x90   :  { %1812 = vmatprep.subr.bf16.mxu1 %v6202_v13  ;;  %v6218_v24 = vld [vmem:[#allocation7 + $0x24] ss:$16 sps:$4 sm:$0xff]   ;;  %v6222_v26 = vld [vmem:[#allocation7 + $0x20] ss:$16 sps:$4 sm:$0xff]  }
  0x91   :  { %v6220_v25 = vld [vmem:[#allocation7 + $0x224] ss:$16 sps:$4 sm:$0xff]   ;;  %v6223_v27 = vld [vmem:[#allocation7 + $0x220] ss:$16 sps:$4 sm:$0xff]  }
  0x92   :  { %1772 = vmatpush1.bf16.msra.mxu0 %v6204_v14  ;;  %v6224_v28 = vld [vmem:[#allocation7 + $0x4] ss:$16 sps:$4 sm:$0xff]   ;;  %v6228_v30 = vld [vmem:[#allocation7] ss:$16 sps:$4 sm:$0xff]  }
  0x93   :  { %1813 = vmatpush1.bf16.msra.mxu1 %v6205_v15  ;;  %1773 = vmatprep.subr.bf16.mxu0 %v6206_v16  ;;  %v6226_v29 = vld [vmem:[#allocation7 + $0x204] ss:$16 sps:$4 sm:$0xff]   ;;  %v6229_v31 = vld [vmem:[#allocation7 + $0x200] ss:$16 sps:$4 sm:$0xff]  }
  0x94   :  { %1814 = vmatprep.subr.bf16.mxu1 %v6208_v17  ;;  %v6230_v32 = vld [vmem:[#allocation7 + $0x1e4] ss:$16 sps:$4 sm:$0xff]   ;;  %v6234_v34 = vld [vmem:[#allocation7 + $0x1e0] ss:$16 sps:$4 sm:$0xff]  }
  0x95   :  { %v6232_v33 = vld [vmem:[#allocation7 + $0x3e4] ss:$16 sps:$4 sm:$0xff]   ;;  %v6235_v35 = vld [vmem:[#allocation7 + $0x3e0] ss:$16 sps:$4 sm:$0xff]  }
  0x96   :  { %1774 = vmatpush1.bf16.msra.mxu0 %v6210_v18  ;;  %v6236_v36 = vld [vmem:[#allocation7 + $0x1c4] ss:$16 sps:$4 sm:$0xff]   ;;  %v6240_v38 = vld [vmem:[#allocation7 + $0x1c0] ss:$16 sps:$4 sm:$0xff]  }
  0x97   :  { %1815 = vmatpush1.bf16.msra.mxu1 %v6211_v19  ;;  %1775 = vmatprep.subr.bf16.mxu0 %v6212_v20  ;;  %v6238_v37 = vld [vmem:[#allocation7 + $0x3c4] ss:$16 sps:$4 sm:$0xff]   ;;  %v6241_v39 = vld [vmem:[#allocation7 + $0x3c0] ss:$16 sps:$4 sm:$0xff]  }
  0x98   :  { %1816 = vmatprep.subr.bf16.mxu1 %v6214_v21  ;;  %v6242_v40 = vld [vmem:[#allocation7 + $0x1a4] ss:$16 sps:$4 sm:$0xff]   ;;  %v6246_v42 = vld [vmem:[#allocation7 + $0x1a0] ss:$16 sps:$4 sm:$0xff]  }
  0x99   :  { %v6244_v41 = vld [vmem:[#allocation7 + $0x3a4] ss:$16 sps:$4 sm:$0xff]   ;;  %v6247_v43 = vld [vmem:[#allocation7 + $0x3a0] ss:$16 sps:$4 sm:$0xff]  }
  0x9a   :  { %1776 = vmatpush1.bf16.msra.mxu0 %v6216_v22  ;;  %v6248_v44 = vld [vmem:[#allocation7 + $0x184] ss:$16 sps:$4 sm:$0xff]   ;;  %v6252_v47 = vld [vmem:[#allocation7 + $0x180] ss:$16 sps:$4 sm:$0xff]  }
  0x9b   :  { %1817 = vmatpush1.bf16.msra.mxu1 %v6217_v23  ;;  %1777 = vmatprep.subr.bf16.mxu0 %v6218_v24  ;;  %v6250_v45 = vld [vmem:[#allocation7 + $0x384] ss:$16 sps:$4 sm:$0xff]   ;;  %v6253_v48 = vld [vmem:[#allocation7 + $0x380] ss:$16 sps:$4 sm:$0xff]  }
  0x9c   :  { %1818 = vmatprep.subr.bf16.mxu1 %v6220_v25  ;;  %v192_v46 = vld [vmem:[#allocation2 + $0x8] sm:$0xff]  ;;  %v194_v50 = vld [vmem:[#allocation2 + $0x18] sm:$0xff] }
  0x9d   :  { %v7273_v49 = vpack.c.bf16 %v192_v46, %v192_v46  ;;  %v6254_v51 = vld [vmem:[#allocation7 + $0x164] ss:$16 sps:$4 sm:$0xff]   ;;  %v7275_v52 = vpack.c.bf16 %v194_v50, %v194_v50  ;;  %v6258_v54 = vld [vmem:[#allocation7 + $0x160] ss:$16 sps:$4 sm:$0xff]  }
  0x9e   :  { %1778 = vmatpush1.bf16.msra.mxu0 %v6222_v26  ;;  %v6256_v53 = vld [vmem:[#allocation7 + $0x364] ss:$16 sps:$4 sm:$0xff]   ;;  %v6259_v55 = vld [vmem:[#allocation7 + $0x360] ss:$16 sps:$4 sm:$0xff]  }
  0x9f   :  { %1819 = vmatpush1.bf16.msra.mxu1 %v6223_v27  ;;  %1779 = vmatprep.subr.bf16.mxu0 %v6224_v28  ;;  %v6260_v56 = vld [vmem:[#allocation7 + $0x144] ss:$16 sps:$4 sm:$0xff]   ;;  %v6264_v58 = vld [vmem:[#allocation7 + $0x140] ss:$16 sps:$4 sm:$0xff]  }
  0xa0   :  { %1820 = vmatprep.subr.bf16.mxu1 %v6226_v29  ;;  %1797 = vmatprep.mubr.bf16.mxu0 %v7273_v49  ;;  %v6262_v57 = vld [vmem:[#allocation7 + $0x344] ss:$16 sps:$4 sm:$0xff]   ;;  %v6265_v59 = vld [vmem:[#allocation7 + $0x340] ss:$16 sps:$4 sm:$0xff]  }
  0xa1   :  { %1838 = vmatprep.mubr.bf16.mxu1 %v7275_v52  ;;  %v6266_v60 = vld [vmem:[#allocation7 + $0x124] ss:$16 sps:$4 sm:$0xff]   ;;  %v6270_v62 = vld [vmem:[#allocation7 + $0x120] ss:$16 sps:$4 sm:$0xff]  }
  0xa2   :  { %1780 = vmatpush1.bf16.msra.mxu0 %v6228_v30  ;;  %v6268_v61 = vld [vmem:[#allocation7 + $0x324] ss:$16 sps:$4 sm:$0xff]   ;;  %v6271_v63 = vld [vmem:[#allocation7 + $0x320] ss:$16 sps:$4 sm:$0xff]  }
  0xa3   :  { %1821 = vmatpush1.bf16.msra.mxu1 %v6229_v31  ;;  %1781 = vmatprep.subr.bf16.mxu0 %v6230_v32  ;;  %v6272_v0 = vld [vmem:[#allocation7 + $0x104] ss:$16 sps:$4 sm:$0xff]   ;;  %v6276_v2 = vld [vmem:[#allocation7 + $0x100] ss:$16 sps:$4 sm:$0xff]  }
  0xa4   :  { %1822 = vmatprep.subr.bf16.mxu1 %v6232_v33  ;;  %v6274_v1 = vld [vmem:[#allocation7 + $0x304] ss:$16 sps:$4 sm:$0xff]   ;;  %v6277_v3 = vld [vmem:[#allocation7 + $0x300] ss:$16 sps:$4 sm:$0xff]  }
  0xa5   :  { %v6280_v6 = vld [vmem:[#allocation7 + $0x4e4] ss:$16 sps:$4 sm:$0xff]   ;;  %v6278_v10 = vld [vmem:[#allocation7 + $0x4e0] ss:$16 sps:$4 sm:$0xff]  }
  0xa6   :  { %1782 = vmatpush2.bf16.msra.mxu0 %v6234_v34  ;;  %v6283_v7 = vld [vmem:[#allocation7 + $0x6e4] ss:$16 sps:$4 sm:$0xff]   ;;  %v6281_v11 = vld [vmem:[#allocation7 + $0x6e0] ss:$16 sps:$4 sm:$0xff]  }
  0xa7   :  { %1823 = vmatpush2.bf16.msra.mxu1 %v6235_v35  ;;  %1783 = vmatprep.subr.bf16.mxu0 %v6236_v36  ;;  %v6286_v12 = vld [vmem:[#allocation7 + $0x4c4] ss:$16 sps:$4 sm:$0xff]   ;;  %v6284_v14 = vld [vmem:[#allocation7 + $0x4c0] ss:$16 sps:$4 sm:$0xff]  }
  0xa8   :  { %1824 = vmatprep.subr.bf16.mxu1 %v6238_v37  ;;  %v6289_v13 = vld [vmem:[#allocation7 + $0x6c4] ss:$16 sps:$4 sm:$0xff]   ;;  %v6287_v15 = vld [vmem:[#allocation7 + $0x6c0] ss:$16 sps:$4 sm:$0xff]  }
  0xa9   :  { %v6292_v16 = vld [vmem:[#allocation7 + $0x4a4] ss:$16 sps:$4 sm:$0xff]   ;;  %v6290_v18 = vld [vmem:[#allocation7 + $0x4a0] ss:$16 sps:$4 sm:$0xff]  }
  0xaa   :  { %1784 = vmatpush2.bf16.msra.mxu0 %v6240_v38  ;;  %v6295_v17 = vld [vmem:[#allocation7 + $0x6a4] ss:$16 sps:$4 sm:$0xff]   ;;  %v6293_v19 = vld [vmem:[#allocation7 + $0x6a0] ss:$16 sps:$4 sm:$0xff]  }
  0xab   :  { %1825 = vmatpush2.bf16.msra.mxu1 %v6241_v39  ;;  %1785 = vmatprep.subr.bf16.mxu0 %v6242_v40  ;;  %v6298_v20 = vld [vmem:[#allocation7 + $0x484] ss:$16 sps:$4 sm:$0xff]   ;;  %v6296_v22 = vld [vmem:[#allocation7 + $0x480] ss:$16 sps:$4 sm:$0xff]  }
  0xac   :  { %1826 = vmatprep.subr.bf16.mxu1 %v6244_v41  ;;  %v6301_v21 = vld [vmem:[#allocation7 + $0x684] ss:$16 sps:$4 sm:$0xff]   ;;  %v6299_v23 = vld [vmem:[#allocation7 + $0x680] ss:$16 sps:$4 sm:$0xff]  }
  0xad   :  { %v6304_v24 = vld [vmem:[#allocation7 + $0x464] ss:$16 sps:$4 sm:$0xff]   ;;  %v6302_v26 = vld [vmem:[#allocation7 + $0x460] ss:$16 sps:$4 sm:$0xff]  }
  0xae   :  { %1786 = vmatpush2.bf16.msra.mxu0 %v6246_v42  ;;  %v6307_v25 = vld [vmem:[#allocation7 + $0x664] ss:$16 sps:$4 sm:$0xff]   ;;  %v6305_v27 = vld [vmem:[#allocation7 + $0x660] ss:$16 sps:$4 sm:$0xff]  }
  0xaf   :  { %1827 = vmatpush2.bf16.msra.mxu1 %v6247_v43  ;;  %1787 = vmatprep.subr.bf16.mxu0 %v6248_v44  ;;  %v6310_v28 = vld [vmem:[#allocation7 + $0x444] ss:$16 sps:$4 sm:$0xff]   ;;  %v6308_v30 = vld [vmem:[#allocation7 + $0x440] ss:$16 sps:$4 sm:$0xff]  }
  0xb0   :  { %1828 = vmatprep.subr.bf16.mxu1 %v6250_v45  ;;  %v6313_v29 = vld [vmem:[#allocation7 + $0x644] ss:$16 sps:$4 sm:$0xff]   ;;  %v6311_v31 = vld [vmem:[#allocation7 + $0x640] ss:$16 sps:$4 sm:$0xff]  }
  0xb1   :  { %v6316_v32 = vld [vmem:[#allocation7 + $0x424] ss:$16 sps:$4 sm:$0xff]   ;;  %v6314_v35 = vld [vmem:[#allocation7 + $0x420] ss:$16 sps:$4 sm:$0xff]  }
  0xb2   :  { %1788 = vmatpush2.bf16.msra.mxu0 %v6252_v47  ;;  %v6319_v33 = vld [vmem:[#allocation7 + $0x624] ss:$16 sps:$4 sm:$0xff]   ;;  %v6317_v36 = vld [vmem:[#allocation7 + $0x620] ss:$16 sps:$4 sm:$0xff]  }
  0xb3   :  { %1829 = vmatpush2.bf16.msra.mxu1 %v6253_v48  ;;  %1789 = vmatprep.subr.bf16.mxu0 %v6254_v51  ;;  %v196_v34 = vld [vmem:[#allocation2 + $0x28] sm:$0xff]  ;;  %v198_v38 = vld [vmem:[#allocation2 + $0x38] sm:$0xff] }
  0xb4   :  { %1830 = vmatprep.subr.bf16.mxu1 %v6256_v53  ;;  %v7285_v37 = vpack.c.bf16 %v196_v34, %v196_v34  ;;  %v6322_v39 = vld [vmem:[#allocation7 + $0x404] ss:$16 sps:$4 sm:$0xff]   ;;  %v7287_v40 = vpack.c.bf16 %v198_v38, %v198_v38  ;;  %v6320_v42 = vld [vmem:[#allocation7 + $0x400] ss:$16 sps:$4 sm:$0xff]   ;;  %v6392_v34 = vld [vmem:[#allocation7 + $0x88] ss:$16 sps:$4 sm:$0xff]  }
  0xb5   :  { %v6325_v41 = vld [vmem:[#allocation7 + $0x604] ss:$16 sps:$4 sm:$0xff]   ;;  %v6323_v43 = vld [vmem:[#allocation7 + $0x600] ss:$16 sps:$4 sm:$0xff]   ;;  %v6403_v38 = vld [vmem:[#allocation7 + $0x26c] ss:$16 sps:$4 sm:$0xff]  }
  0xb6   :  { %1790 = vmatpush2.bf16.msra.mxu0 %v6258_v54  ;;  %v6328_v44 = vld [vmem:[#allocation7 + $0x5e4] ss:$16 sps:$4 sm:$0xff]   ;;  %v6326_v46 = vld [vmem:[#allocation7 + $0x5e0] ss:$16 sps:$4 sm:$0xff]  }
  0xb7   :  { %1831 = vmatpush2.bf16.msra.mxu1 %v6259_v55  ;;  %1791 = vmatprep.subr.bf16.mxu0 %v6260_v56  ;;  %v6331_v45 = vld [vmem:[#allocation7 + $0x7e4] ss:$16 sps:$4 sm:$0xff]   ;;  %v6329_v47 = vld [vmem:[#allocation7 + $0x7e0] ss:$16 sps:$4 sm:$0xff]  }
  0xb8   :  { %1832 = vmatprep.subr.bf16.mxu1 %v6262_v57  ;;  %v6334_v48 = vld [vmem:[#allocation7 + $0x5c4] ss:$16 sps:$4 sm:$0xff]   ;;  %v6332_v51 = vld [vmem:[#allocation7 + $0x5c0] ss:$16 sps:$4 sm:$0xff]  }
  0xb9   :  { %v6337_v50 = vld [vmem:[#allocation7 + $0x7c4] ss:$16 sps:$4 sm:$0xff]   ;;  %v6335_v53 = vld [vmem:[#allocation7 + $0x7c0] ss:$16 sps:$4 sm:$0xff]  }
  0xba   :  { %1792 = vmatpush2.bf16.msra.mxu0 %v6264_v58  ;;  %v6340_v54 = vld [vmem:[#allocation7 + $0x5a4] ss:$16 sps:$4 sm:$0xff]   ;;  %v6338_v56 = vld [vmem:[#allocation7 + $0x5a0] ss:$16 sps:$4 sm:$0xff]  }
  0xbb   :  { %1833 = vmatpush2.bf16.msra.mxu1 %v6265_v59  ;;  %1793 = vmatprep.subr.bf16.mxu0 %v6266_v60  ;;  %v6343_v55 = vld [vmem:[#allocation7 + $0x7a4] ss:$16 sps:$4 sm:$0xff]   ;;  %v6341_v57 = vld [vmem:[#allocation7 + $0x7a0] ss:$16 sps:$4 sm:$0xff]  }
  0xbc   :  { %1834 = vmatprep.subr.bf16.mxu1 %v6268_v61  ;;  %v6346_v58 = vld [vmem:[#allocation7 + $0x584] ss:$16 sps:$4 sm:$0xff]   ;;  %v6344_v60 = vld [vmem:[#allocation7 + $0x580] ss:$16 sps:$4 sm:$0xff]  }
  0xbd   :  { %v6349_v59 = vld [vmem:[#allocation7 + $0x784] ss:$16 sps:$4 sm:$0xff]   ;;  %v6347_v61 = vld [vmem:[#allocation7 + $0x780] ss:$16 sps:$4 sm:$0xff]  }
  0xbe   :  { %1794 = vmatpush2.bf16.msra.mxu0 %v6270_v62  ;;  %v6352_v62 = vld [vmem:[#allocation7 + $0x564] ss:$16 sps:$4 sm:$0xff]   ;;  %v6356_v4 = vld [vmem:[#allocation7 + $0x540] ss:$16 sps:$4 sm:$0xff]  }
  0xbf   :  { %1835 = vmatpush2.bf16.msra.mxu1 %v6271_v63  ;;  %1795 = vmatprep.subr.bf16.mxu0 %v6272_v0  ;;  %v6355_v63 = vld [vmem:[#allocation7 + $0x764] ss:$16 sps:$4 sm:$0xff]   ;;  %v6350_v0 = vld [vmem:[#allocation7 + $0x560] ss:$16 sps:$4 sm:$0xff]  }
  0xc0   :  { %1836 = vmatprep.subr.bf16.mxu1 %v6274_v1  ;;  %v6353_v1 = vld [vmem:[#allocation7 + $0x760] ss:$16 sps:$4 sm:$0xff]  }
  0xc1   :  { %v6359_v5 = vld [vmem:[#allocation7 + $0x740] ss:$16 sps:$4 sm:$0xff]  }
  0xc2   :  { %1796 = vmatpush2.bf16.msra.mxu0 %v6276_v2  ;;  %v6358_v2 = vld [vmem:[#allocation7 + $0x544] ss:$16 sps:$4 sm:$0xff]  }
  0xc3   :  { %1837 = vmatpush2.bf16.msra.mxu1 %v6277_v3  ;;  %1847 = vmatprep.subr.bf16.mxu0 %v6280_v6  ;;  %v6361_v3 = vld [vmem:[#allocation7 + $0x744] ss:$16 sps:$4 sm:$0xff]  }
  0xc4   :  { %1888 = vmatprep.subr.bf16.mxu1 %v6283_v7  ;;  %v6364_v6 = vld [vmem:[#allocation7 + $0x524] ss:$16 sps:$4 sm:$0xff]  }
  0xc5   :  { %1798 = vmatmul.mubr.bf16.vlgmr.msra.gmra.mxu0 %v7279_v8  ;;  %v6367_v7 = vld [vmem:[#allocation7 + $0x724] ss:$16 sps:$4 sm:$0xff]  }
  0xc6   :  { %1839 = vmatmul.mubr.bf16.vlgmr.msra.gmra.mxu1 %v7281_v9  ;;  %1848 = vmatpush1.bf16.msra.mxu0 %v6278_v10  ;;  %v6362_v10 = vld [vmem:[#allocation7 + $0x520] ss:$16 sps:$4 sm:$0xff]  }
  0xc7   :  { %1889 = vmatpush1.bf16.msra.mxu1 %v6281_v11  ;;  %1849 = vmatprep.subr.bf16.mxu0 %v6286_v12  ;;  %v6365_v11 = vld [vmem:[#allocation7 + $0x720] ss:$16 sps:$4 sm:$0xff]   ;;  %v6370_v12 = vld [vmem:[#allocation7 + $0x504] ss:$16 sps:$4 sm:$0xff]  }
  0xc8   :  { %1890 = vmatprep.subr.bf16.mxu1 %v6289_v13  ;;  %1879 = vmatprep.mubr.bf16.mxu0 %v7285_v37  ;;  %v6373_v13 = vld [vmem:[#allocation7 + $0x704] ss:$16 sps:$4 sm:$0xff]  }
  0xc9   :  { %1920 = vmatprep.mubr.bf16.mxu1 %v7287_v40 }
  0xca   :  { %1850 = vmatpush1.bf16.msra.mxu0 %v6284_v14  ;;  %v6368_v14 = vld [vmem:[#allocation7 + $0x500] ss:$16 sps:$4 sm:$0xff]  }
  0xcb   :  { %1891 = vmatpush1.bf16.msra.mxu1 %v6287_v15  ;;  %1851 = vmatprep.subr.bf16.mxu0 %v6292_v16  ;;  %v6371_v15 = vld [vmem:[#allocation7 + $0x700] ss:$16 sps:$4 sm:$0xff]   ;;  %v195_v16 = vld [vmem:[#allocation2 + $0x20] sm:$0xff] }
  0xcc   :  { %1892 = vmatprep.subr.bf16.mxu1 %v6295_v17  ;;  %v197_v17 = vld [vmem:[#allocation2 + $0x30] sm:$0xff] }
  0xce   :  { %1852 = vmatpush1.bf16.msra.mxu0 %v6290_v18  ;;  %v6376_v18 = vld [vmem:[#allocation7 + $0xec] ss:$16 sps:$4 sm:$0xff]  }
  0xcf   :  { %1893 = vmatpush1.bf16.msra.mxu1 %v6293_v19  ;;  %1853 = vmatprep.subr.bf16.mxu0 %v6298_v20  ;;  %v6379_v19 = vld [vmem:[#allocation7 + $0x2ec] ss:$16 sps:$4 sm:$0xff]   ;;  %v7291_v20 = vpack.c.bf16 %v195_v16, %v195_v16 }
  0xd0   :  { %1894 = vmatprep.subr.bf16.mxu1 %v6301_v21  ;;  %v7293_v21 = vpack.c.bf16 %v197_v17, %v197_v17  ;;  %v6460_v16 = vld [vmem:[#allocation7 + $0x12c] ss:$16 sps:$4 sm:$0xff]  }
  0xd1   :  { %v6463_v17 = vld [vmem:[#allocation7 + $0x32c] ss:$16 sps:$4 sm:$0xff]  }
  0xd2   :  { %1854 = vmatpush1.bf16.msra.mxu0 %v6296_v22  ;;  %v6374_v22 = vld [vmem:[#allocation7 + $0xe8] ss:$16 sps:$4 sm:$0xff]  }
  0xd3   :  { %1895 = vmatpush1.bf16.msra.mxu1 %v6299_v23  ;;  %1855 = vmatprep.subr.bf16.mxu0 %v6304_v24  ;;  %v6377_v23 = vld [vmem:[#allocation7 + $0x2e8] ss:$16 sps:$4 sm:$0xff]   ;;  %v6382_v24 = vld [vmem:[#allocation7 + $0xcc] ss:$16 sps:$4 sm:$0xff]  }
  0xd4   :  { %1896 = vmatprep.subr.bf16.mxu1 %v6307_v25  ;;  %v6385_v25 = vld [vmem:[#allocation7 + $0x2cc] ss:$16 sps:$4 sm:$0xff]  }
  0xd6   :  { %1856 = vmatpush1.bf16.msra.mxu0 %v6302_v26  ;;  %v6380_v26 = vld [vmem:[#allocation7 + $0xc8] ss:$16 sps:$4 sm:$0xff]  }
  0xd7   :  { %1897 = vmatpush1.bf16.msra.mxu1 %v6305_v27  ;;  %1857 = vmatprep.subr.bf16.mxu0 %v6310_v28  ;;  %v6383_v27 = vld [vmem:[#allocation7 + $0x2c8] ss:$16 sps:$4 sm:$0xff]   ;;  %v6388_v28 = vld [vmem:[#allocation7 + $0xac] ss:$16 sps:$4 sm:$0xff]  }
  0xd8   :  { %1898 = vmatprep.subr.bf16.mxu1 %v6313_v29  ;;  %v6391_v29 = vld [vmem:[#allocation7 + $0x2ac] ss:$16 sps:$4 sm:$0xff]  }
  0xda   :  { %1858 = vmatpush1.bf16.msra.mxu0 %v6308_v30  ;;  %v6386_v30 = vld [vmem:[#allocation7 + $0xa8] ss:$16 sps:$4 sm:$0xff]  }
  0xdb   :  { %1899 = vmatpush1.bf16.msra.mxu1 %v6311_v31  ;;  %1859 = vmatprep.subr.bf16.mxu0 %v6316_v32  ;;  %v6389_v31 = vld [vmem:[#allocation7 + $0x2a8] ss:$16 sps:$4 sm:$0xff]   ;;  %v6394_v32 = vld [vmem:[#allocation7 + $0x8c] ss:$16 sps:$4 sm:$0xff]  }
  0xdc   :  { %1900 = vmatprep.subr.bf16.mxu1 %v6319_v33  ;;  %v6397_v33 = vld [vmem:[#allocation7 + $0x28c] ss:$16 sps:$4 sm:$0xff]  }
  0xde   :  { %1860 = vmatpush1.bf16.msra.mxu0 %v6314_v35  ;;  %v6395_v35 = vld [vmem:[#allocation7 + $0x288] ss:$16 sps:$4 sm:$0xff]  }
  0xdf   :  { %1901 = vmatpush1.bf16.msra.mxu1 %v6317_v36  ;;  %1861 = vmatprep.subr.bf16.mxu0 %v6322_v39  ;;  %v6400_v36 = vld [vmem:[#allocation7 + $0x6c] ss:$16 sps:$4 sm:$0xff]   ;;  %v6398_v39 = vld [vmem:[#allocation7 + $0x68] ss:$16 sps:$4 sm:$0xff]  }
  0xe0   :  { %1902 = vmatprep.subr.bf16.mxu1 %v6325_v41  ;;  %v6409_v41 = vld [vmem:[#allocation7 + $0x24c] ss:$16 sps:$4 sm:$0xff]  }
  0xe2   :  { %1862 = vmatpush1.bf16.msra.mxu0 %v6320_v42  ;;  %v6404_v42 = vld [vmem:[#allocation7 + $0x48] ss:$16 sps:$4 sm:$0xff]  }
  0xe3   :  { %1903 = vmatpush1.bf16.msra.mxu1 %v6323_v43  ;;  %1863 = vmatprep.subr.bf16.mxu0 %v6328_v44  ;;  %v6407_v43 = vld [vmem:[#allocation7 + $0x248] ss:$16 sps:$4 sm:$0xff]   ;;  %v6412_v44 = vld [vmem:[#allocation7 + $0x2c] ss:$16 sps:$4 sm:$0xff]  }
  0xe4   :  { %1904 = vmatprep.subr.bf16.mxu1 %v6331_v45  ;;  %v6415_v45 = vld [vmem:[#allocation7 + $0x22c] ss:$16 sps:$4 sm:$0xff]  }
  0xe6   :  { %1864 = vmatpush2.bf16.msra.mxu0 %v6326_v46  ;;  %v6410_v46 = vld [vmem:[#allocation7 + $0x28] ss:$16 sps:$4 sm:$0xff]  }
  0xe7   :  { %1905 = vmatpush2.bf16.msra.mxu1 %v6329_v47  ;;  %1865 = vmatprep.subr.bf16.mxu0 %v6334_v48  ;;  %v6413_v47 = vld [vmem:[#allocation7 + $0x228] ss:$16 sps:$4 sm:$0xff]   ;;  %v6418_v48 = vld [vmem:[#allocation7 + $0xc] ss:$16 sps:$4 sm:$0xff]  }
  0xe8   :  { %1906 = vmatprep.subr.bf16.mxu1 %v6337_v50  ;;  %v6421_v50 = vld [vmem:[#allocation7 + $0x20c] ss:$16 sps:$4 sm:$0xff]  }
  0xea   :  { %1866 = vmatpush2.bf16.msra.mxu0 %v6332_v51  ;;  %v6416_v51 = vld [vmem:[#allocation7 + $0x8] ss:$16 sps:$4 sm:$0xff]  }
  0xeb   :  { %1907 = vmatpush2.bf16.msra.mxu1 %v6335_v53  ;;  %1867 = vmatprep.subr.bf16.mxu0 %v6340_v54  ;;  %v6419_v53 = vld [vmem:[#allocation7 + $0x208] ss:$16 sps:$4 sm:$0xff]   ;;  %v6424_v54 = vld [vmem:[#allocation7 + $0x1ec] ss:$16 sps:$4 sm:$0xff]  }
  0xec   :  { %1908 = vmatprep.subr.bf16.mxu1 %v6343_v55  ;;  %v6427_v55 = vld [vmem:[#allocation7 + $0x3ec] ss:$16 sps:$4 sm:$0xff]  }
  0xee   :  { %1868 = vmatpush2.bf16.msra.mxu0 %v6338_v56  ;;  %v6422_v56 = vld [vmem:[#allocation7 + $0x1e8] ss:$16 sps:$4 sm:$0xff]  }
  0xef   :  { %1909 = vmatpush2.bf16.msra.mxu1 %v6341_v57  ;;  %1869 = vmatprep.subr.bf16.mxu0 %v6346_v58  ;;  %v6425_v57 = vld [vmem:[#allocation7 + $0x3e8] ss:$16 sps:$4 sm:$0xff]   ;;  %v6430_v58 = vld [vmem:[#allocation7 + $0x1cc] ss:$16 sps:$4 sm:$0xff]  }
  0xf0   :  { %1910 = vmatprep.subr.bf16.mxu1 %v6349_v59  ;;  %v6433_v59 = vld [vmem:[#allocation7 + $0x3cc] ss:$16 sps:$4 sm:$0xff]  }
  0xf2   :  { %1870 = vmatpush2.bf16.msra.mxu0 %v6344_v60  ;;  %v6428_v60 = vld [vmem:[#allocation7 + $0x1c8] ss:$16 sps:$4 sm:$0xff]  }
  0xf3   :  { %1911 = vmatpush2.bf16.msra.mxu1 %v6347_v61  ;;  %1871 = vmatprep.subr.bf16.mxu0 %v6352_v62  ;;  %v6431_v61 = vld [vmem:[#allocation7 + $0x3c8] ss:$16 sps:$4 sm:$0xff]   ;;  %v6436_v62 = vld [vmem:[#allocation7 + $0x1ac] ss:$16 sps:$4 sm:$0xff]  }
  0xf4   :  { %1912 = vmatprep.subr.bf16.mxu1 %v6355_v63  ;;  %v6439_v63 = vld [vmem:[#allocation7 + $0x3ac] ss:$16 sps:$4 sm:$0xff]  }
  0xf6   :  { %1872 = vmatpush2.bf16.msra.mxu0 %v6350_v0  ;;  %v6434_v0 = vld [vmem:[#allocation7 + $0x1a8] ss:$16 sps:$4 sm:$0xff]  }
  0xf7   :  { %1913 = vmatpush2.bf16.msra.mxu1 %v6353_v1  ;;  %1873 = vmatprep.subr.bf16.mxu0 %v6358_v2  ;;  %v6437_v1 = vld [vmem:[#allocation7 + $0x3a8] ss:$16 sps:$4 sm:$0xff]   ;;  %v6442_v2 = vld [vmem:[#allocation7 + $0x18c] ss:$16 sps:$4 sm:$0xff]  }
  0xf8   :  { %1914 = vmatprep.subr.bf16.mxu1 %v6361_v3  ;;  %v6445_v3 = vld [vmem:[#allocation7 + $0x38c] ss:$16 sps:$4 sm:$0xff]  }
  0xfa   :  { %1874 = vmatpush2.bf16.msra.mxu0 %v6356_v4  ;;  %v6440_v4 = vld [vmem:[#allocation7 + $0x188] ss:$16 sps:$4 sm:$0xff]  }
  0xfb   :  { %1915 = vmatpush2.bf16.msra.mxu1 %v6359_v5  ;;  %1875 = vmatprep.subr.bf16.mxu0 %v6364_v6  ;;  %v6443_v5 = vld [vmem:[#allocation7 + $0x388] ss:$16 sps:$4 sm:$0xff]   ;;  %v6448_v6 = vld [vmem:[#allocation7 + $0x16c] ss:$16 sps:$4 sm:$0xff]  }
  0xfc   :  { %1916 = vmatprep.subr.bf16.mxu1 %v6367_v7  ;;  %v6451_v7 = vld [vmem:[#allocation7 + $0x36c] ss:$16 sps:$4 sm:$0xff]  }
  0xfe   :  { %1876 = vmatpush2.bf16.msra.mxu0 %v6362_v10  ;;  %v6446_v10 = vld [vmem:[#allocation7 + $0x168] ss:$16 sps:$4 sm:$0xff]  }
  0xff   :  { %1917 = vmatpush2.bf16.msra.mxu1 %v6365_v11  ;;  %1877 = vmatprep.subr.bf16.mxu0 %v6370_v12  ;;  %v6449_v11 = vld [vmem:[#allocation7 + $0x368] ss:$16 sps:$4 sm:$0xff]   ;;  %v6454_v12 = vld [vmem:[#allocation7 + $0x14c] ss:$16 sps:$4 sm:$0xff]  }
 0x100   :  { %1918 = vmatprep.subr.bf16.mxu1 %v6373_v13  ;;  %v6457_v13 = vld [vmem:[#allocation7 + $0x34c] ss:$16 sps:$4 sm:$0xff]  }
 0x102   :  { %1878 = vmatpush2.bf16.msra.mxu0 %v6368_v14  ;;  %v6452_v14 = vld [vmem:[#allocation7 + $0x148] ss:$16 sps:$4 sm:$0xff]  }
 0x103   :  { %1919 = vmatpush2.bf16.msra.mxu1 %v6371_v15  ;;  %1929 = vmatprep.subr.bf16.mxu0 %v6376_v18  ;;  %v6455_v15 = vld [vmem:[#allocation7 + $0x348] ss:$16 sps:$4 sm:$0xff]  }
 0x104   :  { %1970 = vmatprep.subr.bf16.mxu1 %v6379_v19  ;;  %v6458_v18 = vld [vmem:[#allocation7 + $0x128] ss:$16 sps:$4 sm:$0xff]  }
 0x105   :  { %1880 = vmatmul.mubr.bf16.vlgmr.msra.gmra.mxu0 %v7291_v20  ;;  %v6461_v19 = vld [vmem:[#allocation7 + $0x328] ss:$16 sps:$4 sm:$0xff]  }
 0x106   :  { %1921 = vmatmul.mubr.bf16.vlgmr.msra.gmra.mxu1 %v7293_v21  ;;  %1930 = vmatpush1.bf16.msra.mxu0 %v6374_v22  ;;  %v6466_v22 = vld [vmem:[#allocation7 + $0x10c] ss:$16 sps:$4 sm:$0xff]  }
 0x107   :  { %1971 = vmatpush1.bf16.msra.mxu1 %v6377_v23  ;;  %1931 = vmatprep.subr.bf16.mxu0 %v6382_v24  ;;  %v6469_v23 = vld [vmem:[#allocation7 + $0x30c] ss:$16 sps:$4 sm:$0xff]   ;;  %v6464_v24 = vld [vmem:[#allocation7 + $0x108] ss:$16 sps:$4 sm:$0xff]  }
 0x108   :  { %1972 = vmatprep.subr.bf16.mxu1 %v6385_v25  ;;  %1961 = vmatprep.mubr.bf16.mxu0 %v7273_v49  ;;  %v6401_v49 = vld [vmem:[#allocation7 + $0x268] ss:$16 sps:$4 sm:$0xff]  }
 0x109   :  { %2002 = vmatprep.mubr.bf16.mxu1 %v7275_v52  ;;  %v6406_v52 = vld [vmem:[#allocation7 + $0x4c] ss:$16 sps:$4 sm:$0xff]   ;;  %v6467_v25 = vld [vmem:[#allocation7 + $0x308] ss:$16 sps:$4 sm:$0xff]  }
 0x10a   :  { %1932 = vmatpush1.bf16.msra.mxu0 %v6380_v26  ;;  %v6472_v26 = vld [vmem:[#allocation7 + $0x4ec] ss:$16 sps:$4 sm:$0xff]  }
 0x10b   :  { %1973 = vmatpush1.bf16.msra.mxu1 %v6383_v27  ;;  %1933 = vmatprep.subr.bf16.mxu0 %v6388_v28  ;;  %v6475_v27 = vld [vmem:[#allocation7 + $0x6ec] ss:$16 sps:$4 sm:$0xff]   ;;  %v6470_v28 = vld [vmem:[#allocation7 + $0x4e8] ss:$16 sps:$4 sm:$0xff]  }
 0x10c   :  { %1974 = vmatprep.subr.bf16.mxu1 %v6391_v29  ;;  %v6473_v29 = vld [vmem:[#allocation7 + $0x6e8] ss:$16 sps:$4 sm:$0xff]  }
 0x10e   :  { %1934 = vmatpush1.bf16.msra.mxu0 %v6386_v30  ;;  %v6478_v30 = vld [vmem:[#allocation7 + $0x4cc] ss:$16 sps:$4 sm:$0xff]  }
 0x10f   :  { %1975 = vmatpush1.bf16.msra.mxu1 %v6389_v31  ;;  %1935 = vmatprep.subr.bf16.mxu0 %v6394_v32  ;;  %v6481_v31 = vld [vmem:[#allocation7 + $0x6cc] ss:$16 sps:$4 sm:$0xff]   ;;  %v6476_v32 = vld [vmem:[#allocation7 + $0x4c8] ss:$16 sps:$4 sm:$0xff]  }
 0x110   :  { %1976 = vmatprep.subr.bf16.mxu1 %v6397_v33  ;;  %v6479_v33 = vld [vmem:[#allocation7 + $0x6c8] ss:$16 sps:$4 sm:$0xff]  }
 0x112   :  { %1936 = vmatpush1.bf16.msra.mxu0 %v6392_v34  ;;  %v6484_v34 = vld [vmem:[#allocation7 + $0x4ac] ss:$16 sps:$4 sm:$0xff]  }
 0x113   :  { %1977 = vmatpush1.bf16.msra.mxu1 %v6395_v35  ;;  %1937 = vmatprep.subr.bf16.mxu0 %v6400_v36  ;;  %v6487_v35 = vld [vmem:[#allocation7 + $0x6ac] ss:$16 sps:$4 sm:$0xff]   ;;  %v6482_v36 = vld [vmem:[#allocation7 + $0x4a8] ss:$16 sps:$4 sm:$0xff]  }
 0x114   :  { %1978 = vmatprep.subr.bf16.mxu1 %v6403_v38  ;;  %v6485_v38 = vld [vmem:[#allocation7 + $0x6a8] ss:$16 sps:$4 sm:$0xff]  }
 0x116   :  { %1938 = vmatpush1.bf16.msra.mxu0 %v6398_v39  ;;  %v6490_v39 = vld [vmem:[#allocation7 + $0x48c] ss:$16 sps:$4 sm:$0xff]  }
 0x117   :  { %1979 = vmatpush1.bf16.msra.mxu1 %v6401_v49  ;;  %1939 = vmatprep.subr.bf16.mxu0 %v6406_v52  ;;  %v6488_v49 = vld [vmem:[#allocation7 + $0x488] ss:$16 sps:$4 sm:$0xff]   ;;  %v6496_v52 = vld [vmem:[#allocation7 + $0x46c] ss:$16 sps:$4 sm:$0xff]  }
 0x118   :  { %1980 = vmatprep.subr.bf16.mxu1 %v6409_v41  ;;  %v6499_v41 = vld [vmem:[#allocation7 + $0x66c] ss:$16 sps:$4 sm:$0xff]  }
 0x11a   :  { %1940 = vmatpush1.bf16.msra.mxu0 %v6404_v42  ;;  %v6494_v42 = vld [vmem:[#allocation7 + $0x468] ss:$16 sps:$4 sm:$0xff]  }
 0x11b   :  { %1981 = vmatpush1.bf16.msra.mxu1 %v6407_v43  ;;  %1941 = vmatprep.subr.bf16.mxu0 %v6412_v44  ;;  %v6497_v43 = vld [vmem:[#allocation7 + $0x668] ss:$16 sps:$4 sm:$0xff]   ;;  %v6502_v44 = vld [vmem:[#allocation7 + $0x44c] ss:$16 sps:$4 sm:$0xff]  }
 0x11c   :  { %1982 = vmatprep.subr.bf16.mxu1 %v6415_v45  ;;  %v6503_v45 = vld [vmem:[#allocation7 + $0x648] ss:$16 sps:$4 sm:$0xff]  }
 0x11e   :  { %1942 = vmatpush1.bf16.msra.mxu0 %v6410_v46  ;;  %v6508_v46 = vld [vmem:[#allocation7 + $0x42c] ss:$16 sps:$4 sm:$0xff]  }
 0x11f   :  { %1983 = vmatpush1.bf16.msra.mxu1 %v6413_v47  ;;  %1943 = vmatprep.subr.bf16.mxu0 %v6418_v48  ;;  %v6511_v47 = vld [vmem:[#allocation7 + $0x62c] ss:$16 sps:$4 sm:$0xff]   ;;  %v6506_v48 = vld [vmem:[#allocation7 + $0x428] ss:$16 sps:$4 sm:$0xff]  }
 0x120   :  { %1984 = vmatprep.subr.bf16.mxu1 %v6421_v50  ;;  %v6509_v50 = vld [vmem:[#allocation7 + $0x628] ss:$16 sps:$4 sm:$0xff]  }
 0x122   :  { %1944 = vmatpush1.bf16.msra.mxu0 %v6416_v51  ;;  %v6514_v51 = vld [vmem:[#allocation7 + $0x40c] ss:$16 sps:$4 sm:$0xff]  }
 0x123   :  { %1985 = vmatpush1.bf16.msra.mxu1 %v6419_v53  ;;  %1945 = vmatprep.subr.bf16.mxu0 %v6424_v54  ;;  %v6517_v53 = vld [vmem:[#allocation7 + $0x60c] ss:$16 sps:$4 sm:$0xff]   ;;  %v6512_v54 = vld [vmem:[#allocation7 + $0x408] ss:$16 sps:$4 sm:$0xff]  }
 0x124   :  { %1986 = vmatprep.subr.bf16.mxu1 %v6427_v55  ;;  %v6515_v55 = vld [vmem:[#allocation7 + $0x608] ss:$16 sps:$4 sm:$0xff]  }
 0x126   :  { %1946 = vmatpush2.bf16.msra.mxu0 %v6422_v56  ;;  %v6520_v56 = vld [vmem:[#allocation7 + $0x5ec] ss:$16 sps:$4 sm:$0xff]  }
 0x127   :  { %1987 = vmatpush2.bf16.msra.mxu1 %v6425_v57  ;;  %1947 = vmatprep.subr.bf16.mxu0 %v6430_v58  ;;  %v6523_v57 = vld [vmem:[#allocation7 + $0x7ec] ss:$16 sps:$4 sm:$0xff]   ;;  %v6518_v58 = vld [vmem:[#allocation7 + $0x5e8] ss:$16 sps:$4 sm:$0xff]  }
 0x128   :  { %1988 = vmatprep.subr.bf16.mxu1 %v6433_v59  ;;  %v6521_v59 = vld [vmem:[#allocation7 + $0x7e8] ss:$16 sps:$4 sm:$0xff]  }
 0x12a   :  { %1948 = vmatpush2.bf16.msra.mxu0 %v6428_v60  ;;  %v6526_v60 = vld [vmem:[#allocation7 + $0x5cc] ss:$16 sps:$4 sm:$0xff]  }
 0x12b   :  { %1989 = vmatpush2.bf16.msra.mxu1 %v6431_v61  ;;  %1949 = vmatprep.subr.bf16.mxu0 %v6436_v62  ;;  %v6529_v61 = vld [vmem:[#allocation7 + $0x7cc] ss:$16 sps:$4 sm:$0xff]   ;;  %v6524_v62 = vld [vmem:[#allocation7 + $0x5c8] ss:$16 sps:$4 sm:$0xff]  }
 0x12c   :  { %1990 = vmatprep.subr.bf16.mxu1 %v6439_v63  ;;  %v6527_v63 = vld [vmem:[#allocation7 + $0x7c8] ss:$16 sps:$4 sm:$0xff]  }
 0x12e   :  { %1950 = vmatpush2.bf16.msra.mxu0 %v6434_v0  ;;  %v6532_v0 = vld [vmem:[#allocation7 + $0x5ac] ss:$16 sps:$4 sm:$0xff]  }
 0x12f   :  { %1991 = vmatpush2.bf16.msra.mxu1 %v6437_v1  ;;  %1951 = vmatprep.subr.bf16.mxu0 %v6442_v2  ;;  %v6535_v1 = vld [vmem:[#allocation7 + $0x7ac] ss:$16 sps:$4 sm:$0xff]   ;;  %v6530_v2 = vld [vmem:[#allocation7 + $0x5a8] ss:$16 sps:$4 sm:$0xff]  }
 0x130   :  { %1992 = vmatprep.subr.bf16.mxu1 %v6445_v3  ;;  %v6533_v3 = vld [vmem:[#allocation7 + $0x7a8] ss:$16 sps:$4 sm:$0xff]  }
 0x132   :  { %1952 = vmatpush2.bf16.msra.mxu0 %v6440_v4  ;;  %v6538_v4 = vld [vmem:[#allocation7 + $0x58c] ss:$16 sps:$4 sm:$0xff]  }
 0x133   :  { %1993 = vmatpush2.bf16.msra.mxu1 %v6443_v5  ;;  %1953 = vmatprep.subr.bf16.mxu0 %v6448_v6  ;;  %v6541_v5 = vld [vmem:[#allocation7 + $0x78c] ss:$16 sps:$4 sm:$0xff]   ;;  %v6536_v6 = vld [vmem:[#allocation7 + $0x588] ss:$16 sps:$4 sm:$0xff]  }
 0x134   :  { %1994 = vmatprep.subr.bf16.mxu1 %v6451_v7  ;;  %v6539_v7 = vld [vmem:[#allocation7 + $0x788] ss:$16 sps:$4 sm:$0xff]  }
 0x136   :  { %1954 = vmatpush2.bf16.msra.mxu0 %v6446_v10  ;;  %v6544_v10 = vld [vmem:[#allocation7 + $0x56c] ss:$16 sps:$4 sm:$0xff]  }
 0x137   :  { %1995 = vmatpush2.bf16.msra.mxu1 %v6449_v11  ;;  %1955 = vmatprep.subr.bf16.mxu0 %v6454_v12  ;;  %v6547_v11 = vld [vmem:[#allocation7 + $0x76c] ss:$16 sps:$4 sm:$0xff]   ;;  %v6542_v12 = vld [vmem:[#allocation7 + $0x568] ss:$16 sps:$4 sm:$0xff]  }
 0x138   :  { %1996 = vmatprep.subr.bf16.mxu1 %v6457_v13  ;;  %v6545_v13 = vld [vmem:[#allocation7 + $0x768] ss:$16 sps:$4 sm:$0xff]  }
 0x13a   :  { %1956 = vmatpush2.bf16.msra.mxu0 %v6452_v14  ;;  %v6550_v14 = vld [vmem:[#allocation7 + $0x54c] ss:$16 sps:$4 sm:$0xff]  }
 0x13b   :  { %1997 = vmatpush2.bf16.msra.mxu1 %v6455_v15  ;;  %1957 = vmatprep.subr.bf16.mxu0 %v6460_v16  ;;  %v6553_v15 = vld [vmem:[#allocation7 + $0x74c] ss:$16 sps:$4 sm:$0xff]   ;;  %v6548_v16 = vld [vmem:[#allocation7 + $0x548] ss:$16 sps:$4 sm:$0xff]  }
 0x13c   :  { %1998 = vmatprep.subr.bf16.mxu1 %v6463_v17  ;;  %v6551_v17 = vld [vmem:[#allocation7 + $0x748] ss:$16 sps:$4 sm:$0xff]  }
 0x13e   :  { %1958 = vmatpush2.bf16.msra.mxu0 %v6458_v18  ;;  %v6556_v18 = vld [vmem:[#allocation7 + $0x52c] ss:$16 sps:$4 sm:$0xff]  }
 0x13f   :  { %1999 = vmatpush2.bf16.msra.mxu1 %v6461_v19  ;;  %1959 = vmatprep.subr.bf16.mxu0 %v6466_v22  ;;  %v6559_v19 = vld [vmem:[#allocation7 + $0x72c] ss:$16 sps:$4 sm:$0xff]   ;;  %v6554_v22 = vld [vmem:[#allocation7 + $0x528] ss:$16 sps:$4 sm:$0xff]  }
 0x140   :  { %2000 = vmatprep.subr.bf16.mxu1 %v6469_v23  ;;  %v6557_v23 = vld [vmem:[#allocation7 + $0x728] ss:$16 sps:$4 sm:$0xff]  }
 0x142   :  { %1960 = vmatpush2.bf16.msra.mxu0 %v6464_v24  ;;  %v6562_v24 = vld [vmem:[#allocation7 + $0x50c] ss:$16 sps:$4 sm:$0xff]  }
 0x143   :  { %2001 = vmatpush2.bf16.msra.mxu1 %v6467_v25  ;;  %2011 = vmatprep.subr.bf16.mxu0 %v6472_v26  ;;  %v6565_v25 = vld [vmem:[#allocation7 + $0x70c] ss:$16 sps:$4 sm:$0xff]   ;;  %v6560_v26 = vld [vmem:[#allocation7 + $0x508] ss:$16 sps:$4 sm:$0xff]  }
 0x144   :  { %2052 = vmatprep.subr.bf16.mxu1 %v6475_v27  ;;  %v6563_v27 = vld [vmem:[#allocation7 + $0x708] ss:$16 sps:$4 sm:$0xff]  }
 0x145   :  { %1962 = vmatmul.mubr.bf16.vlgmr.msra.gmra.mxu0 %v7279_v8  ;;  %v6493_v8 = vld [vmem:[#allocation7 + $0x68c] ss:$16 sps:$4 sm:$0xff]  }
 0x146   :  { %2003 = vmatmul.mubr.bf16.vlgmr.msra.gmra.mxu1 %v7281_v9  ;;  %2012 = vmatpush1.bf16.msra.mxu0 %v6470_v28  ;;  %v6491_v9 = vld [vmem:[#allocation7 + $0x688] ss:$16 sps:$4 sm:$0xff]   ;;  %v6568_v28 = vld [vmem:[#allocation8 + $0x74] ss:$8 sps:$4 sm:$0xff]  }
 0x147   :  { %2053 = vmatpush1.bf16.msra.mxu1 %v6473_v29  ;;  %2013 = vmatprep.subr.bf16.mxu0 %v6478_v30  ;;  %v6566_v29 = vld [vmem:[#allocation8 + $0x70] ss:$8 sps:$4 sm:$0xff]   ;;  %v6571_v30 = vld [vmem:[#allocation8 + $0x64] ss:$8 sps:$4 sm:$0xff]  }
 0x148   :  { %2054 = vmatprep.subr.bf16.mxu1 %v6481_v31  ;;  %2043 = vmatprep.mubr.bf16.mxu0 %v7285_v37  ;;  %v6505_v37 = vld [vmem:[#allocation7 + $0x64c] ss:$16 sps:$4 sm:$0xff]  }
 0x149   :  { %2084 = vmatprep.mubr.bf16.mxu1 %v7287_v40  ;;  %v6500_v40 = vld [vmem:[#allocation7 + $0x448] ss:$16 sps:$4 sm:$0xff]  }
 0x14a   :  { %2014 = vmatpush1.bf16.msra.mxu0 %v6476_v32 }
 0x14b   :  { %2055 = vmatpush1.bf16.msra.mxu1 %v6479_v33  ;;  %2015 = vmatprep.subr.bf16.mxu0 %v6484_v34  ;;  %v6569_v33 = vld [vmem:[#allocation8 + $0x60] ss:$8 sps:$4 sm:$0xff]  }
 0x14c   :  { %2056 = vmatprep.subr.bf16.mxu1 %v6487_v35 }
 0x14e   :  { %2016 = vmatpush1.bf16.msra.mxu0 %v6482_v36  ;;  %v6574_v36 = vld [vmem:[#allocation8 + $0x54] ss:$8 sps:$4 sm:$0xff]  }
 0x14f   :  { %2057 = vmatpush1.bf16.msra.mxu1 %v6485_v38  ;;  %2017 = vmatprep.subr.bf16.mxu0 %v6490_v39 }
 0x150   :  { %2058 = vmatprep.subr.bf16.mxu1 %v6493_v8  ;;  %v6572_v8 = vld [vmem:[#allocation8 + $0x50] ss:$8 sps:$4 sm:$0xff]  }
 0x152   :  { %2018 = vmatpush1.bf16.msra.mxu0 %v6488_v49 }
 0x153   :  { %2059 = vmatpush1.bf16.msra.mxu1 %v6491_v9  ;;  %2019 = vmatprep.subr.bf16.mxu0 %v6496_v52  ;;  %v6577_v52 = vld [vmem:[#allocation8 + $0x44] ss:$8 sps:$4 sm:$0xff]  }
 0x154   :  { %2060 = vmatprep.subr.bf16.mxu1 %v6499_v41  ;;  %v6614_v41 = vld [vmem:[#allocation8 + $0x170] ss:$8 sps:$4 sm:$0xff]  }
 0x156   :  { %2020 = vmatpush1.bf16.msra.mxu0 %v6494_v42  ;;  %v6619_v42 = vld [vmem:[#allocation8 + $0x164] ss:$8 sps:$4 sm:$0xff]  }
 0x157   :  { %2061 = vmatpush1.bf16.msra.mxu1 %v6497_v43  ;;  %2021 = vmatprep.subr.bf16.mxu0 %v6502_v44  ;;  %v6617_v43 = vld [vmem:[#allocation8 + $0x160] ss:$8 sps:$4 sm:$0xff]   ;;  %v6580_v44 = vld [vmem:[#allocation8 + $0x34] ss:$8 sps:$4 sm:$0xff]  }
 0x158   :  { %2062 = vmatprep.subr.bf16.mxu1 %v6505_v37  ;;  %v6622_v37 = vld [vmem:[#allocation8 + $0x154] ss:$8 sps:$4 sm:$0xff]  }
 0x15a   :  { %2022 = vmatpush1.bf16.msra.mxu0 %v6500_v40  ;;  %v6578_v40 = vld [vmem:[#allocation8 + $0x30] ss:$8 sps:$4 sm:$0xff]  }
 0x15b   :  { %2063 = vmatpush1.bf16.msra.mxu1 %v6503_v45  ;;  %2023 = vmatprep.subr.bf16.mxu0 %v6508_v46  ;;  %v6620_v45 = vld [vmem:[#allocation8 + $0x150] ss:$8 sps:$4 sm:$0xff]   ;;  %v6583_v46 = vld [vmem:[#allocation8 + $0x24] ss:$8 sps:$4 sm:$0xff]  }
 0x15c   :  { %2064 = vmatprep.subr.bf16.mxu1 %v6511_v47  ;;  %v6625_v47 = vld [vmem:[#allocation8 + $0x144] ss:$8 sps:$4 sm:$0xff]  }
 0x15e   :  { %2024 = vmatpush1.bf16.msra.mxu0 %v6506_v48  ;;  %v6581_v48 = vld [vmem:[#allocation8 + $0x20] ss:$8 sps:$4 sm:$0xff]  }
 0x15f   :  { %2065 = vmatpush1.bf16.msra.mxu1 %v6509_v50  ;;  %2025 = vmatprep.subr.bf16.mxu0 %v6514_v51  ;;  %v6623_v50 = vld [vmem:[#allocation8 + $0x140] ss:$8 sps:$4 sm:$0xff]   ;;  %v6586_v51 = vld [vmem:[#allocation8 + $0x14] ss:$8 sps:$4 sm:$0xff]  }
 0x160   :  { %2066 = vmatprep.subr.bf16.mxu1 %v6517_v53  ;;  %v6628_v53 = vld [vmem:[#allocation8 + $0x134] ss:$8 sps:$4 sm:$0xff]  }
 0x162   :  { %2026 = vmatpush1.bf16.msra.mxu0 %v6512_v54  ;;  %v6584_v54 = vld [vmem:[#allocation8 + $0x10] ss:$8 sps:$4 sm:$0xff]  }
 0x163   :  { %2067 = vmatpush1.bf16.msra.mxu1 %v6515_v55  ;;  %2027 = vmatprep.subr.bf16.mxu0 %v6520_v56  ;;  %v6626_v55 = vld [vmem:[#allocation8 + $0x130] ss:$8 sps:$4 sm:$0xff]   ;;  %v6589_v56 = vld [vmem:[#allocation8 + $0x4] ss:$8 sps:$4 sm:$0xff]  }
 0x164   :  { %2068 = vmatprep.subr.bf16.mxu1 %v6523_v57  ;;  %v6631_v57 = vld [vmem:[#allocation8 + $0x124] ss:$8 sps:$4 sm:$0xff]  }
 0x166   :  { %2028 = vmatpush2.bf16.msra.mxu0 %v6518_v58  ;;  %v6587_v58 = vld [vmem:[#allocation8] ss:$8 sps:$4 sm:$0xff]  }
 0x167   :  { %2069 = vmatpush2.bf16.msra.mxu1 %v6521_v59  ;;  %2029 = vmatprep.subr.bf16.mxu0 %v6526_v60  ;;  %v6629_v59 = vld [vmem:[#allocation8 + $0x120] ss:$8 sps:$4 sm:$0xff]   ;;  %v6592_v60 = vld [vmem:[#allocation8 + $0xf4] ss:$8 sps:$4 sm:$0xff]  }
 0x168   :  { %2070 = vmatprep.subr.bf16.mxu1 %v6529_v61  ;;  %v6634_v61 = vld [vmem:[#allocation8 + $0x114] ss:$8 sps:$4 sm:$0xff]  }
 0x16a   :  { %2030 = vmatpush2.bf16.msra.mxu0 %v6524_v62  ;;  %v6590_v62 = vld [vmem:[#allocation8 + $0xf0] ss:$8 sps:$4 sm:$0xff]  }
 0x16b   :  { %2071 = vmatpush2.bf16.msra.mxu1 %v6527_v63  ;;  %2031 = vmatprep.subr.bf16.mxu0 %v6532_v0  ;;  %v6632_v63 = vld [vmem:[#allocation8 + $0x110] ss:$8 sps:$4 sm:$0xff]   ;;  %v6595_v0 = vld [vmem:[#allocation8 + $0xe4] ss:$8 sps:$4 sm:$0xff]  }
 0x16c   :  { %2072 = vmatprep.subr.bf16.mxu1 %v6535_v1  ;;  %v6637_v1 = vld [vmem:[#allocation8 + $0x104] ss:$8 sps:$4 sm:$0xff]  }
 0x16e   :  { %2032 = vmatpush2.bf16.msra.mxu0 %v6530_v2  ;;  %v6593_v2 = vld [vmem:[#allocation8 + $0xe0] ss:$8 sps:$4 sm:$0xff]  }
 0x16f   :  { %2073 = vmatpush2.bf16.msra.mxu1 %v6533_v3  ;;  %2033 = vmatprep.subr.bf16.mxu0 %v6538_v4  ;;  %v6635_v3 = vld [vmem:[#allocation8 + $0x100] ss:$8 sps:$4 sm:$0xff]   ;;  %v6598_v4 = vld [vmem:[#allocation8 + $0xd4] ss:$8 sps:$4 sm:$0xff]  }
 0x170   :  { %2074 = vmatprep.subr.bf16.mxu1 %v6541_v5  ;;  %v6640_v5 = vld [vmem:[#allocation8 + $0x1f4] ss:$8 sps:$4 sm:$0xff]  }
 0x172   :  { %2034 = vmatpush2.bf16.msra.mxu0 %v6536_v6  ;;  %v6596_v6 = vld [vmem:[#allocation8 + $0xd0] ss:$8 sps:$4 sm:$0xff]  }
 0x173   :  { %2075 = vmatpush2.bf16.msra.mxu1 %v6539_v7  ;;  %2035 = vmatprep.subr.bf16.mxu0 %v6544_v10  ;;  %v6638_v7 = vld [vmem:[#allocation8 + $0x1f0] ss:$8 sps:$4 sm:$0xff]   ;;  %v6601_v10 = vld [vmem:[#allocation8 + $0xc4] ss:$8 sps:$4 sm:$0xff]  }
 0x174   :  { %2076 = vmatprep.subr.bf16.mxu1 %v6547_v11  ;;  %v6643_v11 = vld [vmem:[#allocation8 + $0x1e4] ss:$8 sps:$4 sm:$0xff]  }
 0x176   :  { %2036 = vmatpush2.bf16.msra.mxu0 %v6542_v12  ;;  %v6599_v12 = vld [vmem:[#allocation8 + $0xc0] ss:$8 sps:$4 sm:$0xff]  }
 0x177   :  { %2077 = vmatpush2.bf16.msra.mxu1 %v6545_v13  ;;  %2037 = vmatprep.subr.bf16.mxu0 %v6550_v14  ;;  %v6641_v13 = vld [vmem:[#allocation8 + $0x1e0] ss:$8 sps:$4 sm:$0xff]   ;;  %v6604_v14 = vld [vmem:[#allocation8 + $0xb4] ss:$8 sps:$4 sm:$0xff]  }
 0x178   :  { %2078 = vmatprep.subr.bf16.mxu1 %v6553_v15  ;;  %v6646_v15 = vld [vmem:[#allocation8 + $0x1d4] ss:$8 sps:$4 sm:$0xff]  }
 0x17a   :  { %2038 = vmatpush2.bf16.msra.mxu0 %v6548_v16  ;;  %v465_v16 = vlaneseq }
 0x17b   :  { %2079 = vmatpush2.bf16.msra.mxu1 %v6551_v17  ;;  %2039 = vmatprep.subr.bf16.mxu0 %v6556_v18  ;;  %v6602_v17 = vld [vmem:[#allocation8 + $0xb0] ss:$8 sps:$4 sm:$0xff]  }
 0x17c   :  { %2080 = vmatprep.subr.bf16.mxu1 %v6559_v19  ;;  %v6644_v18 = vld [vmem:[#allocation8 + $0x1d0] ss:$8 sps:$4 sm:$0xff]   ;;  %v6607_v19 = vld [vmem:[#allocation8 + $0xa4] ss:$8 sps:$4 sm:$0xff]  }
 0x17e   :  { %2040 = vmatpush2.bf16.msra.mxu0 %v6554_v22  ;;  %v6649_v22 = vld [vmem:[#allocation8 + $0x1c4] ss:$8 sps:$4 sm:$0xff]  }
 0x17f   :  { %2081 = vmatpush2.bf16.msra.mxu1 %v6557_v23  ;;  %2041 = vmatprep.subr.bf16.mxu0 %v6562_v24  ;;  %v7313_v23 = vshrl.u32 %v465_v16, 7  ;;  %v6605_v24 = vld [vmem:[#allocation8 + $0xa0] ss:$8 sps:$4 sm:$0xff]  }
 0x180   :  { %2082 = vmatprep.subr.bf16.mxu1 %v6565_v25  ;;  %v6647_v25 = vld [vmem:[#allocation8 + $0x1c0] ss:$8 sps:$4 sm:$0xff]  }
 0x181   :  { %v6677_v16 = vld [vmem:[#allocation11 + $0x20] ss:$8 sps:$4 sm:$0xff]  }
 0x182   :  { %2042 = vmatpush2.bf16.msra.mxu0 %v6560_v26  ;;  %v6610_v26 = vld [vmem:[#allocation8 + $0x94] ss:$8 sps:$4 sm:$0xff]  }
 0x183   :  { %2083 = vmatpush2.bf16.msra.mxu1 %v6563_v27  ;;  %2497 = vmatprep.subr.bf16.mxu0 %v6568_v28  ;;  %v6652_v27 = vld [vmem:[#allocation8 + $0x1b4] ss:$8 sps:$4 sm:$0xff]   ;;  %v7316_v28 = vsub.s32 0, %v7313_v23 }
 0x185   :  { %v7303_v31 = vpop.f32.mrf.mxu0  ;;  %2044 = vmatmul.mubr.bf16.vlgmr.msra.gmra.mxu0 %v7291_v20  ;;  %v6616_v20 = vld [vmem:[#allocation8 + $0x174] ss:$8 sps:$4 sm:$0xff]  }
 0x186   :  { %v7305_v32 = vpop.f32.mrf.mxu1  ;;  %2085 = vmatmul.mubr.bf16.vlgmr.msra.gmra.mxu1 %v7293_v21  ;;  %2498 = vmatpush1.bf16.msra.mxu0 %v6566_v29  ;;  %v6575_v21 = vld [vmem:[#allocation8 + $0x40] ss:$8 sps:$4 sm:$0xff]   ;;  %v7321_v29 = vld [vmem:[%s7411_s3] sm:$0xf] }
 0x187   :  { %v7309_v34 = vpop.f32.mrf.mxu0  ;;  %2499 = vmatprep.subr.bf16.mxu0 %v6571_v30  ;;  %2538 = vmatprep.subr.bf16.mxu1 %v6616_v20  ;;  %v7324_v30 = vsub.s32 1, %v7313_v23 }
 0x188   :  { %v7311_v35 = vpop.f32.mrf.mxu1  ;;  %2539 = vmatpush1.bf16.msra.mxu1 %v6614_v41  ;;  %v6655_v41 = vld [vmem:[#allocation8 + $0x1a4] ss:$8 sps:$4 sm:$0xff]  }
 0x189   :  { %v1803_v38 = vpop.f32.mrf.mxu0  ;;  %2540 = vmatprep.subr.bf16.mxu1 %v6619_v42  ;;  %v6653_v42 = vld [vmem:[#allocation8 + $0x1a0] ss:$8 sps:$4 sm:$0xff]  }
 0x18a   :  { %v1844_v39 = vpop.f32.mrf.mxu1  ;;  %2500 = vmatpush1.bf16.msra.mxu0 %v6569_v33  ;;  %v6608_v33 = vld [vmem:[#allocation8 + $0x90] ss:$8 sps:$4 sm:$0xff]   ;;  %v6613_v38 = vld [vmem:[#allocation8 + $0x84] ss:$8 sps:$4 sm:$0xff]  }
 0x18b   :  { %v1804_v49 = vpop.f32.mrf.mxu0  ;;  %2501 = vmatprep.subr.bf16.mxu0 %v6574_v36  ;;  %v6650_v36 = vld [vmem:[#allocation8 + $0x1b0] ss:$8 sps:$4 sm:$0xff]   ;;  %v468_v39 = vrot.slane %v7321_v29, %v7316_v28 }
 0x18c   :  { %v1845_v9 = vpop.f32.mrf.mxu1  ;;  %2541 = vmatpush1.bf16.msra.mxu1 %v6617_v43  ;;  %v6611_v49 = vld [vmem:[#allocation8 + $0x80] ss:$8 sps:$4 sm:$0xff]  }
 0x18d   :  { %2542 = vmatprep.subr.bf16.mxu1 %v6622_v37  ;;  %v1800_v9 = vadd.f32 %v7303_v31, %v468_v39  ;;  %v6656_v31 = vld [vmem:[#allocation8 + $0x190] ss:$8 sps:$4 sm:$0xff]  }
 0x18e   :  { %2502 = vmatpush1.bf16.msra.mxu0 %v6572_v8  ;;  %v472_v8 = vrot.slane %v7321_v29, %v7324_v30 }
 0x18f   :  { %2503 = vmatprep.subr.bf16.mxu0 %v6577_v52  ;;  %v1841_v20 = vadd.f32 %v7305_v32, %v1800_v9  ;;  %v6697_v9 = vld [vmem:[#allocation11 + $0xc4] ss:$8 sps:$4 sm:$0xff]  }
 0x190   :  { %2543 = vmatpush1.bf16.msra.mxu1 %v6620_v45  ;;  %v1802_v52 = vadd.f32 %v7309_v34, %v472_v8 }
 0x191   :  { %2544 = vmatprep.subr.bf16.mxu1 %v6625_v47 }
 0x192   :  { %2504 = vmatpush1.bf16.msra.mxu0 %v6575_v21 }
 0x193   :  { %2505 = vmatprep.subr.bf16.mxu0 %v6580_v44  ;;  %v1843_v44 = vadd.f32 %v7311_v35, %v1802_v52 }
 0x194   :  { %2545 = vmatpush1.bf16.msra.mxu1 %v6623_v50 }
 0x195   :  { %2546 = vmatprep.subr.bf16.mxu1 %v6628_v53 }
 0x196   :  { %2506 = vmatpush1.bf16.msra.mxu0 %v6578_v40 }
 0x197   :  { %2507 = vmatprep.subr.bf16.mxu0 %v6583_v46  ;;  %v6658_v46 = vld [vmem:[#allocation8 + $0x194] ss:$8 sps:$4 sm:$0xff]  }
 0x198   :  { %2547 = vmatpush1.bf16.msra.mxu1 %v6626_v55  ;;  %v6661_v55 = vld [vmem:[#allocation8 + $0x184] ss:$8 sps:$4 sm:$0xff]  }
 0x199   :  { %2548 = vmatprep.subr.bf16.mxu1 %v6631_v57  ;;  %v6659_v57 = vld [vmem:[#allocation8 + $0x180] ss:$8 sps:$4 sm:$0xff]  }
 0x19a   :  { %2508 = vmatpush1.bf16.msra.mxu0 %v6581_v48 }
 0x19b   :  { %2509 = vmatprep.subr.bf16.mxu0 %v6586_v51 }
 0x19c   :  { %2549 = vmatpush1.bf16.msra.mxu1 %v6629_v59 }
 0x19d   :  { %2550 = vmatprep.subr.bf16.mxu1 %v6634_v61 }
 0x19e   :  { %2510 = vmatpush1.bf16.msra.mxu0 %v6584_v54 }
 0x19f   :  { %2511 = vmatprep.subr.bf16.mxu0 %v6589_v56 }
 0x1a0   :  { %2551 = vmatpush1.bf16.msra.mxu1 %v6632_v63 }
 0x1a1   :  { %2552 = vmatprep.subr.bf16.mxu1 %v6637_v1 }
 0x1a2   :  { %2512 = vmatpush1.bf16.msra.mxu0 %v6587_v58 }
 0x1a3   :  { %2513 = vmatprep.subr.bf16.mxu0 %v6592_v60 }
 0x1a4   :  { %2553 = vmatpush1.bf16.msra.mxu1 %v6635_v3  ;;  %v6662_v3 = vld [vmem:[#allocation11 + $0x70] ss:$8 sps:$4 sm:$0xff]  }
 0x1a5   :  { %2554 = vmatprep.subr.bf16.mxu1 %v6640_v5  ;;  %v6667_v5 = vld [vmem:[#allocation11 + $0x64] ss:$8 sps:$4 sm:$0xff]  }
 0x1a6   :  { %2514 = vmatpush2.bf16.msra.mxu0 %v6590_v62 }
 0x1a7   :  { %2515 = vmatprep.subr.bf16.mxu0 %v6595_v0 }
 0x1a8   :  { %2555 = vmatpush2.bf16.msra.mxu1 %v6638_v7  ;;  %v6670_v7 = vld [vmem:[#allocation11 + $0x54] ss:$8 sps:$4 sm:$0xff]  }
 0x1a9   :  { %2556 = vmatprep.subr.bf16.mxu1 %v6643_v11  ;;  %v6673_v11 = vld [vmem:[#allocation11 + $0x44] ss:$8 sps:$4 sm:$0xff]  }
 0x1aa   :  { %2516 = vmatpush2.bf16.msra.mxu0 %v6593_v2 }
 0x1ab   :  { %2517 = vmatprep.subr.bf16.mxu0 %v6598_v4  ;;  %v6664_v4 = vld [vmem:[#allocation11 + $0x74] ss:$8 sps:$4 sm:$0xff]  }
 0x1ac   :  { %2557 = vmatpush2.bf16.msra.mxu1 %v6641_v13  ;;  %v6676_v13 = vld [vmem:[#allocation11 + $0x34] ss:$8 sps:$4 sm:$0xff]  }
 0x1ad   :  { %2558 = vmatprep.subr.bf16.mxu1 %v6646_v15  ;;  %v6679_v15 = vld [vmem:[#allocation11 + $0x24] ss:$8 sps:$4 sm:$0xff]  }
 0x1ae   :  { %2518 = vmatpush2.bf16.msra.mxu0 %v6596_v6  ;;  %v6665_v6 = vld [vmem:[#allocation11 + $0x60] ss:$8 sps:$4 sm:$0xff]  }
 0x1af   :  { %2519 = vmatprep.subr.bf16.mxu0 %v6601_v10  ;;  %v6668_v10 = vld [vmem:[#allocation11 + $0x50] ss:$8 sps:$4 sm:$0xff]  }
 0x1b0   :  { %2559 = vmatpush2.bf16.msra.mxu1 %v6644_v18  ;;  %v6680_v18 = vld [vmem:[#allocation11 + $0x10] ss:$8 sps:$4 sm:$0xff]  }
 0x1b1   :  { %2560 = vmatprep.subr.bf16.mxu1 %v6649_v22  ;;  %v6683_v22 = vld [vmem:[#allocation11] ss:$8 sps:$4 sm:$0xff]  }
 0x1b2   :  { %2520 = vmatpush2.bf16.msra.mxu0 %v6599_v12  ;;  %v6671_v12 = vld [vmem:[#allocation11 + $0x40] ss:$8 sps:$4 sm:$0xff]  }
 0x1b3   :  { %2521 = vmatprep.subr.bf16.mxu0 %v6604_v14  ;;  %v6674_v14 = vld [vmem:[#allocation11 + $0x30] ss:$8 sps:$4 sm:$0xff]  }
 0x1b4   :  { %2561 = vmatpush2.bf16.msra.mxu1 %v6647_v25  ;;  %v6686_v25 = vld [vmem:[#allocation11 + $0xf0] ss:$8 sps:$4 sm:$0xff]  }
 0x1b5   :  { %2562 = vmatprep.subr.bf16.mxu1 %v6652_v27  ;;  %v7335_v27 = vsub.s32 2, %v7313_v23 }
 0x1b6   :  { %2522 = vmatpush2.bf16.msra.mxu0 %v6602_v17  ;;  %v6682_v17 = vld [vmem:[#allocation11 + $0x14] ss:$8 sps:$4 sm:$0xff]  }
 0x1b7   :  { %2523 = vmatprep.subr.bf16.mxu0 %v6607_v19  ;;  %v6685_v19 = vld [vmem:[#allocation11 + $0x4] ss:$8 sps:$4 sm:$0xff]   ;;  %v476_v39 = vrot.slane %v7321_v29, %v7335_v27 }
 0x1b8   :  { %2563 = vmatpush2.bf16.msra.mxu1 %v6650_v36  ;;  %v6689_v36 = vld [vmem:[#allocation11 + $0xe0] ss:$8 sps:$4 sm:$0xff]  }
 0x1b9   :  { %2564 = vmatprep.subr.bf16.mxu1 %v6655_v41 }
 0x1ba   :  { %2524 = vmatpush2.bf16.msra.mxu0 %v6605_v24  ;;  %v6688_v24 = vld [vmem:[#allocation11 + $0xf4] ss:$8 sps:$4 sm:$0xff]  }
 0x1bb   :  { %2525 = vmatprep.subr.bf16.mxu0 %v6610_v26  ;;  %v6691_v26 = vld [vmem:[#allocation11 + $0xe4] ss:$8 sps:$4 sm:$0xff]  }
 0x1bc   :  { %2565 = vmatpush2.bf16.msra.mxu1 %v6653_v42  ;;  %v6700_v42 = vld [vmem:[#allocation11 + $0xb4] ss:$8 sps:$4 sm:$0xff]  }
 0x1bd   :  { %2566 = vmatprep.subr.bf16.mxu1 %v6658_v46 }
 0x1be   :  { %2526 = vmatpush2.bf16.msra.mxu0 %v6608_v33  ;;  %v7338_v33 = vsub.s32 3, %v7313_v23 }
 0x1bf   :  { %2527 = vmatprep.subr.bf16.mxu0 %v6613_v38  ;;  %v6694_v38 = vld [vmem:[#allocation11 + $0xd4] ss:$8 sps:$4 sm:$0xff]  }
 0x1c0   :  { %2567 = vmatpush2.bf16.msra.mxu1 %v6656_v31  ;;  %v480_v8 = vrot.slane %v7321_v29, %v7338_v33  ;;  %v6703_v29 = vld [vmem:[#allocation11 + $0xa4] ss:$8 sps:$4 sm:$0xff]  }
 0x1c1   :  { %2568 = vmatprep.subr.bf16.mxu1 %v6661_v55 }
 0x1c2   :  { %2528 = vmatpush2.bf16.msra.mxu0 %v6611_v49  ;;  %v6692_v49 = vld [vmem:[#allocation11 + $0xd0] ss:$8 sps:$4 sm:$0xff]  }
 0x1c3   :  { %2787 = vmatprep.subr.bf16.mxu0 %v6664_v4  ;;  %v2165_v4 = vld [vmem:[#allocation10] sm:$0x3] }
 0x1c4   :  { %2569 = vmatpush2.bf16.msra.mxu1 %v6659_v57 }
 0x1c5   :  { %v1881_v21 = vpop.f32.mrf.mxu0 }
 0x1c6   :  { %v1922_v43 = vpop.f32.mrf.mxu1  ;;  %v1882_v37 = vadd.f32 %v1881_v21, %v1841_v20  ;;  %v6695_v20 = vld [vmem:[#allocation11 + $0xc0] ss:$8 sps:$4 sm:$0xff]  }
 0x1c7   :  { %v1883_v40 = vpop.f32.mrf.mxu0 }
 0x1c8   :  { %v1924_v45 = vpop.f32.mrf.mxu1  ;;  %v1923_v47 = vadd.f32 %v1922_v43, %v1882_v37  ;;  %v1884_v48 = vadd.f32 %v1883_v40, %v1843_v44 }
 0x1c9   :  { %v1885_v50 = vpop.f32.mrf.mxu0 }
 0x1ca   :  { %v1926_v34 = vpop.f32.mrf.mxu1  ;;  %v1925_v51 = vadd.f32 %v1924_v45, %v1884_v48  ;;  %v2093_v32 = vmax.f32 %v1923_v47, 0.0  ;;  %v6698_v45 = vld [vmem:[#allocation11 + $0xb0] ss:$8 sps:$4 sm:$0xff]  }
 0x1cb   :  { %v1886_v53 = vpop.f32.mrf.mxu0 }
 0x1cc   :  { %v1927_v54 = vpop.f32.mrf.mxu1  ;;  %v2094_v56 = vmax.f32 %v1925_v51, 0.0  ;;  %v2097_v58 = vpack.c.bf16 %v2093_v32, %v2093_v32  ;;  %v6701_v32 = vld [vmem:[#allocation11 + $0xa0] ss:$8 sps:$4 sm:$0xff]  }
 0x1ce   :  { %v2098_v35 = vpack.c.bf16 %v2094_v56, %v2094_v56 }
 0x1d0   :  { %2529 = vmatprep.mubr.bf16.mxu0 %v2098_v35 }
 0x1d1   :  { %2530 = vmatmul.mubr.bf16.vlgmr.msra.gmra.mxu0 %v2097_v58 }
 0x1d2   :  { %2788 = vmatpush1.bf16.msra.mxu0 %v6662_v3  ;;  %v6712_v3 = vld [vmem:[#allocation14 + $0x74] ss:$8 sps:$4 sm:$0xff]  }
 0x1d3   :  { %2789 = vmatprep.subr.bf16.mxu0 %v6667_v5  ;;  %2943 = vmatprep.subr.bf16.mxu1 %v6712_v3  ;;  %v2170_v5 = vrot.slane %v2165_v4, %v7316_v28  ;;  %v6815_v3 = vld [vmem:[#allocation17 + $0x148] ss:$16 sps:$4 sm:$0xff]  }
 0x1d6   :  { %2790 = vmatpush1.bf16.msra.mxu0 %v6665_v6  ;;  %v2174_v6 = vrot.slane %v2165_v4, %v7324_v30  ;;  %v2615_v4 = vld [vmem:[#allocation13] sm:$0x3] }
 0x1d7   :  { %2791 = vmatprep.subr.bf16.mxu0 %v6670_v7 }
 0x1da   :  { %2792 = vmatpush1.bf16.msra.mxu0 %v6668_v10 }
 0x1db   :  { %2793 = vmatprep.subr.bf16.mxu0 %v6673_v11 }
 0x1de   :  { %2794 = vmatpush1.bf16.msra.mxu0 %v6671_v12 }
 0x1df   :  { %2795 = vmatprep.subr.bf16.mxu0 %v6676_v13 }
 0x1e2   :  { %2796 = vmatpush1.bf16.msra.mxu0 %v6674_v14 }
 0x1e3   :  { %2797 = vmatprep.subr.bf16.mxu0 %v6679_v15 }
 0x1e6   :  { %2798 = vmatpush1.bf16.msra.mxu0 %v6677_v16 }
 0x1e7   :  { %2799 = vmatprep.subr.bf16.mxu0 %v6682_v17 }
 0x1ea   :  { %2800 = vmatpush1.bf16.msra.mxu0 %v6680_v18 }
 0x1eb   :  { %2801 = vmatprep.subr.bf16.mxu0 %v6685_v19 }
 0x1ee   :  { %2802 = vmatpush1.bf16.msra.mxu0 %v6683_v22 }
 0x1ef   :  { %2803 = vmatprep.subr.bf16.mxu0 %v6688_v24  ;;  %v6715_v24 = vld [vmem:[#allocation14 + $0x64] ss:$8 sps:$4 sm:$0xff]  }
 0x1f2   :  { %2804 = vmatpush2.bf16.msra.mxu0 %v6686_v25  ;;  %v6713_v25 = vld [vmem:[#allocation14 + $0x60] ss:$8 sps:$4 sm:$0xff]  }
 0x1f3   :  { %2805 = vmatprep.subr.bf16.mxu0 %v6691_v26  ;;  %v6718_v26 = vld [vmem:[#allocation14 + $0x54] ss:$8 sps:$4 sm:$0xff]  }
 0x1f6   :  { %2806 = vmatpush2.bf16.msra.mxu0 %v6689_v36  ;;  %v6716_v36 = vld [vmem:[#allocation14 + $0x50] ss:$8 sps:$4 sm:$0xff]  }
 0x1f7   :  { %2807 = vmatprep.subr.bf16.mxu0 %v6694_v38  ;;  %v6721_v38 = vld [vmem:[#allocation14 + $0x44] ss:$8 sps:$4 sm:$0xff]  }
 0x1fa   :  { %2808 = vmatpush2.bf16.msra.mxu0 %v6692_v49  ;;  %v6722_v49 = vld [vmem:[#allocation14 + $0x30] ss:$8 sps:$4 sm:$0xff]  }
 0x1fb   :  { %2809 = vmatprep.subr.bf16.mxu0 %v6697_v9  ;;  %v6727_v9 = vld [vmem:[#allocation14 + $0x24] ss:$8 sps:$4 sm:$0xff]  }
 0x1fe   :  { %2810 = vmatpush2.bf16.msra.mxu0 %v6695_v20  ;;  %v6730_v20 = vld [vmem:[#allocation14 + $0x14] ss:$8 sps:$4 sm:$0xff]  }
 0x1ff   :  { %2811 = vmatprep.subr.bf16.mxu0 %v6700_v42  ;;  %v6728_v42 = vld [vmem:[#allocation14 + $0x10] ss:$8 sps:$4 sm:$0xff]  }
 0x202   :  { %2812 = vmatpush2.bf16.msra.mxu0 %v6698_v45  ;;  %v6745_v45 = vld [vmem:[#allocation17 + $0xcc] ss:$16 sps:$4 sm:$0xff]  }
 0x203   :  { %2813 = vmatprep.subr.bf16.mxu0 %v6703_v29  ;;  %v6749_v29 = vld [vmem:[#allocation17 + $0xa8] ss:$16 sps:$4 sm:$0xff]  }
 0x205   :  { %v1963_v59 = vpop.f32.mrf.mxu0 }
 0x206   :  { %v2004_v60 = vpop.f32.mrf.mxu1  ;;  %v1964_v52 = vadd.f32 %v1963_v59, %v476_v39  ;;  %2814 = vmatpush2.bf16.msra.mxu0 %v6701_v32  ;;  %v6706_v59 = vld [vmem:[#allocation11 + $0x94] ss:$8 sps:$4 sm:$0xff]   ;;  %v6719_v39 = vld [vmem:[#allocation14 + $0x40] ss:$8 sps:$4 sm:$0xff]  }
 0x207   :  { %v1965_v61 = vpop.f32.mrf.mxu0  ;;  %2815 = vmatprep.subr.bf16.mxu0 %v6706_v59  ;;  %v6767_v32 = vld [vmem:[#allocation17 + $0x48] ss:$16 sps:$4 sm:$0xff]  }
 0x208   :  { %v2006_v62 = vpop.f32.mrf.mxu1  ;;  %v1966_v41 = vadd.f32 %v1965_v61, %v480_v8  ;;  %v2005_v21 = vadd.f32 %v2004_v60, %v1964_v52  ;;  %v6704_v60 = vld [vmem:[#allocation11 + $0x90] ss:$8 sps:$4 sm:$0xff]   ;;  %v7157_v52 = vmov 0   ;;  %v6791_v59 = vld [vmem:[#allocation17 + $0x1c8] ss:$16 sps:$4 sm:$0xff]  }
 0x209   :  { %v1967_v63 = vpop.f32.mrf.mxu0  ;;  %v6724_v8 = vld [vmem:[#allocation14 + $0x34] ss:$8 sps:$4 sm:$0xff]  }
 0x20a   :  { %v2008_v0 = vpop.f32.mrf.mxu1  ;;  %v2007_v37 = vadd.f32 %v2006_v62, %v1966_v41  ;;  %2816 = vmatpush2.bf16.msra.mxu0 %v6704_v60  ;;  %v6709_v63 = vld [vmem:[#allocation11 + $0x84] ss:$8 sps:$4 sm:$0xff]   ;;  %v6799_v60 = vld [vmem:[#allocation17 + $0x1ac] ss:$16 sps:$4 sm:$0xff]  }
 0x20b   :  { %v1968_v1 = vpop.f32.mrf.mxu0  ;;  %v6707_v0 = vld [vmem:[#allocation11 + $0x80] ss:$8 sps:$4 sm:$0xff]   ;;  %2817 = vmatprep.subr.bf16.mxu0 %v6709_v63  ;;  %v6803_v63 = vld [vmem:[#allocation17 + $0x188] ss:$16 sps:$4 sm:$0xff]  }
 0x20c   :  { %v2009_v2 = vpop.f32.mrf.mxu1  ;;  %v6725_v41 = vld [vmem:[#allocation14 + $0x20] ss:$8 sps:$4 sm:$0xff]  }
 0x20d   :  { %v6710_v2 = vld [vmem:[#allocation14 + $0x70] ss:$8 sps:$4 sm:$0xff]  }
 0x20e   :  { %2818 = vmatpush2.bf16.msra.mxu0 %v6707_v0  ;;  %v6811_v0 = vld [vmem:[#allocation17 + $0x16c] ss:$16 sps:$4 sm:$0xff]  }
 0x245   :  { %v2045_v43 = vpop.f32.mrf.mxu0 }
 0x246   :  { %v2086_v44 = vpop.f32.mrf.mxu1  ;;  %v2046_v40 = vadd.f32 %v2045_v43, %v2005_v21  ;;  %v6733_v21 = vld [vmem:[#allocation14 + $0x4] ss:$8 sps:$4 sm:$0xff]   ;;  %v6731_v43 = vld [vmem:[#allocation14] ss:$8 sps:$4 sm:$0xff]  }
 0x247   :  { %v2047_v46 = vpop.f32.mrf.mxu0 }
 0x248   :  { %v2088_v47 = vpop.f32.mrf.mxu1  ;;  %v2087_v48 = vadd.f32 %v2086_v44, %v2046_v40  ;;  %v2048_v31 = vadd.f32 %v2047_v46, %v2007_v37  ;;  %v6736_v44 = vld [vmem:[#allocation17 + $0xe4] ss:$16 sps:$4 sm:$0xff]   ;;  %v6737_v37 = vld [vmem:[#allocation17 + $0xe8] ss:$16 sps:$4 sm:$0xff]   ;;  %v6739_v40 = vld [vmem:[#allocation17 + $0xec] ss:$16 sps:$4 sm:$0xff]  }
 0x249   :  { %v2049_v50 = vpop.f32.mrf.mxu0  ;;  %3435 = vmatprep.subr.bf16.mxu0 %v6739_v40  ;;  %v6743_v46 = vld [vmem:[#allocation17 + $0xc8] ss:$16 sps:$4 sm:$0xff]   ;;  %v6782_v40 = vld [vmem:[#allocation17 + $0x1e0] ss:$16 sps:$4 sm:$0xff]  }
 0x24a   :  { %v2090_v34 = vpop.f32.mrf.mxu1  ;;  %v2089_v51 = vadd.f32 %v2088_v47, %v2048_v31  ;;  %v2095_v53 = vmax.f32 %v2087_v48, 0.0  ;;  %v6751_v47 = vld [vmem:[#allocation17 + $0xac] ss:$16 sps:$4 sm:$0xff]   ;;  %v6755_v31 = vld [vmem:[#allocation17 + $0x88] ss:$16 sps:$4 sm:$0xff]  }
 0x24b   :  { %v2050_v54 = vpop.f32.mrf.mxu0  ;;  %v6757_v48 = vld [vmem:[#allocation17 + $0x8c] ss:$16 sps:$4 sm:$0xff]   ;;  %v6761_v34 = vld [vmem:[#allocation17 + $0x68] ss:$16 sps:$4 sm:$0xff]  }
 0x24c   :  { %v2091_v55 = vpop.f32.mrf.mxu1  ;;  %v2096_v56 = vmax.f32 %v2089_v51, 0.0  ;;  %v2099_v35 = vpack.c.bf16 %v2095_v53, %v2095_v53  ;;  %v6763_v50 = vld [vmem:[#allocation17 + $0x6c] ss:$16 sps:$4 sm:$0xff]   ;;  %v6773_v54 = vld [vmem:[#allocation17 + $0x28] ss:$16 sps:$4 sm:$0xff]  }
 0x24d   :  { %v6769_v51 = vld [vmem:[#allocation17 + $0x4c] ss:$16 sps:$4 sm:$0xff]  }
 0x24e   :  { %v2100_v57 = vpack.c.bf16 %v2096_v56, %v2096_v56  ;;  %v6775_v53 = vld [vmem:[#allocation17 + $0x2c] ss:$16 sps:$4 sm:$0xff]   ;;  %v6779_v56 = vld [vmem:[#allocation17 + $0x8] ss:$16 sps:$4 sm:$0xff]  }
 0x24f   :  { %v6781_v55 = vld [vmem:[#allocation17 + $0xc] ss:$16 sps:$4 sm:$0xff]  }
 0x250   :  { %2570 = vmatprep.mubr.bf16.mxu1 %v2100_v57  ;;  %v6787_v57 = vld [vmem:[#allocation17 + $0x1ec] ss:$16 sps:$4 sm:$0xff]  }
 0x251   :  { %2571 = vmatmul.mubr.bf16.vlgmr.msra.gmra.mxu1 %v2099_v35  ;;  %v6785_v35 = vld [vmem:[#allocation17 + $0x1e8] ss:$16 sps:$4 sm:$0xff]  }
 0x252   :  { %2944 = vmatpush1.bf16.msra.mxu1 %v6710_v2  ;;  %2975 = vmatprep.mubr.bf16.mxu1 %v7157_v52  ;;  %v6817_v2 = vld [vmem:[#allocation17 + $0x14c] ss:$16 sps:$4 sm:$0xff]   ;;  %v6758_v52 = vld [vmem:[#allocation17 + $0x60] ss:$16 sps:$4 sm:$0xff]  }
 0x253   :  { %2945 = vmatprep.subr.bf16.mxu1 %v6715_v24  ;;  %v6734_v24 = vld [vmem:[#allocation17 + $0xe0] ss:$16 sps:$4 sm:$0xff]  }
 0x256   :  { %2946 = vmatpush1.bf16.msra.mxu1 %v6713_v25 }
 0x257   :  { %2947 = vmatprep.subr.bf16.mxu1 %v6718_v26  ;;  %v6742_v26 = vld [vmem:[#allocation17 + $0xc4] ss:$16 sps:$4 sm:$0xff]  }
 0x25a   :  { %2948 = vmatpush1.bf16.msra.mxu1 %v6716_v36  ;;  %v6740_v36 = vld [vmem:[#allocation17 + $0xc0] ss:$16 sps:$4 sm:$0xff]  }
 0x25b   :  { %2949 = vmatprep.subr.bf16.mxu1 %v6721_v38  ;;  %v6748_v38 = vld [vmem:[#allocation17 + $0xa4] ss:$16 sps:$4 sm:$0xff]  }
 0x25e   :  { %2950 = vmatpush1.bf16.msra.mxu1 %v6719_v39  ;;  %v6746_v39 = vld [vmem:[#allocation17 + $0xa0] ss:$16 sps:$4 sm:$0xff]  }
 0x25f   :  { %2951 = vmatprep.subr.bf16.mxu1 %v6724_v8  ;;  %v6754_v8 = vld [vmem:[#allocation17 + $0x84] ss:$16 sps:$4 sm:$0xff]  }
 0x262   :  { %2952 = vmatpush1.bf16.msra.mxu1 %v6722_v49  ;;  %v6752_v49 = vld [vmem:[#allocation17 + $0x80] ss:$16 sps:$4 sm:$0xff]  }
 0x263   :  { %2953 = vmatprep.subr.bf16.mxu1 %v6727_v9  ;;  %v6760_v9 = vld [vmem:[#allocation17 + $0x64] ss:$16 sps:$4 sm:$0xff]  }
 0x266   :  { %2954 = vmatpush1.bf16.msra.mxu1 %v6725_v41  ;;  %v6766_v41 = vld [vmem:[#allocation17 + $0x44] ss:$16 sps:$4 sm:$0xff]  }
 0x267   :  { %2955 = vmatprep.subr.bf16.mxu1 %v6730_v20  ;;  %v6764_v20 = vld [vmem:[#allocation17 + $0x40] ss:$16 sps:$4 sm:$0xff]  }
 0x26a   :  { %2956 = vmatpush1.bf16.msra.mxu1 %v6728_v42  ;;  %v6772_v42 = vld [vmem:[#allocation17 + $0x24] ss:$16 sps:$4 sm:$0xff]  }
 0x26b   :  { %2957 = vmatprep.subr.bf16.mxu1 %v6733_v21  ;;  %v6770_v21 = vld [vmem:[#allocation17 + $0x20] ss:$16 sps:$4 sm:$0xff]  }
 0x26e   :  { %2958 = vmatpush1.bf16.msra.mxu1 %v6731_v43  ;;  %v6778_v43 = vld [vmem:[#allocation17 + $0x4] ss:$16 sps:$4 sm:$0xff]  }
 0x26f   :  { %3394 = vmatprep.subr.bf16.mxu1 %v6736_v44  ;;  %v6776_v44 = vld [vmem:[#allocation17] ss:$16 sps:$4 sm:$0xff]  }
 0x291   :  { %v2531_v58 = vpop.f32.mrf.mxu0 }
 0x292   :  { %v2532_v7 = vadd.f32 %v2531_v58, %v2170_v5  ;;  %v6793_v58 = vld [vmem:[#allocation17 + $0x1cc] ss:$16 sps:$4 sm:$0xff]   ;;  %v2620_v5 = vrot.slane %v2615_v4, %v7316_v28 }
 0x293   :  { %v2533_v61 = vpop.f32.mrf.mxu0 }
 0x294   :  { %v2534_v11 = vadd.f32 %v2533_v61, %v2174_v6  ;;  %v6797_v61 = vld [vmem:[#allocation17 + $0x1a8] ss:$16 sps:$4 sm:$0xff]   ;;  %v2624_v6 = vrot.slane %v2615_v4, %v7324_v30  ;;  %v2851_v4 = vld [vmem:[#allocation16] sm:$0x3] }
 0x295   :  { %v2535_v62 = vpop.f32.mrf.mxu0 }
 0x296   :  { %v6805_v62 = vld [vmem:[#allocation17 + $0x18c] ss:$16 sps:$4 sm:$0xff]  }
 0x297   :  { %v2536_v1 = vpop.f32.mrf.mxu0 }
 0x298   :  { %v6809_v1 = vld [vmem:[#allocation17 + $0x168] ss:$16 sps:$4 sm:$0xff]  }
 0x311   :  { %v2572_v10 = vpop.f32.mrf.mxu1 }
 0x312   :  { %v2573_v12 = vadd.f32 %v2572_v10, %v2532_v7 }
 0x313   :  { %v2574_v13 = vpop.f32.mrf.mxu1 }
 0x314   :  { %v2575_v14 = vadd.f32 %v2574_v13, %v2534_v11  ;;  %v2579_v15 = vmax.f32 %v2573_v12, 0.0 }
 0x315   :  { %v2576_v16 = vpop.f32.mrf.mxu1 }
 0x316   :  { %v2580_v17 = vmax.f32 %v2575_v14, 0.0  ;;  %v2581_v22 = vpack.c.bf16 %v2579_v15, %v2579_v15 }
 0x317   :  { %v2577_v18 = vpop.f32.mrf.mxu1 }
 0x318   :  { %v2582_v19 = vpack.c.bf16 %v2580_v17, %v2580_v17  ;;  %v2831_v17 = vld [vmem:[#allocation5] sm:$0xff] }
 0x31a   :  { %2819 = vmatprep.mubr.bf16.mxu0 %v2582_v19 }
 0x31b   :  { %2820 = vmatmul.mubr.bf16.vlgmr.msra.gmra.mxu0 %v2581_v22 }
 0x31c   :  { %3436 = vmatpush1.bf16.msra.mxu0 %v6737_v37  ;;  %v6784_v37 = vld [vmem:[#allocation17 + $0x1e4] ss:$16 sps:$4 sm:$0xff]  }
 0x31d   :  { %3437 = vmatprep.subr.bf16.mxu0 %v6745_v45  ;;  %v6790_v45 = vld [vmem:[#allocation17 + $0x1c4] ss:$16 sps:$4 sm:$0xff]  }
 0x320   :  { %3438 = vmatpush1.bf16.msra.mxu0 %v6743_v46  ;;  %v6788_v46 = vld [vmem:[#allocation17 + $0x1c0] ss:$16 sps:$4 sm:$0xff]  }
 0x321   :  { %3439 = vmatprep.subr.bf16.mxu0 %v6751_v47  ;;  %v6796_v47 = vld [vmem:[#allocation17 + $0x1a4] ss:$16 sps:$4 sm:$0xff]  }
 0x324   :  { %3440 = vmatpush1.bf16.msra.mxu0 %v6749_v29  ;;  %v6794_v29 = vld [vmem:[#allocation17 + $0x1a0] ss:$16 sps:$4 sm:$0xff]  }
 0x325   :  { %3441 = vmatprep.subr.bf16.mxu0 %v6757_v48  ;;  %v6802_v48 = vld [vmem:[#allocation17 + $0x184] ss:$16 sps:$4 sm:$0xff]  }
 0x328   :  { %3442 = vmatpush1.bf16.msra.mxu0 %v6755_v31  ;;  %v6800_v31 = vld [vmem:[#allocation17 + $0x180] ss:$16 sps:$4 sm:$0xff]  }
 0x329   :  { %3443 = vmatprep.subr.bf16.mxu0 %v6763_v50  ;;  %v6808_v50 = vld [vmem:[#allocation17 + $0x164] ss:$16 sps:$4 sm:$0xff]  }
 0x32c   :  { %3444 = vmatpush1.bf16.msra.mxu0 %v6761_v34  ;;  %v6806_v34 = vld [vmem:[#allocation17 + $0x160] ss:$16 sps:$4 sm:$0xff]  }
 0x32d   :  { %3445 = vmatprep.subr.bf16.mxu0 %v6769_v51  ;;  %v6814_v51 = vld [vmem:[#allocation17 + $0x144] ss:$16 sps:$4 sm:$0xff]  }
 0x330   :  { %3446 = vmatpush1.bf16.msra.mxu0 %v6767_v32  ;;  %v6812_v32 = vld [vmem:[#allocation17 + $0x140] ss:$16 sps:$4 sm:$0xff]  }
 0x331   :  { %3447 = vmatprep.subr.bf16.mxu0 %v6775_v53  ;;  %v6820_v53 = vld [vmem:[#allocation17 + $0x124] ss:$16 sps:$4 sm:$0xff]  }
 0x334   :  { %3448 = vmatpush1.bf16.msra.mxu0 %v6773_v54  ;;  %v6823_v54 = vld [vmem:[#allocation17 + $0x12c] ss:$16 sps:$4 sm:$0xff]  }
 0x335   :  { %3449 = vmatprep.subr.bf16.mxu0 %v6781_v55  ;;  %v6818_v55 = vld [vmem:[#allocation17 + $0x120] ss:$16 sps:$4 sm:$0xff]  }
 0x338   :  { %3450 = vmatpush1.bf16.msra.mxu0 %v6779_v56  ;;  %v6821_v56 = vld [vmem:[#allocation17 + $0x128] ss:$16 sps:$4 sm:$0xff]  }
 0x339   :  { %3451 = vmatprep.subr.bf16.mxu0 %v6787_v57  ;;  %v6826_v57 = vld [vmem:[#allocation17 + $0x104] ss:$16 sps:$4 sm:$0xff]  }
 0x33c   :  { %3452 = vmatpush2.bf16.msra.mxu0 %v6785_v35  ;;  %v6829_v35 = vld [vmem:[#allocation17 + $0x10c] ss:$16 sps:$4 sm:$0xff]  }
 0x33d   :  { %3453 = vmatprep.subr.bf16.mxu0 %v6793_v58  ;;  %v6824_v58 = vld [vmem:[#allocation17 + $0x100] ss:$16 sps:$4 sm:$0xff]  }
 0x340   :  { %3454 = vmatpush2.bf16.msra.mxu0 %v6791_v59  ;;  %v6827_v59 = vld [vmem:[#allocation17 + $0x108] ss:$16 sps:$4 sm:$0xff]  }
 0x341   :  { %3455 = vmatprep.subr.bf16.mxu0 %v6799_v60  ;;  %v3540_v60 = vld [vmem:[#allocation19 + $0x1c0] sm:$0xff] }
 0x344   :  { %3456 = vmatpush2.bf16.msra.mxu0 %v6797_v61  ;;  %v3544_v61 = vld [vmem:[#allocation19 + $0x1e0] sm:$0xff] }
 0x345   :  { %3457 = vmatprep.subr.bf16.mxu0 %v6805_v62  ;;  %v3668_v62 = vld [vmem:[#allocation19 + $0x5c0] sm:$0xff] }
 0x348   :  { %3458 = vmatpush2.bf16.msra.mxu0 %v6803_v63  ;;  %v5962_v63 = vcombine.low %v3540_v60, %v3544_v61 }
 0x349   :  { %3459 = vmatprep.subr.bf16.mxu0 %v6811_v0  ;;  %v5963_v0 = vcombine.high %v3540_v60, %v3544_v61  ;;  %v3492_v60 = vld [vmem:[#allocation19 + $0x40] sm:$0xff] }
 0x34a   :  { %v3496_v61 = vld [vmem:[#allocation19 + $0x60] sm:$0xff] }
 0x34c   :  { %3460 = vmatpush2.bf16.msra.mxu0 %v6809_v1  ;;  %v3672_v1 = vld [vmem:[#allocation19 + $0x5e0] sm:$0xff] }
 0x34d   :  { %3461 = vmatprep.subr.bf16.mxu0 %v6817_v2  ;;  %v6090_v2 = vcombine.low %v3668_v62, %v3672_v1 }
 0x350   :  { %3462 = vmatpush2.bf16.msra.mxu0 %v6815_v3  ;;  %v6091_v3 = vcombine.high %v3668_v62, %v3672_v1  ;;  %v3620_v62 = vld [vmem:[#allocation19 + $0x440] sm:$0xff] }
 0x351   :  { %3463 = vmatprep.subr.bf16.mxu0 %v6823_v54  ;;  %v3504_v54 = vld [vmem:[#allocation19 + $0xa0] sm:$0xff] }
 0x354   :  { %3464 = vmatpush2.bf16.msra.mxu0 %v6821_v56  ;;  %v3632_v56 = vld [vmem:[#allocation19 + $0x4a0] sm:$0xff] }
 0x355   :  { %3465 = vmatprep.subr.bf16.mxu0 %v6829_v35 }
 0x358   :  { %3466 = vmatpush2.bf16.msra.mxu0 %v6827_v59 }
 0x359   :  { %5103 = vmatprep.subr.bf16.mxu0 %v6091_v3 }
 0x3db   :  { %v2821_v7 = vpop.f32.mrf.mxu0 }
 0x3dc   :  { %v2822_v10 = vadd.f32 %v2821_v7, %v2620_v5  ;;  %v2856_v5 = vrot.slane %v2851_v4, %v7316_v28 }
 0x3dd   :  { %v2823_v11 = vpop.f32.mrf.mxu0 }
 0x3de   :  { %5438 = vst [vmem:[#allocation21] sm:$0xff] %v2822_v10  ;;  %v2824_v12 = vadd.f32 %v2823_v11, %v2624_v6  ;;  %v2860_v6 = vrot.slane %v2851_v4, %v7324_v30  ;;  %v3484_v4 = vld [vmem:[#allocation19] sm:$0xff] }
 0x3df   :  { %v2825_v13 = vpop.f32.mrf.mxu0 }
 0x3e0   :  { %v2828_v14 = vmul.f32 0.5, %v2824_v12  ;;  %5439 = vst [vmem:[#allocation21 + $0x8] sm:$0xff] %v2824_v12 }
 0x3e1   :  { %v2826_v15 = vpop.f32.mrf.mxu0 }
 0x3e2   :  { %v2829_v16 = vmul.f32 1.442695, %v2828_v14  ;;  %v3532_v15 = vld [vmem:[#allocation19 + $0x180] sm:$0xff] }
 0x3e4   :  { %6830 = vpow2.f32 %v2829_v16 }
 0x3f1   :  { %v6831_v18 = vpop.eup %6830 }
 0x3f2   :  { %v2832_v19 = vmul.f32 %v6831_v18, %v2831_v17  ;;  %v3536_v17 = vld [vmem:[#allocation19 + $0x1a0] sm:$0xff] }
 0x3f3   :  { %v3660_v18 = vld [vmem:[#allocation19 + $0x580] sm:$0xff] }
 0x3f4   :  { %v2833_v22 = vadd.f32 %v2832_v19, %v2822_v10  ;;  %v3664_v19 = vld [vmem:[#allocation19 + $0x5a0] sm:$0xff] }
 0x3f6   :  { %v2834_v25 = vpack.c.bf16 %v2833_v22, %v2833_v22 }
 0x3f8   :  { %2976 = vmatmul.mubr.bf16.vlgmr.msra.gmra.mxu1 %v2834_v25 }
 0x3f9   :  { %3395 = vmatpush1.bf16.msra.mxu1 %v6734_v24 }
 0x3fa   :  { %3396 = vmatprep.subr.bf16.mxu1 %v6742_v26  ;;  %v5955_v26 = vcombine.high %v3532_v15, %v3536_v17 }
 0x3fd   :  { %3397 = vmatpush1.bf16.msra.mxu1 %v6740_v36  ;;  %v6083_v36 = vcombine.high %v3660_v18, %v3664_v19 }
 0x3fe   :  { %3398 = vmatprep.subr.bf16.mxu1 %v6748_v38  ;;  %v3524_v38 = vld [vmem:[#allocation19 + $0x140] sm:$0xff] }
 0x401   :  { %3399 = vmatpush1.bf16.msra.mxu1 %v6746_v39  ;;  %v3528_v39 = vld [vmem:[#allocation19 + $0x160] sm:$0xff] }
 0x402   :  { %3400 = vmatprep.subr.bf16.mxu1 %v6754_v8  ;;  %v3652_v8 = vld [vmem:[#allocation19 + $0x540] sm:$0xff] }
 0x405   :  { %3401 = vmatpush1.bf16.msra.mxu1 %v6752_v49  ;;  %v3656_v49 = vld [vmem:[#allocation19 + $0x560] sm:$0xff] }
 0x406   :  { %3402 = vmatprep.subr.bf16.mxu1 %v6760_v9  ;;  %v5954_v9 = vcombine.low %v3532_v15, %v3536_v17  ;;  %v3608_v15 = vld [vmem:[#allocation19 + $0x3e0] sm:$0xff] }
 0x407   :  { %v3736_v17 = vld [vmem:[#allocation19 + $0x7e0] sm:$0xff] }
 0x409   :  { %3403 = vmatpush1.bf16.msra.mxu1 %v6758_v52  ;;  %v6082_v52 = vcombine.low %v3660_v18, %v3664_v19 }
 0x40a   :  { %3404 = vmatprep.subr.bf16.mxu1 %v6766_v41  ;;  %v5947_v41 = vcombine.high %v3524_v38, %v3528_v39 }
 0x40d   :  { %3405 = vmatpush1.bf16.msra.mxu1 %v6764_v20  ;;  %v6075_v20 = vcombine.high %v3652_v8, %v3656_v49 }
 0x40e   :  { %3406 = vmatprep.subr.bf16.mxu1 %v6772_v42  ;;  %v3516_v42 = vld [vmem:[#allocation19 + $0x100] sm:$0xff] }
 0x411   :  { %3407 = vmatpush1.bf16.msra.mxu1 %v6770_v21  ;;  %v3520_v21 = vld [vmem:[#allocation19 + $0x120] sm:$0xff] }
 0x412   :  { %3408 = vmatprep.subr.bf16.mxu1 %v6778_v43  ;;  %v3644_v43 = vld [vmem:[#allocation19 + $0x500] sm:$0xff] }
 0x415   :  { %3409 = vmatpush1.bf16.msra.mxu1 %v6776_v44  ;;  %v3648_v44 = vld [vmem:[#allocation19 + $0x520] sm:$0xff] }
 0x416   :  { %3410 = vmatprep.subr.bf16.mxu1 %v6784_v37  ;;  %v5946_v37 = vcombine.low %v3524_v38, %v3528_v39  ;;  %v3728_v38 = vld [vmem:[#allocation19 + $0x7a0] sm:$0xff] }
 0x419   :  { %3411 = vmatpush2.bf16.msra.mxu1 %v6782_v40  ;;  %v6074_v40 = vcombine.low %v3652_v8, %v3656_v49 }
 0x41a   :  { %3412 = vmatprep.subr.bf16.mxu1 %v6790_v45  ;;  %v5939_v45 = vcombine.high %v3516_v42, %v3520_v21 }
 0x41d   :  { %3413 = vmatpush2.bf16.msra.mxu1 %v6788_v46  ;;  %v6067_v46 = vcombine.high %v3644_v43, %v3648_v44 }
 0x41e   :  { %3414 = vmatprep.subr.bf16.mxu1 %v6796_v47  ;;  %v3508_v47 = vld [vmem:[#allocation19 + $0xc0] sm:$0xff] }
 0x421   :  { %3415 = vmatpush2.bf16.msra.mxu1 %v6794_v29  ;;  %v3512_v29 = vld [vmem:[#allocation19 + $0xe0] sm:$0xff] }
 0x422   :  { %3416 = vmatprep.subr.bf16.mxu1 %v6802_v48  ;;  %v3636_v48 = vld [vmem:[#allocation19 + $0x4c0] sm:$0xff] }
 0x425   :  { %3417 = vmatpush2.bf16.msra.mxu1 %v6800_v31  ;;  %v3640_v31 = vld [vmem:[#allocation19 + $0x4e0] sm:$0xff] }
 0x426   :  { %3418 = vmatprep.subr.bf16.mxu1 %v6808_v50  ;;  %v5938_v50 = vcombine.low %v3516_v42, %v3520_v21  ;;  %v6058_v35 = vcombine.low %v3636_v48, %v3640_v31  ;;  %v3720_v42 = vld [vmem:[#allocation19 + $0x760] sm:$0xff] }
 0x429   :  { %3419 = vmatpush2.bf16.msra.mxu1 %v6806_v34  ;;  %v6066_v34 = vcombine.low %v3644_v43, %v3648_v44 }
 0x42a   :  { %3420 = vmatprep.subr.bf16.mxu1 %v6814_v51  ;;  %v5931_v51 = vcombine.high %v3508_v47, %v3512_v29 }
 0x42d   :  { %3421 = vmatpush2.bf16.msra.mxu1 %v6812_v32  ;;  %v6059_v32 = vcombine.high %v3636_v48, %v3640_v31 }
 0x42e   :  { %3422 = vmatprep.subr.bf16.mxu1 %v6820_v53  ;;  %v3500_v53 = vld [vmem:[#allocation19 + $0x80] sm:$0xff] }
 0x431   :  { %3423 = vmatpush2.bf16.msra.mxu1 %v6818_v55  ;;  %v3628_v55 = vld [vmem:[#allocation19 + $0x480] sm:$0xff] }
 0x432   :  { %3424 = vmatprep.subr.bf16.mxu1 %v6826_v57  ;;  %v5930_v57 = vcombine.low %v3508_v47, %v3512_v29  ;;  %v6051_v59 = vcombine.high %v3628_v55, %v3632_v56  ;;  %v6050_v1 = vcombine.low %v3628_v55, %v3632_v56  ;;  %v3712_v47 = vld [vmem:[#allocation19 + $0x720] sm:$0xff] }
 0x435   :  { %3425 = vmatpush2.bf16.msra.mxu1 %v6824_v58  ;;  %v5923_v58 = vcombine.high %v3500_v53, %v3504_v54 }
 0x436   :  { %5062 = vmatprep.subr.bf16.mxu1 %v5963_v0  ;;  %v5922_v0 = vcombine.low %v3500_v53, %v3504_v54  ;;  %v3704_v53 = vld [vmem:[#allocation19 + $0x6e0] sm:$0xff] }
 0x4b8   :  { %v2977_v7 = vpop.f32.mrf.mxu1 }
 0x4b9   :  { %v2978_v10 = vadd.f32 %v2977_v7, %v2856_v5  ;;  %v3488_v5 = vld [vmem:[#allocation19 + $0x20] sm:$0xff] }
 0x4ba   :  { %v2979_v11 = vpop.f32.mrf.mxu1  ;;  %v3616_v7 = vld [vmem:[#allocation19 + $0x420] sm:$0xff]  ;;  %v5906_v18 = vcombine.low %v3484_v4, %v3488_v5 }
 0x4bb   :  { %v2980_v12 = vadd.f32 %v2979_v11, %v2860_v6  ;;  %v2984_v13 = vmax.f32 %v2978_v10, 0.0  ;;  %v3612_v6 = vld [vmem:[#allocation19 + $0x400] sm:$0xff]  ;;  %v5914_v10 = vcombine.low %v3492_v60, %v3496_v61 }
 0x4bc   :  { %v2981_v14 = vpop.f32.mrf.mxu1  ;;  %v6034_v19 = vcombine.low %v3612_v6, %v3616_v7 }
 0x4bd   :  { %v2985_v16 = vmax.f32 %v2980_v12, 0.0  ;;  %v2986_v25 = vpack.c.bf16 %v2984_v13, %v2984_v13  ;;  %v5907_v12 = vcombine.high %v3484_v4, %v3488_v5  ;;  %v6035_v13 = vcombine.high %v3612_v6, %v3616_v7  ;;  %v3604_v14 = vld [vmem:[#allocation19 + $0x3c0] sm:$0xff] }
 0x4be   :  { %v2982_v22 = vpop.f32.mrf.mxu1  ;;  %v6026_v39 = vcombine.low %v3604_v14, %v3608_v15  ;;  %v3560_v4 = vld [vmem:[#allocation19 + $0x260] sm:$0xff] }
 0x4bf   :  { %v2987_v24 = vpack.c.bf16 %v2985_v16, %v2985_v16  ;;  %v3732_v16 = vld [vmem:[#allocation19 + $0x7c0] sm:$0xff]  ;;  %v6027_v22 = vcombine.high %v3604_v14, %v3608_v15 }
 0x4c0   :  { %v6154_v8 = vcombine.low %v3732_v16, %v3736_v17  ;;  %v3684_v5 = vld [vmem:[#allocation19 + $0x640] sm:$0xff] }
 0x4c1   :  { %3426 = vmatprep.mubr.bf16.mxu1 %v2987_v24  ;;  %3467 = vmatprep.mubr.bf16.mxu0 %v2987_v24  ;;  %v6155_v24 = vcombine.high %v3732_v16, %v3736_v17  ;;  %v3688_v7 = vld [vmem:[#allocation19 + $0x660] sm:$0xff] }
 0x4c2   :  { %3427 = vmatmul.mubr.bf16.vlgmr.msra.gmra.mxu1 %v2986_v25  ;;  %3468 = vmatmul.mubr.bf16.vlgmr.msra.gmra.mxu0 %v2986_v25  ;;  %v3596_v25 = vld [vmem:[#allocation19 + $0x380] sm:$0xff] }
 0x4c3   :  { %5063 = vmatpush1.bf16.msra.mxu1 %v5962_v63  ;;  %5104 = vmatpush1.bf16.msra.mxu0 %v6090_v2  ;;  %v3624_v63 = vld [vmem:[#allocation19 + $0x460] sm:$0xff]  ;;  %v5915_v2 = vcombine.high %v3492_v60, %v3496_v61 }
 0x4c4   :  { %5064 = vmatprep.subr.bf16.mxu1 %v5955_v26  ;;  %5105 = vmatprep.subr.bf16.mxu0 %v6083_v36  ;;  %v6043_v3 = vcombine.high %v3620_v62, %v3624_v63  ;;  %v6042_v11 = vcombine.low %v3620_v62, %v3624_v63  ;;  %v3600_v26 = vld [vmem:[#allocation19 + $0x3a0] sm:$0xff] }
 0x4c5   :  { %v3724_v36 = vld [vmem:[#allocation19 + $0x780] sm:$0xff]  ;;  %v6019_v49 = vcombine.high %v3596_v25, %v3600_v26  ;;  %v6018_v21 = vcombine.low %v3596_v25, %v3600_v26  ;;  %v3545_v25 = vld [vmem:[#allocation19 + $0x1e8] sm:$0xff] }
 0x4c6   :  { %v6146_v43 = vcombine.low %v3724_v36, %v3728_v38  ;;  %v3696_v60 = vld [vmem:[#allocation19 + $0x6a0] sm:$0xff]  ;;  %v3669_v26 = vld [vmem:[#allocation19 + $0x5c8] sm:$0xff] }
 0x4c7   :  { %5065 = vmatpush1.bf16.msra.mxu1 %v5954_v9  ;;  %5106 = vmatpush1.bf16.msra.mxu0 %v6082_v52  ;;  %v6147_v9 = vcombine.high %v3724_v36, %v3728_v38  ;;  %v3588_v52 = vld [vmem:[#allocation19 + $0x340] sm:$0xff]  ;;  %v3673_v38 = vld [vmem:[#allocation19 + $0x5e8] sm:$0xff] }
 0x4c8   :  { %5066 = vmatprep.subr.bf16.mxu1 %v5947_v41  ;;  %5107 = vmatprep.subr.bf16.mxu0 %v6075_v20  ;;  %v3592_v41 = vld [vmem:[#allocation19 + $0x360] sm:$0xff] }
 0x4c9   :  { %v3716_v20 = vld [vmem:[#allocation19 + $0x740] sm:$0xff]  ;;  %v6011_v44 = vcombine.high %v3588_v52, %v3592_v41  ;;  %v6010_v29 = vcombine.low %v3588_v52, %v3592_v41 }
 0x4ca   :  { %v6138_v48 = vcombine.low %v3716_v20, %v3720_v42  ;;  %v3552_v14 = vld [vmem:[#allocation19 + $0x220] sm:$0xff] }
 0x4cb   :  { %5067 = vmatpush1.bf16.msra.mxu1 %v5946_v37  ;;  %5108 = vmatpush1.bf16.msra.mxu0 %v6074_v40  ;;  %v6139_v37 = vcombine.high %v3716_v20, %v3720_v42  ;;  %v3580_v40 = vld [vmem:[#allocation19 + $0x300] sm:$0xff] }
 0x4cc   :  { %5068 = vmatprep.subr.bf16.mxu1 %v5939_v45  ;;  %5109 = vmatprep.subr.bf16.mxu0 %v6067_v46  ;;  %v3584_v45 = vld [vmem:[#allocation19 + $0x320] sm:$0xff] }
 0x4cd   :  { %v3708_v46 = vld [vmem:[#allocation19 + $0x700] sm:$0xff]  ;;  %v6003_v31 = vcombine.high %v3580_v40, %v3584_v45  ;;  %v6002_v54 = vcombine.low %v3580_v40, %v3584_v45 }
 0x4ce   :  { %v6130_v55 = vcombine.low %v3708_v46, %v3712_v47  ;;  %v3676_v15 = vld [vmem:[#allocation19 + $0x600] sm:$0xff] }
 0x4cf   :  { %5069 = vmatpush1.bf16.msra.mxu1 %v5938_v50  ;;  %5110 = vmatpush1.bf16.msra.mxu0 %v6066_v34  ;;  %v6131_v50 = vcombine.high %v3708_v46, %v3712_v47  ;;  %v3572_v34 = vld [vmem:[#allocation19 + $0x2c0] sm:$0xff] }
 0x4d0   :  { %5070 = vmatprep.subr.bf16.mxu1 %v5931_v51  ;;  %5111 = vmatprep.subr.bf16.mxu0 %v6059_v32  ;;  %v3576_v51 = vld [vmem:[#allocation19 + $0x2e0] sm:$0xff] }
 0x4d1   :  { %v3700_v32 = vld [vmem:[#allocation19 + $0x6c0] sm:$0xff]  ;;  %v5995_v56 = vcombine.high %v3572_v34, %v3576_v51  ;;  %v5994_v61 = vcombine.low %v3572_v34, %v3576_v51 }
 0x4d2   :  { %v6122_v62 = vcombine.low %v3700_v32, %v3704_v53  ;;  %v3680_v17 = vld [vmem:[#allocation19 + $0x620] sm:$0xff] }
 0x4d3   :  { %5071 = vmatpush1.bf16.msra.mxu1 %v5930_v57  ;;  %5112 = vmatpush1.bf16.msra.mxu0 %v6058_v35  ;;  %v6123_v57 = vcombine.high %v3700_v32, %v3704_v53  ;;  %v3564_v35 = vld [vmem:[#allocation19 + $0x280] sm:$0xff]  ;;  %v3533_v32 = vld [vmem:[#allocation19 + $0x188] sm:$0xff] }
 0x4d4   :  { %5072 = vmatprep.subr.bf16.mxu1 %v5923_v58  ;;  %5113 = vmatprep.subr.bf16.mxu0 %v6051_v59  ;;  %v3568_v58 = vld [vmem:[#allocation19 + $0x2a0] sm:$0xff] }
 0x4d5   :  { %v3692_v59 = vld [vmem:[#allocation19 + $0x680] sm:$0xff]  ;;  %v5987_v63 = vcombine.high %v3564_v35, %v3568_v58 }
 0x4d7   :  { %5073 = vmatpush1.bf16.msra.mxu1 %v5922_v0  ;;  %5114 = vmatpush1.bf16.msra.mxu0 %v6050_v1  ;;  %v6115_v0 = vcombine.high %v3692_v59, %v3696_v60  ;;  %v5986_v1 = vcombine.low %v3564_v35, %v3568_v58 }
 0x4d8   :  { %5074 = vmatprep.subr.bf16.mxu1 %v5915_v2  ;;  %5115 = vmatprep.subr.bf16.mxu0 %v6043_v3  ;;  %v6114_v2 = vcombine.low %v3692_v59, %v3696_v60  ;;  %v3556_v3 = vld [vmem:[#allocation19 + $0x240] sm:$0xff] }
 0x4d9   :  { %v5979_v6 = vcombine.high %v3556_v3, %v3560_v4 }
 0x4db   :  { %5075 = vmatpush1.bf16.msra.mxu1 %v5914_v10  ;;  %5116 = vmatpush1.bf16.msra.mxu0 %v6042_v11  ;;  %v5978_v10 = vcombine.low %v3556_v3, %v3560_v4  ;;  %v6106_v11 = vcombine.low %v3684_v5, %v3688_v7 }
 0x4dc   :  { %5076 = vmatprep.subr.bf16.mxu1 %v5907_v12  ;;  %5117 = vmatprep.subr.bf16.mxu0 %v6035_v13  ;;  %v6107_v12 = vcombine.high %v3684_v5, %v3688_v7  ;;  %v3548_v13 = vld [vmem:[#allocation19 + $0x200] sm:$0xff]  ;;  %v3517_v7 = vld [vmem:[#allocation19 + $0x108] sm:$0xff] }
 0x4dd   :  { %v5971_v16 = vcombine.high %v3548_v13, %v3552_v14 }
 0x4df   :  { %5077 = vmatpush1.bf16.msra.mxu1 %v5906_v18  ;;  %5118 = vmatpush1.bf16.msra.mxu0 %v6034_v19  ;;  %v5970_v18 = vcombine.low %v3548_v13, %v3552_v14  ;;  %v6098_v19 = vcombine.low %v3676_v15, %v3680_v17 }
 0x4e0   :  { %5078 = vmatprep.subr.bf16.mxu1 %v6027_v22  ;;  %5119 = vmatprep.subr.bf16.mxu0 %v6155_v24  ;;  %v6099_v22 = vcombine.high %v3676_v15, %v3680_v17  ;;  %v3541_v24 = vld [vmem:[#allocation19 + $0x1c8] sm:$0xff] }
 0x4e1   :  { %v5965_v36 = vcombine.high %v3541_v24, %v3545_v25  ;;  %v3509_v17 = vld [vmem:[#allocation19 + $0xc8] sm:$0xff] }
 0x4e3   :  { %5079 = vmatpush2.bf16.msra.mxu1 %v6026_v39  ;;  %5120 = vmatpush2.bf16.msra.mxu0 %v6154_v8  ;;  %v5964_v39 = vcombine.low %v3541_v24, %v3545_v25  ;;  %v6092_v8 = vcombine.low %v3669_v26, %v3673_v38 }
 0x4e4   :  { %5080 = vmatprep.subr.bf16.mxu1 %v6019_v49  ;;  %5121 = vmatprep.subr.bf16.mxu0 %v6147_v9  ;;  %v6093_v49 = vcombine.high %v3669_v26, %v3673_v38  ;;  %v3052_v9 = vld [vmem:[%s7419_s11] sm:$0xf]  ;;  %v3501_v38 = vld [vmem:[#allocation19 + $0x88] sm:$0xff] }
 0x4e5   :  { %v3057_v52 = vrot.slane %v3052_v9, %v7316_v28  ;;  %v3065_v41 = vrot.slane %v3052_v9, %v7335_v27  ;;  %v3061_v20 = vrot.slane %v3052_v9, %v7324_v30  ;;  %v3069_v42 = vrot.slane %v3052_v9, %v7338_v33 }
 0x4e7   :  { %5081 = vmatpush2.bf16.msra.mxu1 %v6018_v21  ;;  %5122 = vmatpush2.bf16.msra.mxu0 %v6146_v43 }
 0x4e8   :  { %5082 = vmatprep.subr.bf16.mxu1 %v6011_v44  ;;  %5123 = vmatprep.subr.bf16.mxu0 %v6139_v37 }
 0x4eb   :  { %5083 = vmatpush2.bf16.msra.mxu1 %v6010_v29  ;;  %5124 = vmatpush2.bf16.msra.mxu0 %v6138_v48 }
 0x4ec   :  { %5084 = vmatprep.subr.bf16.mxu1 %v6003_v31  ;;  %5125 = vmatprep.subr.bf16.mxu0 %v6131_v50 }
 0x4ef   :  { %5085 = vmatpush2.bf16.msra.mxu1 %v6002_v54  ;;  %5126 = vmatpush2.bf16.msra.mxu0 %v6130_v55  ;;  %v3537_v55 = vld [vmem:[#allocation19 + $0x1a8] sm:$0xff] }
 0x4f0   :  { %5086 = vmatprep.subr.bf16.mxu1 %v5995_v56  ;;  %5127 = vmatprep.subr.bf16.mxu0 %v6123_v57  ;;  %v3661_v56 = vld [vmem:[#allocation19 + $0x588] sm:$0xff]  ;;  %v5956_v3 = vcombine.low %v3533_v32, %v3537_v55 }
 0x4f1   :  { %v3665_v57 = vld [vmem:[#allocation19 + $0x5a8] sm:$0xff] }
 0x4f2   :  { %v6084_v4 = vcombine.low %v3661_v56, %v3665_v57 }
 0x4f3   :  { %5087 = vmatpush2.bf16.msra.mxu1 %v5994_v61  ;;  %5128 = vmatpush2.bf16.msra.mxu0 %v6122_v62  ;;  %v3525_v61 = vld [vmem:[#allocation19 + $0x148] sm:$0xff]  ;;  %v5957_v62 = vcombine.high %v3533_v32, %v3537_v55 }
 0x4f4   :  { %5088 = vmatprep.subr.bf16.mxu1 %v5987_v63  ;;  %5129 = vmatprep.subr.bf16.mxu0 %v6115_v0  ;;  %v6085_v63 = vcombine.high %v3661_v56, %v3665_v57  ;;  %v3529_v0 = vld [vmem:[#allocation19 + $0x168] sm:$0xff] }
 0x4f5   :  { %v5949_v5 = vcombine.high %v3525_v61, %v3529_v0  ;;  %v5948_v13 = vcombine.low %v3525_v61, %v3529_v0  ;;  %v3733_v55 = vld [vmem:[#allocation19 + $0x7c8] sm:$0xff] }
 0x4f6   :  { %v3737_v56 = vld [vmem:[#allocation19 + $0x7e8] sm:$0xff] }
 0x4f7   :  { %5089 = vmatpush2.bf16.msra.mxu1 %v5986_v1  ;;  %5130 = vmatpush2.bf16.msra.mxu0 %v6114_v2  ;;  %v3653_v1 = vld [vmem:[#allocation19 + $0x548] sm:$0xff] }
 0x4f8   :  { %5090 = vmatprep.subr.bf16.mxu1 %v5979_v6  ;;  %5131 = vmatprep.subr.bf16.mxu0 %v6107_v12  ;;  %v3657_v2 = vld [vmem:[#allocation19 + $0x568] sm:$0xff] }
 0x4f9   :  { %v6077_v6 = vcombine.high %v3653_v1, %v3657_v2  ;;  %v3649_v12 = vld [vmem:[#allocation19 + $0x528] sm:$0xff]  ;;  %v6076_v14 = vcombine.low %v3653_v1, %v3657_v2 }
 0x4fa   :  { %v3597_v0 = vld [vmem:[#allocation19 + $0x388] sm:$0xff] }
 0x4fb   :  { %5091 = vmatpush2.bf16.msra.mxu1 %v5978_v10  ;;  %5132 = vmatpush2.bf16.msra.mxu0 %v6106_v11  ;;  %v3521_v10 = vld [vmem:[#allocation19 + $0x128] sm:$0xff] }
 0x4fc   :  { %5092 = vmatprep.subr.bf16.mxu1 %v5971_v16  ;;  %5133 = vmatprep.subr.bf16.mxu0 %v6099_v22  ;;  %v3645_v11 = vld [vmem:[#allocation19 + $0x508] sm:$0xff]  ;;  %v5941_v15 = vcombine.high %v3517_v7, %v3521_v10  ;;  %v5940_v24 = vcombine.low %v3517_v7, %v3521_v10 }
 0x4fd   :  { %v6069_v16 = vcombine.high %v3645_v11, %v3649_v12  ;;  %v3641_v22 = vld [vmem:[#allocation19 + $0x4e8] sm:$0xff]  ;;  %v6068_v25 = vcombine.low %v3645_v11, %v3649_v12 }
 0x4fe   :  { %v3601_v1 = vld [vmem:[#allocation19 + $0x3a8] sm:$0xff] }
 0x4ff   :  { %5093 = vmatpush2.bf16.msra.mxu1 %v5970_v18  ;;  %5134 = vmatpush2.bf16.msra.mxu0 %v6098_v19  ;;  %v3513_v18 = vld [vmem:[#allocation19 + $0xe8] sm:$0xff] }
 0x500   :  { %5144 = vmatprep.subr.bf16.mxu1 %v5965_v36  ;;  %5185 = vmatprep.subr.bf16.mxu0 %v6093_v49  ;;  %v3637_v19 = vld [vmem:[#allocation19 + $0x4c8] sm:$0xff]  ;;  %v5933_v26 = vcombine.high %v3509_v17, %v3513_v18  ;;  %v5932_v9 = vcombine.low %v3509_v17, %v3513_v18 }
 0x501   :  { %v6061_v36 = vcombine.high %v3637_v19, %v3641_v22  ;;  %v3633_v49 = vld [vmem:[#allocation19 + $0x4a8] sm:$0xff] }
 0x502   :  { %v3725_v2 = vld [vmem:[#allocation19 + $0x788] sm:$0xff] }
 0x503   :  { %v3589_v10 = vld [vmem:[#allocation19 + $0x348] sm:$0xff] }
 0x504   :  { %v3593_v11 = vld [vmem:[#allocation19 + $0x368] sm:$0xff] }
 0x505   :  { %v3717_v12 = vld [vmem:[#allocation19 + $0x748] sm:$0xff] }
 0x506   :  { %v3581_v18 = vld [vmem:[#allocation19 + $0x308] sm:$0xff] }
 0x582   :  { %v3428_v21 = vpop.f32.mrf.mxu1  ;;  %v3469_v43 = vpop.f32.mrf.mxu0 }
 0x583   :  { %v3429_v44 = vadd.f32 %v3428_v21, %v3057_v52  ;;  %v3470_v37 = vadd.f32 %v3469_v43, %v3065_v41  ;;  %v6060_v52 = vcombine.low %v3637_v19, %v3641_v22  ;;  %v3497_v21 = vld [vmem:[#allocation19 + $0x68] sm:$0xff] }
 0x584   :  { %v3430_v40 = vpop.f32.mrf.mxu1  ;;  %v3471_v45 = vpop.f32.mrf.mxu0  ;;  %v3621_v43 = vld [vmem:[#allocation19 + $0x448] sm:$0xff] }
 0x585   :  { %v3431_v46 = vadd.f32 %v3430_v40, %v3061_v20  ;;  %v3472_v47 = vadd.f32 %v3471_v45, %v3069_v42  ;;  %v3476_v29 = vmax.f32 %v3429_v44, 0.0  ;;  %v3478_v48 = vmax.f32 %v3470_v37, 0.0  ;;  %v3493_v42 = vld [vmem:[#allocation19 + $0x48] sm:$0xff] }
 0x586   :  { %v3432_v31 = vpop.f32.mrf.mxu1  ;;  %v3473_v50 = vpop.f32.mrf.mxu0  ;;  %v3625_v44 = vld [vmem:[#allocation19 + $0x468] sm:$0xff]  ;;  %v5917_v45 = vcombine.high %v3493_v42, %v3497_v21 }
 0x587   :  { %v3477_v34 = vmax.f32 %v3431_v46, 0.0  ;;  %v3479_v51 = vmax.f32 %v3472_v47, 0.0  ;;  %v7361_v59 = vpack.c.bf16 %v3476_v29, %v3476_v29  ;;  %v7363_v60 = vpack.c.bf16 %v3478_v48, %v3478_v48  ;;  %v3485_v47 = vld [vmem:[#allocation19 + $0x8] sm:$0xff] }
 0x588   :  { %v3433_v53 = vpop.f32.mrf.mxu1  ;;  %v3474_v54 = vpop.f32.mrf.mxu0  ;;  %v6045_v46 = vcombine.high %v3621_v43, %v3625_v44  ;;  %v3489_v29 = vld [vmem:[#allocation19 + $0x28] sm:$0xff]  ;;  %v5916_v50 = vcombine.low %v3493_v42, %v3497_v21 }
 0x589   :  { %v7357_v35 = vpack.c.bf16 %v3477_v34, %v3477_v34  ;;  %v7359_v58 = vpack.c.bf16 %v3479_v51, %v3479_v51  ;;  %v3613_v48 = vld [vmem:[#allocation19 + $0x408] sm:$0xff]  ;;  %v6044_v34 = vcombine.low %v3621_v43, %v3625_v44  ;;  %v5909_v51 = vcombine.high %v3485_v47, %v3489_v29 }
 0x58a   :  { %v3617_v31 = vld [vmem:[#allocation19 + $0x428] sm:$0xff]  ;;  %v5908_v57 = vcombine.low %v3485_v47, %v3489_v29 }
 0x58b   :  { %5094 = vmatprep.mubr.bf16.mxu1 %v7357_v35  ;;  %5135 = vmatprep.mubr.bf16.mxu0 %v7359_v58  ;;  %v6037_v32 = vcombine.high %v3613_v48, %v3617_v31  ;;  %v3605_v53 = vld [vmem:[#allocation19 + $0x3c8] sm:$0xff]  ;;  %v6036_v61 = vcombine.low %v3613_v48, %v3617_v31 }
 0x58c   :  { %5095 = vmatmul.mubr.bf16.vlgmr.msra.gmra.mxu1 %v7361_v59  ;;  %5136 = vmatmul.mubr.bf16.vlgmr.msra.gmra.mxu0 %v7363_v60  ;;  %v3609_v54 = vld [vmem:[#allocation19 + $0x3e8] sm:$0xff] }
 0x58d   :  { %5145 = vmatpush1.bf16.msra.mxu1 %v5964_v39  ;;  %5186 = vmatpush1.bf16.msra.mxu0 %v6092_v8  ;;  %v3505_v39 = vld [vmem:[#allocation19 + $0xa8] sm:$0xff] }
 0x58e   :  { %5176 = vmatprep.mubr.bf16.mxu1 %v7357_v35  ;;  %5217 = vmatprep.mubr.bf16.mxu0 %v7359_v58  ;;  %v3629_v8 = vld [vmem:[#allocation19 + $0x488] sm:$0xff]  ;;  %v5925_v41 = vcombine.high %v3501_v38, %v3505_v39  ;;  %v5924_v37 = vcombine.low %v3501_v38, %v3505_v39 }
 0x58f   :  { %5146 = vmatprep.subr.bf16.mxu1 %v5957_v62  ;;  %5187 = vmatprep.subr.bf16.mxu0 %v6085_v63  ;;  %v6053_v20 = vcombine.high %v3629_v8, %v3633_v49  ;;  %v6052_v40 = vcombine.low %v3629_v8, %v3633_v49  ;;  %v6029_v62 = vcombine.high %v3605_v53, %v3609_v54  ;;  %v3585_v19 = vld [vmem:[#allocation19 + $0x328] sm:$0xff] }
 0x590   :  { %v6157_v63 = vcombine.high %v3733_v55, %v3737_v56  ;;  %v3709_v22 = vld [vmem:[#allocation19 + $0x708] sm:$0xff] }
 0x591   :  { %5147 = vmatpush1.bf16.msra.mxu1 %v5956_v3  ;;  %5188 = vmatpush1.bf16.msra.mxu0 %v6084_v4  ;;  %v3729_v3 = vld [vmem:[#allocation19 + $0x7a8] sm:$0xff]  ;;  %v6028_v4 = vcombine.low %v3605_v53, %v3609_v54 }
 0x592   :  { %5148 = vmatprep.subr.bf16.mxu1 %v5949_v5  ;;  %5189 = vmatprep.subr.bf16.mxu0 %v6077_v6  ;;  %v6156_v5 = vcombine.low %v3733_v55, %v3737_v56  ;;  %v6021_v6 = vcombine.high %v3597_v0, %v3601_v1  ;;  %v6149_v7 = vcombine.high %v3725_v2, %v3729_v3  ;;  %v3573_v39 = vld [vmem:[#allocation19 + $0x2c8] sm:$0xff] }
 0x593   :  { %v3577_v8 = vld [vmem:[#allocation19 + $0x2e8] sm:$0xff] }
 0x594   :  { %v3701_v49 = vld [vmem:[#allocation19 + $0x6c8] sm:$0xff] }
 0x595   :  { %5149 = vmatpush1.bf16.msra.mxu1 %v5948_v13  ;;  %5190 = vmatpush1.bf16.msra.mxu0 %v6076_v14  ;;  %v3721_v13 = vld [vmem:[#allocation19 + $0x768] sm:$0xff]  ;;  %v6020_v14 = vcombine.low %v3597_v0, %v3601_v1  ;;  %v3542_v1 = vld [vmem:[#allocation19 + $0x1d0] sm:$0xff] }
 0x596   :  { %5150 = vmatprep.subr.bf16.mxu1 %v5941_v15  ;;  %5191 = vmatprep.subr.bf16.mxu0 %v6069_v16  ;;  %v6148_v15 = vcombine.low %v3725_v2, %v3729_v3  ;;  %v6013_v16 = vcombine.high %v3589_v10, %v3593_v11  ;;  %v6141_v17 = vcombine.high %v3717_v12, %v3721_v13  ;;  %v3565_v21 = vld [vmem:[#allocation19 + $0x288] sm:$0xff]  ;;  %v3546_v2 = vld [vmem:[#allocation19 + $0x1f0] sm:$0xff] }
 0x597   :  { %v3569_v43 = vld [vmem:[#allocation19 + $0x2a8] sm:$0xff]  ;;  %v3670_v3 = vld [vmem:[#allocation19 + $0x5d0] sm:$0xff] }
 0x598   :  { %v3693_v44 = vld [vmem:[#allocation19 + $0x688] sm:$0xff] }
 0x599   :  { %5151 = vmatpush1.bf16.msra.mxu1 %v5940_v24  ;;  %5192 = vmatpush1.bf16.msra.mxu0 %v6068_v25  ;;  %v3713_v24 = vld [vmem:[#allocation19 + $0x728] sm:$0xff]  ;;  %v6012_v25 = vcombine.low %v3589_v10, %v3593_v11  ;;  %v3534_v11 = vld [vmem:[#allocation19 + $0x190] sm:$0xff] }
 0x59a   :  { %5152 = vmatprep.subr.bf16.mxu1 %v5933_v26  ;;  %5193 = vmatprep.subr.bf16.mxu0 %v6061_v36  ;;  %v6140_v26 = vcombine.low %v3717_v12, %v3721_v13  ;;  %v6005_v36 = vcombine.high %v3581_v18, %v3585_v19  ;;  %v6133_v38 = vcombine.high %v3709_v22, %v3713_v24  ;;  %v3557_v29 = vld [vmem:[#allocation19 + $0x248] sm:$0xff]  ;;  %v3538_v12 = vld [vmem:[#allocation19 + $0x1b0] sm:$0xff] }
 0x59b   :  { %v3561_v48 = vld [vmem:[#allocation19 + $0x268] sm:$0xff]  ;;  %v3662_v13 = vld [vmem:[#allocation19 + $0x590] sm:$0xff] }
 0x59c   :  { %v3685_v31 = vld [vmem:[#allocation19 + $0x648] sm:$0xff] }
 0x59d   :  { %5153 = vmatpush1.bf16.msra.mxu1 %v5932_v9  ;;  %5194 = vmatpush1.bf16.msra.mxu0 %v6060_v52  ;;  %v3705_v9 = vld [vmem:[#allocation19 + $0x6e8] sm:$0xff]  ;;  %v6004_v52 = vcombine.low %v3581_v18, %v3585_v19  ;;  %v3526_v19 = vld [vmem:[#allocation19 + $0x150] sm:$0xff] }
 0x59e   :  { %5154 = vmatprep.subr.bf16.mxu1 %v5925_v41  ;;  %5195 = vmatprep.subr.bf16.mxu0 %v6053_v20  ;;  %v6132_v41 = vcombine.low %v3709_v22, %v3713_v24  ;;  %v5997_v20 = vcombine.high %v3573_v39, %v3577_v8  ;;  %v6125_v42 = vcombine.high %v3701_v49, %v3705_v9  ;;  %v3549_v54 = vld [vmem:[#allocation19 + $0x208] sm:$0xff]  ;;  %v3530_v22 = vld [vmem:[#allocation19 + $0x170] sm:$0xff] }
 0x59f   :  { %v3553_v55 = vld [vmem:[#allocation19 + $0x228] sm:$0xff]  ;;  %v3654_v24 = vld [vmem:[#allocation19 + $0x550] sm:$0xff] }
 0x5a0   :  { %v3677_v56 = vld [vmem:[#allocation19 + $0x608] sm:$0xff] }
 0x5a1   :  { %5155 = vmatpush1.bf16.msra.mxu1 %v5924_v37  ;;  %5196 = vmatpush1.bf16.msra.mxu0 %v6052_v40  ;;  %v3697_v37 = vld [vmem:[#allocation19 + $0x6a8] sm:$0xff]  ;;  %v5996_v40 = vcombine.low %v3573_v39, %v3577_v8  ;;  %v3518_v8 = vld [vmem:[#allocation19 + $0x110] sm:$0xff] }
 0x5a2   :  { %5156 = vmatprep.subr.bf16.mxu1 %v5917_v45  ;;  %5197 = vmatprep.subr.bf16.mxu0 %v6045_v46  ;;  %v6124_v45 = vcombine.low %v3701_v49, %v3705_v9  ;;  %v5989_v46 = vcombine.high %v3565_v21, %v3569_v43  ;;  %v6117_v47 = vcombine.high %v3693_v44, %v3697_v37  ;;  %v3522_v49 = vld [vmem:[#allocation19 + $0x130] sm:$0xff] }
 0x5a3   :  { %v3646_v9 = vld [vmem:[#allocation19 + $0x510] sm:$0xff] }
 0x5a5   :  { %5157 = vmatpush1.bf16.msra.mxu1 %v5916_v50  ;;  %5198 = vmatpush1.bf16.msra.mxu0 %v6044_v34  ;;  %v3689_v50 = vld [vmem:[#allocation19 + $0x668] sm:$0xff]  ;;  %v5988_v34 = vcombine.low %v3565_v21, %v3569_v43  ;;  %v3510_v43 = vld [vmem:[#allocation19 + $0xd0] sm:$0xff] }
 0x5a6   :  { %5158 = vmatprep.subr.bf16.mxu1 %v5909_v51  ;;  %5199 = vmatprep.subr.bf16.mxu0 %v6037_v32  ;;  %v6116_v51 = vcombine.low %v3693_v44, %v3697_v37  ;;  %v5981_v32 = vcombine.high %v3557_v29, %v3561_v48  ;;  %v6109_v53 = vcombine.high %v3685_v31, %v3689_v50  ;;  %v3514_v44 = vld [vmem:[#allocation19 + $0xf0] sm:$0xff] }
 0x5a7   :  { %v3638_v37 = vld [vmem:[#allocation19 + $0x4d0] sm:$0xff] }
 0x5a9   :  { %5159 = vmatpush1.bf16.msra.mxu1 %v5908_v57  ;;  %5200 = vmatpush1.bf16.msra.mxu0 %v6036_v61  ;;  %v3681_v57 = vld [vmem:[#allocation19 + $0x628] sm:$0xff]  ;;  %v5980_v61 = vcombine.low %v3557_v29, %v3561_v48  ;;  %v3502_v48 = vld [vmem:[#allocation19 + $0x90] sm:$0xff] }
 0x5aa   :  { %5160 = vmatprep.subr.bf16.mxu1 %v6029_v62  ;;  %5201 = vmatprep.subr.bf16.mxu0 %v6157_v63  ;;  %v6108_v62 = vcombine.low %v3685_v31, %v3689_v50  ;;  %v5973_v63 = vcombine.high %v3549_v54, %v3553_v55  ;;  %v6101_v0 = vcombine.high %v3677_v56, %v3681_v57  ;;  %v3506_v31 = vld [vmem:[#allocation19 + $0xb0] sm:$0xff] }
 0x5ab   :  { %v3630_v50 = vld [vmem:[#allocation19 + $0x490] sm:$0xff] }
 0x5ad   :  { %5161 = vmatpush2.bf16.msra.mxu1 %v6028_v4  ;;  %5202 = vmatpush2.bf16.msra.mxu0 %v6156_v5  ;;  %v3674_v4 = vld [vmem:[#allocation19 + $0x5f0] sm:$0xff]  ;;  %v5972_v5 = vcombine.low %v3549_v54, %v3553_v55 }
 0x5ae   :  { %5162 = vmatprep.subr.bf16.mxu1 %v6021_v6  ;;  %5203 = vmatprep.subr.bf16.mxu0 %v6149_v7  ;;  %v6100_v6 = vcombine.low %v3677_v56, %v3681_v57  ;;  %v5967_v7 = vcombine.high %v3542_v1, %v3546_v2  ;;  %v6095_v10 = vcombine.high %v3670_v3, %v3674_v4  ;;  %v3494_v55 = vld [vmem:[#allocation19 + $0x50] sm:$0xff] }
 0x5af   :  { %v3498_v56 = vld [vmem:[#allocation19 + $0x70] sm:$0xff] }
 0x5b0   :  { %v3622_v57 = vld [vmem:[#allocation19 + $0x450] sm:$0xff] }
 0x5b1   :  { %5163 = vmatpush2.bf16.msra.mxu1 %v6020_v14  ;;  %5204 = vmatpush2.bf16.msra.mxu0 %v6148_v15  ;;  %v3666_v14 = vld [vmem:[#allocation19 + $0x5b0] sm:$0xff]  ;;  %v5966_v15 = vcombine.low %v3542_v1, %v3546_v2 }
 0x5b2   :  { %5164 = vmatprep.subr.bf16.mxu1 %v6013_v16  ;;  %5205 = vmatprep.subr.bf16.mxu0 %v6141_v17  ;;  %v6094_v16 = vcombine.low %v3670_v3, %v3674_v4  ;;  %v5959_v17 = vcombine.high %v3534_v11, %v3538_v12  ;;  %v6087_v18 = vcombine.high %v3662_v13, %v3666_v14  ;;  %v3486_v2 = vld [vmem:[#allocation19 + $0x10] sm:$0xff] }
 0x5b3   :  { %v3490_v3 = vld [vmem:[#allocation19 + $0x30] sm:$0xff] }
 0x5b4   :  { %v3614_v4 = vld [vmem:[#allocation19 + $0x410] sm:$0xff] }
 0x5b5   :  { %5165 = vmatpush2.bf16.msra.mxu1 %v6012_v25  ;;  %5206 = vmatpush2.bf16.msra.mxu0 %v6140_v26  ;;  %v3658_v25 = vld [vmem:[#allocation19 + $0x570] sm:$0xff]  ;;  %v5958_v26 = vcombine.low %v3534_v11, %v3538_v12 }
 0x5b6   :  { %5166 = vmatprep.subr.bf16.mxu1 %v6005_v36  ;;  %5207 = vmatprep.subr.bf16.mxu0 %v6133_v38  ;;  %v6086_v36 = vcombine.low %v3662_v13, %v3666_v14  ;;  %v5951_v38 = vcombine.high %v3526_v19, %v3530_v22  ;;  %v6079_v39 = vcombine.high %v3654_v24, %v3658_v25  ;;  %v3606_v12 = vld [vmem:[#allocation19 + $0x3d0] sm:$0xff] }
 0x5b7   :  { %v3610_v13 = vld [vmem:[#allocation19 + $0x3f0] sm:$0xff] }
 0x5b8   :  { %v3734_v14 = vld [vmem:[#allocation19 + $0x7d0] sm:$0xff] }
 0x5b9   :  { %5167 = vmatpush2.bf16.msra.mxu1 %v6004_v52  ;;  %5208 = vmatpush2.bf16.msra.mxu0 %v6132_v41  ;;  %v3650_v52 = vld [vmem:[#allocation19 + $0x530] sm:$0xff]  ;;  %v5950_v41 = vcombine.low %v3526_v19, %v3530_v22 }
 0x5ba   :  { %5168 = vmatprep.subr.bf16.mxu1 %v5997_v20  ;;  %5209 = vmatprep.subr.bf16.mxu0 %v6125_v42  ;;  %v6078_v20 = vcombine.low %v3654_v24, %v3658_v25  ;;  %v5943_v42 = vcombine.high %v3518_v8, %v3522_v49  ;;  %v6071_v21 = vcombine.high %v3646_v9, %v3650_v52  ;;  %v3598_v22 = vld [vmem:[#allocation19 + $0x390] sm:$0xff] }
 0x5bb   :  { %v3602_v24 = vld [vmem:[#allocation19 + $0x3b0] sm:$0xff] }
 0x5bc   :  { %v3726_v25 = vld [vmem:[#allocation19 + $0x790] sm:$0xff] }
 0x5bd   :  { %5169 = vmatpush2.bf16.msra.mxu1 %v5996_v40  ;;  %5210 = vmatpush2.bf16.msra.mxu0 %v6124_v45  ;;  %v3642_v40 = vld [vmem:[#allocation19 + $0x4f0] sm:$0xff]  ;;  %v5942_v45 = vcombine.low %v3518_v8, %v3522_v49 }
 0x5be   :  { %5170 = vmatprep.subr.bf16.mxu1 %v5989_v46  ;;  %5211 = vmatprep.subr.bf16.mxu0 %v6117_v47  ;;  %v6070_v46 = vcombine.low %v3646_v9, %v3650_v52  ;;  %v5935_v47 = vcombine.high %v3510_v43, %v3514_v44  ;;  %v6063_v29 = vcombine.high %v3638_v37, %v3642_v40  ;;  %v3590_v49 = vld [vmem:[#allocation19 + $0x350] sm:$0xff] }
 0x5bf   :  { %v3594_v9 = vld [vmem:[#allocation19 + $0x370] sm:$0xff] }
 0x5c0   :  { %v3718_v52 = vld [vmem:[#allocation19 + $0x750] sm:$0xff] }
 0x5c1   :  { %5171 = vmatpush2.bf16.msra.mxu1 %v5988_v34  ;;  %5212 = vmatpush2.bf16.msra.mxu0 %v6116_v51  ;;  %v3634_v34 = vld [vmem:[#allocation19 + $0x4b0] sm:$0xff]  ;;  %v5934_v51 = vcombine.low %v3510_v43, %v3514_v44 }
 0x5c2   :  { %5172 = vmatprep.subr.bf16.mxu1 %v5981_v32  ;;  %5213 = vmatprep.subr.bf16.mxu0 %v6109_v53  ;;  %v6062_v32 = vcombine.low %v3638_v37, %v3642_v40  ;;  %v5927_v53 = vcombine.high %v3502_v48, %v3506_v31  ;;  %v6055_v54 = vcombine.high %v3630_v50, %v3634_v34  ;;  %v3582_v44 = vld [vmem:[#allocation19 + $0x310] sm:$0xff] }
 0x5c3   :  { %v3586_v37 = vld [vmem:[#allocation19 + $0x330] sm:$0xff] }
 0x5c4   :  { %v3710_v40 = vld [vmem:[#allocation19 + $0x710] sm:$0xff] }
 0x5c5   :  { %5173 = vmatpush2.bf16.msra.mxu1 %v5980_v61  ;;  %5214 = vmatpush2.bf16.msra.mxu0 %v6108_v62  ;;  %v3626_v61 = vld [vmem:[#allocation19 + $0x470] sm:$0xff]  ;;  %v5926_v62 = vcombine.low %v3502_v48, %v3506_v31 }
 0x5c6   :  { %5174 = vmatprep.subr.bf16.mxu1 %v5973_v63  ;;  %5215 = vmatprep.subr.bf16.mxu0 %v6101_v0  ;;  %v6054_v63 = vcombine.low %v3630_v50, %v3634_v34  ;;  %v5919_v0 = vcombine.high %v3494_v55, %v3498_v56  ;;  %v6047_v1 = vcombine.high %v3622_v57, %v3626_v61  ;;  %v3574_v31 = vld [vmem:[#allocation19 + $0x2d0] sm:$0xff] }
 0x5c7   :  { %v3578_v50 = vld [vmem:[#allocation19 + $0x2f0] sm:$0xff] }
 0x5c8   :  { %v3702_v34 = vld [vmem:[#allocation19 + $0x6d0] sm:$0xff] }
 0x5c9   :  { %5175 = vmatpush2.bf16.msra.mxu1 %v5972_v5  ;;  %5216 = vmatpush2.bf16.msra.mxu0 %v6100_v6  ;;  %v3618_v5 = vld [vmem:[#allocation19 + $0x430] sm:$0xff]  ;;  %v5918_v6 = vcombine.low %v3494_v55, %v3498_v56 }
 0x5ca   :  { %5226 = vmatprep.subr.bf16.mxu1 %v5967_v7  ;;  %5267 = vmatprep.subr.bf16.mxu0 %v6095_v10  ;;  %v6046_v7 = vcombine.low %v3622_v57, %v3626_v61  ;;  %v5911_v10 = vcombine.high %v3486_v2, %v3490_v3  ;;  %v6039_v11 = vcombine.high %v3614_v4, %v3618_v5  ;;  %v3566_v56 = vld [vmem:[#allocation19 + $0x290] sm:$0xff] }
 0x5cb   :  { %v3570_v57 = vld [vmem:[#allocation19 + $0x2b0] sm:$0xff] }
 0x5cc   :  { %5177 = vmatmul.mubr.bf16.vlgmr.msra.gmra.mxu1 %v7361_v59  ;;  %5218 = vmatmul.mubr.bf16.vlgmr.msra.gmra.mxu0 %v7363_v60  ;;  %v3694_v61 = vld [vmem:[#allocation19 + $0x690] sm:$0xff] }
 0x5cd   :  { %5227 = vmatpush1.bf16.msra.mxu1 %v5966_v15  ;;  %5258 = vmatprep.mubr.bf16.mxu1 %v7357_v35  ;;  %v3738_v15 = vld [vmem:[#allocation19 + $0x7f0] sm:$0xff] }
 0x5ce   :  { %5268 = vmatpush1.bf16.msra.mxu0 %v6094_v16  ;;  %5299 = vmatprep.mubr.bf16.mxu0 %v7359_v58  ;;  %v5910_v16 = vcombine.low %v3486_v2, %v3490_v3  ;;  %v6159_v19 = vcombine.high %v3734_v14, %v3738_v15  ;;  %v3558_v3 = vld [vmem:[#allocation19 + $0x250] sm:$0xff] }
 0x5cf   :  { %5228 = vmatprep.subr.bf16.mxu1 %v5959_v17  ;;  %5269 = vmatprep.subr.bf16.mxu0 %v6087_v18  ;;  %v6038_v17 = vcombine.low %v3614_v4, %v3618_v5  ;;  %v6031_v18 = vcombine.high %v3606_v12, %v3610_v13  ;;  %v3562_v4 = vld [vmem:[#allocation19 + $0x270] sm:$0xff] }
 0x5d0   :  { %v3686_v5 = vld [vmem:[#allocation19 + $0x650] sm:$0xff] }
 0x5d1   :  { %5229 = vmatpush1.bf16.msra.mxu1 %v5958_v26  ;;  %v3730_v26 = vld [vmem:[#allocation19 + $0x7b0] sm:$0xff] }
 0x5d2   :  { %5270 = vmatpush1.bf16.msra.mxu0 %v6086_v36  ;;  %5230 = vmatprep.subr.bf16.mxu1 %v5951_v38  ;;  %v6030_v36 = vcombine.low %v3606_v12, %v3610_v13  ;;  %v6158_v38 = vcombine.low %v3734_v14, %v3738_v15  ;;  %v6151_v8 = vcombine.high %v3726_v25, %v3730_v26  ;;  %v3550_v13 = vld [vmem:[#allocation19 + $0x210] sm:$0xff] }
 0x5d3   :  { %5271 = vmatprep.subr.bf16.mxu0 %v6079_v39  ;;  %v6023_v39 = vcombine.high %v3598_v22, %v3602_v24  ;;  %v3554_v14 = vld [vmem:[#allocation19 + $0x230] sm:$0xff] }
 0x5d4   :  { %v3678_v15 = vld [vmem:[#allocation19 + $0x610] sm:$0xff] }
 0x5d5   :  { %5231 = vmatpush1.bf16.msra.mxu1 %v5950_v41  ;;  %v3722_v41 = vld [vmem:[#allocation19 + $0x770] sm:$0xff] }
 0x5d6   :  { %5272 = vmatpush1.bf16.msra.mxu0 %v6078_v20  ;;  %5232 = vmatprep.subr.bf16.mxu1 %v5943_v42  ;;  %v6022_v20 = vcombine.low %v3598_v22, %v3602_v24  ;;  %v6150_v42 = vcombine.low %v3726_v25, %v3730_v26  ;;  %v6143_v43 = vcombine.high %v3718_v52, %v3722_v41  ;;  %v3543_v24 = vld [vmem:[#allocation19 + $0x1d8] sm:$0xff] }
 0x5d7   :  { %5273 = vmatprep.subr.bf16.mxu0 %v6071_v21  ;;  %v6015_v21 = vcombine.high %v3590_v49, %v3594_v9  ;;  %v3547_v25 = vld [vmem:[#allocation19 + $0x1f8] sm:$0xff] }
 0x5d8   :  { %v3671_v26 = vld [vmem:[#allocation19 + $0x5d8] sm:$0xff] }
 0x5d9   :  { %5233 = vmatpush1.bf16.msra.mxu1 %v5942_v45  ;;  %v3714_v45 = vld [vmem:[#allocation19 + $0x730] sm:$0xff] }
 0x5da   :  { %5274 = vmatpush1.bf16.msra.mxu0 %v6070_v46  ;;  %5234 = vmatprep.subr.bf16.mxu1 %v5935_v47  ;;  %v6014_v46 = vcombine.low %v3590_v49, %v3594_v9  ;;  %v6142_v47 = vcombine.low %v3718_v52, %v3722_v41  ;;  %v6135_v48 = vcombine.high %v3710_v40, %v3714_v45  ;;  %v3535_v9 = vld [vmem:[#allocation19 + $0x198] sm:$0xff] }
 0x5db   :  { %5275 = vmatprep.subr.bf16.mxu0 %v6063_v29  ;;  %v6007_v29 = vcombine.high %v3582_v44, %v3586_v37  ;;  %v3539_v52 = vld [vmem:[#allocation19 + $0x1b8] sm:$0xff]  ;;  %v5968_v41 = vcombine.low %v3543_v24, %v3547_v25 }
 0x5dd   :  { %5235 = vmatpush1.bf16.msra.mxu1 %v5934_v51  ;;  %v3706_v51 = vld [vmem:[#allocation19 + $0x6f0] sm:$0xff] }
 0x5de   :  { %5276 = vmatpush1.bf16.msra.mxu0 %v6062_v32  ;;  %5236 = vmatprep.subr.bf16.mxu1 %v5927_v53  ;;  %v6006_v32 = vcombine.low %v3582_v44, %v3586_v37  ;;  %v6134_v53 = vcombine.low %v3710_v40, %v3714_v45  ;;  %v6127_v55 = vcombine.high %v3702_v34, %v3706_v51  ;;  %v3527_v44 = vld [vmem:[#allocation19 + $0x158] sm:$0xff] }
 0x5df   :  { %5277 = vmatprep.subr.bf16.mxu0 %v6055_v54  ;;  %v5999_v54 = vcombine.high %v3574_v31, %v3578_v50  ;;  %v3531_v37 = vld [vmem:[#allocation19 + $0x178] sm:$0xff] }
 0x5e0   :  { %v3655_v45 = vld [vmem:[#allocation19 + $0x558] sm:$0xff] }
 0x5e1   :  { %5237 = vmatpush1.bf16.msra.mxu1 %v5926_v62  ;;  %v3698_v62 = vld [vmem:[#allocation19 + $0x6b0] sm:$0xff] }
 0x5e2   :  { %5278 = vmatpush1.bf16.msra.mxu0 %v6054_v63  ;;  %5238 = vmatprep.subr.bf16.mxu1 %v5919_v0  ;;  %v5998_v63 = vcombine.low %v3574_v31, %v3578_v50  ;;  %v6126_v0 = vcombine.low %v3702_v34, %v3706_v51  ;;  %v6119_v2 = vcombine.high %v3694_v61, %v3698_v62  ;;  %v3519_v50 = vld [vmem:[#allocation19 + $0x118] sm:$0xff] }
 0x5e3   :  { %5279 = vmatprep.subr.bf16.mxu0 %v6047_v1  ;;  %v5991_v1 = vcombine.high %v3566_v56, %v3570_v57  ;;  %v3523_v34 = vld [vmem:[#allocation19 + $0x138] sm:$0xff] }
 0x5e4   :  { %v3647_v51 = vld [vmem:[#allocation19 + $0x518] sm:$0xff] }
 0x5e5   :  { %5239 = vmatpush1.bf16.msra.mxu1 %v5918_v6  ;;  %v3690_v6 = vld [vmem:[#allocation19 + $0x670] sm:$0xff] }
 0x5e6   :  { %5280 = vmatpush1.bf16.msra.mxu0 %v6046_v7  ;;  %5240 = vmatprep.subr.bf16.mxu1 %v5911_v10  ;;  %v5990_v7 = vcombine.low %v3566_v56, %v3570_v57  ;;  %v6118_v10 = vcombine.low %v3694_v61, %v3698_v62  ;;  %v6111_v12 = vcombine.high %v3686_v5, %v3690_v6  ;;  %v3511_v56 = vld [vmem:[#allocation19 + $0xd8] sm:$0xff] }
 0x5e7   :  { %5281 = vmatprep.subr.bf16.mxu0 %v6039_v11  ;;  %v5983_v11 = vcombine.high %v3558_v3, %v3562_v4  ;;  %v3515_v57 = vld [vmem:[#allocation19 + $0xf8] sm:$0xff] }
 0x5e8   :  { %v3639_v61 = vld [vmem:[#allocation19 + $0x4d8] sm:$0xff] }
 0x5e9   :  { %5241 = vmatpush1.bf16.msra.mxu1 %v5910_v16  ;;  %v3682_v16 = vld [vmem:[#allocation19 + $0x630] sm:$0xff]  ;;  %v3643_v62 = vld [vmem:[#allocation19 + $0x4f8] sm:$0xff] }
 0x5ea   :  { %5282 = vmatpush1.bf16.msra.mxu0 %v6038_v17  ;;  %5242 = vmatprep.subr.bf16.mxu1 %v6031_v18  ;;  %v5982_v17 = vcombine.low %v3558_v3, %v3562_v4  ;;  %v6110_v18 = vcombine.low %v3686_v5, %v3690_v6  ;;  %v6103_v22 = vcombine.high %v3678_v15, %v3682_v16  ;;  %v3507_v3 = vld [vmem:[#allocation19 + $0xb8] sm:$0xff] }
 0x5eb   :  { %5283 = vmatprep.subr.bf16.mxu0 %v6159_v19  ;;  %v5975_v19 = vcombine.high %v3550_v13, %v3554_v14  ;;  %v3631_v4 = vld [vmem:[#allocation19 + $0x498] sm:$0xff]  ;;  %v5936_v6 = vcombine.low %v3511_v56, %v3515_v57 }
 0x5ec   :  { %v3635_v5 = vld [vmem:[#allocation19 + $0x4b8] sm:$0xff] }
 0x5ed   :  { %5243 = vmatpush2.bf16.msra.mxu1 %v6030_v36  ;;  %v3675_v36 = vld [vmem:[#allocation19 + $0x5f8] sm:$0xff] }
 0x5ee   :  { %5284 = vmatpush2.bf16.msra.mxu0 %v6158_v38  ;;  %5244 = vmatprep.subr.bf16.mxu1 %v6023_v39  ;;  %v5974_v38 = vcombine.low %v3550_v13, %v3554_v14  ;;  %v6102_v39 = vcombine.low %v3678_v15, %v3682_v16  ;;  %v6097_v49 = vcombine.high %v3671_v26, %v3675_v36  ;;  %v3499_v13 = vld [vmem:[#allocation19 + $0x78] sm:$0xff] }
 0x5ef   :  { %5285 = vmatprep.subr.bf16.mxu0 %v6151_v8  ;;  %v5969_v8 = vcombine.high %v3543_v24, %v3547_v25  ;;  %v3623_v14 = vld [vmem:[#allocation19 + $0x458] sm:$0xff] }
 0x5f0   :  { %v3627_v15 = vld [vmem:[#allocation19 + $0x478] sm:$0xff] }
 0x5f1   :  { %5245 = vmatpush2.bf16.msra.mxu1 %v6022_v20  ;;  %v3663_v20 = vld [vmem:[#allocation19 + $0x598] sm:$0xff] }
 0x5f2   :  { %5286 = vmatpush2.bf16.msra.mxu0 %v6150_v42  ;;  %5246 = vmatprep.subr.bf16.mxu1 %v6015_v21  ;;  %v3667_v42 = vld [vmem:[#allocation19 + $0x5b8] sm:$0xff]  ;;  %v6096_v21 = vcombine.low %v3671_v26, %v3675_v36 }
 0x5f3   :  { %5287 = vmatprep.subr.bf16.mxu0 %v6143_v43  ;;  %v5961_v43 = vcombine.high %v3535_v9, %v3539_v52  ;;  %v6089_v40 = vcombine.high %v3663_v20, %v3667_v42  ;;  %v3491_v24 = vld [vmem:[#allocation19 + $0x38] sm:$0xff] }
 0x5f4   :  { %v3615_v25 = vld [vmem:[#allocation19 + $0x418] sm:$0xff] }
 0x5f5   :  { %5247 = vmatpush2.bf16.msra.mxu1 %v6014_v46  ;;  %v3659_v46 = vld [vmem:[#allocation19 + $0x578] sm:$0xff] }
 0x5f6   :  { %5288 = vmatpush2.bf16.msra.mxu0 %v6142_v47  ;;  %5248 = vmatprep.subr.bf16.mxu1 %v6007_v29  ;;  %v5960_v47 = vcombine.low %v3535_v9, %v3539_v52  ;;  %v6088_v29 = vcombine.low %v3663_v20, %v3667_v42  ;;  %v6081_v31 = vcombine.high %v3655_v45, %v3659_v46  ;;  %v3619_v26 = vld [vmem:[#allocation19 + $0x438] sm:$0xff] }
 0x5f7   :  { %5289 = vmatprep.subr.bf16.mxu0 %v6135_v48  ;;  %v5953_v48 = vcombine.high %v3527_v44, %v3531_v37  ;;  %v3611_v9 = vld [vmem:[#allocation19 + $0x3f8] sm:$0xff]  ;;  %v6040_v42 = vcombine.low %v3615_v25, %v3619_v26 }
 0x5f8   :  { %v3735_v52 = vld [vmem:[#allocation19 + $0x7d8] sm:$0xff] }
 0x5f9   :  { %5249 = vmatpush2.bf16.msra.mxu1 %v6006_v32  ;;  %v3651_v32 = vld [vmem:[#allocation19 + $0x538] sm:$0xff] }
 0x5fa   :  { %5290 = vmatpush2.bf16.msra.mxu0 %v6134_v53  ;;  %5250 = vmatprep.subr.bf16.mxu1 %v5999_v54  ;;  %v5952_v53 = vcombine.low %v3527_v44, %v3531_v37  ;;  %v6080_v54 = vcombine.low %v3655_v45, %v3659_v46  ;;  %v3599_v44 = vld [vmem:[#allocation19 + $0x398] sm:$0xff] }
 0x5fb   :  { %5291 = vmatprep.subr.bf16.mxu0 %v6127_v55  ;;  %v5945_v55 = vcombine.high %v3519_v50, %v3523_v34  ;;  %v3603_v37 = vld [vmem:[#allocation19 + $0x3b8] sm:$0xff] }
 0x5fc   :  { %v3731_v45 = vld [vmem:[#allocation19 + $0x7b8] sm:$0xff] }
 0x5fd   :  { %5251 = vmatpush2.bf16.msra.mxu1 %v5998_v63  ;;  %v6072_v63 = vcombine.low %v3647_v51, %v3651_v32 }
 0x5fe   :  { %5292 = vmatpush2.bf16.msra.mxu0 %v6126_v0  ;;  %5252 = vmatprep.subr.bf16.mxu1 %v5991_v1  ;;  %v5937_v0 = vcombine.high %v3511_v56, %v3515_v57  ;;  %v6065_v1 = vcombine.high %v3639_v61, %v3643_v62  ;;  %v3587_v56 = vld [vmem:[#allocation19 + $0x338] sm:$0xff] }
 0x5ff   :  { %5293 = vmatprep.subr.bf16.mxu0 %v6119_v2  ;;  %v3503_v2 = vld [vmem:[#allocation19 + $0x98] sm:$0xff] }
 0x600   :  { %v5928_v16 = vcombine.low %v3503_v2, %v3507_v3  ;;  %v3711_v57 = vld [vmem:[#allocation19 + $0x718] sm:$0xff] }
 0x601   :  { %5253 = vmatpush2.bf16.msra.mxu1 %v5990_v7  ;;  %v6064_v7 = vcombine.low %v3639_v61, %v3643_v62  ;;  %v3715_v61 = vld [vmem:[#allocation19 + $0x738] sm:$0xff] }
 0x602   :  { %5294 = vmatpush2.bf16.msra.mxu0 %v6118_v10  ;;  %5254 = vmatprep.subr.bf16.mxu1 %v5983_v11  ;;  %v5929_v10 = vcombine.high %v3503_v2, %v3507_v3  ;;  %v6057_v11 = vcombine.high %v3631_v4, %v3635_v5  ;;  %v3579_v2 = vld [vmem:[#allocation19 + $0x2f8] sm:$0xff] }
 0x603   :  { %5295 = vmatprep.subr.bf16.mxu0 %v6111_v12  ;;  %v3495_v12 = vld [vmem:[#allocation19 + $0x58] sm:$0xff] }
 0x604   :  { %v5920_v36 = vcombine.low %v3495_v12, %v3499_v13  ;;  %v3703_v3 = vld [vmem:[#allocation19 + $0x6d8] sm:$0xff] }
 0x605   :  { %5255 = vmatpush2.bf16.msra.mxu1 %v5982_v17  ;;  %v6056_v17 = vcombine.low %v3631_v4, %v3635_v5  ;;  %v3707_v4 = vld [vmem:[#allocation19 + $0x6f8] sm:$0xff] }
 0x606   :  { %5296 = vmatpush2.bf16.msra.mxu0 %v6110_v18  ;;  %5256 = vmatprep.subr.bf16.mxu1 %v5975_v19  ;;  %v5921_v18 = vcombine.high %v3495_v12, %v3499_v13  ;;  %v6049_v19 = vcombine.high %v3623_v14, %v3627_v15  ;;  %v3571_v12 = vld [vmem:[#allocation19 + $0x2b8] sm:$0xff] }
 0x607   :  { %5297 = vmatprep.subr.bf16.mxu0 %v6103_v22  ;;  %v3487_v22 = vld [vmem:[#allocation19 + $0x18] sm:$0xff] }
 0x608   :  { %v5912_v20 = vcombine.low %v3487_v22, %v3491_v24  ;;  %v3695_v13 = vld [vmem:[#allocation19 + $0x698] sm:$0xff] }
 0x609   :  { %5257 = vmatpush2.bf16.msra.mxu1 %v5974_v38  ;;  %v6048_v38 = vcombine.low %v3623_v14, %v3627_v15  ;;  %v3699_v14 = vld [vmem:[#allocation19 + $0x6b8] sm:$0xff] }
 0x60a   :  { %5298 = vmatpush2.bf16.msra.mxu0 %v6102_v39  ;;  %5308 = vmatprep.subr.bf16.mxu1 %v5969_v8  ;;  %v5913_v39 = vcombine.high %v3487_v22, %v3491_v24  ;;  %v6041_v8 = vcombine.high %v3615_v25, %v3619_v26  ;;  %v3563_v22 = vld [vmem:[#allocation19 + $0x278] sm:$0xff] }
 0x60b   :  { %5349 = vmatprep.subr.bf16.mxu0 %v6097_v49  ;;  %v3607_v49 = vld [vmem:[#allocation19 + $0x3d8] sm:$0xff] }
 0x60c   :  { %5259 = vmatmul.mubr.bf16.vlgmr.msra.gmra.mxu1 %v7361_v59  ;;  %v6032_v46 = vcombine.low %v3607_v49, %v3611_v9  ;;  %v3687_v24 = vld [vmem:[#allocation19 + $0x658] sm:$0xff] }
 0x60d   :  { %5300 = vmatmul.mubr.bf16.vlgmr.msra.gmra.mxu0 %v7363_v60  ;;  %5309 = vmatpush1.bf16.msra.mxu1 %v5968_v41  ;;  %v3739_v41 = vld [vmem:[#allocation19 + $0x7f8] sm:$0xff] }
 0x60e   :  { %5340 = vmatprep.mubr.bf16.mxu1 %v7357_v35  ;;  %5350 = vmatpush1.bf16.msra.mxu0 %v6096_v21  ;;  %v6073_v35 = vcombine.high %v3647_v51, %v3651_v32  ;;  %v6033_v21 = vcombine.high %v3607_v49, %v3611_v9  ;;  %v3723_v51 = vld [vmem:[#allocation19 + $0x778] sm:$0xff]  ;;  %v6024_v32 = vcombine.low %v3599_v44, %v3603_v37 }
 0x60f   :  { %5381 = vmatprep.mubr.bf16.mxu0 %v7359_v58  ;;  %5310 = vmatprep.subr.bf16.mxu1 %v5961_v43  ;;  %v5944_v58 = vcombine.low %v3519_v50, %v3523_v34  ;;  %v6161_v43 = vcombine.high %v3735_v52, %v3739_v41  ;;  %v3595_v50 = vld [vmem:[#allocation19 + $0x378] sm:$0xff] }
 0x610   :  { %5351 = vmatprep.subr.bf16.mxu0 %v6089_v40  ;;  %v3727_v40 = vld [vmem:[#allocation19 + $0x798] sm:$0xff] }
 0x611   :  { %5311 = vmatpush1.bf16.msra.mxu1 %v5960_v47  ;;  %v6160_v47 = vcombine.low %v3735_v52, %v3739_v41  ;;  %v3719_v34 = vld [vmem:[#allocation19 + $0x758] sm:$0xff] }
 0x612   :  { %5352 = vmatpush1.bf16.msra.mxu0 %v6088_v29  ;;  %5312 = vmatprep.subr.bf16.mxu1 %v5953_v48  ;;  %v6025_v29 = vcombine.high %v3599_v44, %v3603_v37  ;;  %v6153_v48 = vcombine.high %v3727_v40, %v3731_v45  ;;  %v3691_v25 = vld [vmem:[#allocation19 + $0x678] sm:$0xff] }
 0x613   :  { %5353 = vmatprep.subr.bf16.mxu0 %v6081_v31  ;;  %v3591_v31 = vld [vmem:[#allocation19 + $0x358] sm:$0xff] }
 0x614   :  { %v6016_v62 = vcombine.low %v3591_v31, %v3595_v50  ;;  %v3555_v49 = vld [vmem:[#allocation19 + $0x238] sm:$0xff] }
 0x615   :  { %5313 = vmatpush1.bf16.msra.mxu1 %v5952_v53  ;;  %v6152_v53 = vcombine.low %v3727_v40, %v3731_v45  ;;  %v3679_v9 = vld [vmem:[#allocation19 + $0x618] sm:$0xff] }
 0x616   :  { %5354 = vmatpush1.bf16.msra.mxu0 %v6080_v54  ;;  %5314 = vmatprep.subr.bf16.mxu1 %v5945_v55  ;;  %v6017_v54 = vcombine.high %v3591_v31, %v3595_v50  ;;  %v6145_v55 = vcombine.high %v3719_v34, %v3723_v51  ;;  %v3683_v52 = vld [vmem:[#allocation19 + $0x638] sm:$0xff] }
 0x617   :  { %5355 = vmatprep.subr.bf16.mxu0 %v6073_v35  ;;  %v3583_v35 = vld [vmem:[#allocation19 + $0x318] sm:$0xff]  ;;  %v6104_v44 = vcombine.low %v3679_v9, %v3683_v52 }
 0x618   :  { %v6008_v5 = vcombine.low %v3583_v35, %v3587_v56  ;;  %v7382_v37 = vld [vmem:[%s7421_s13] sm:$0xff]  ;;  %s7158_s13 = smov [#allocation21]  }
 0x619   :  { %5315 = vmatpush1.bf16.msra.mxu1 %v5944_v58  ;;  %v6144_v58 = vcombine.low %v3719_v34, %v3723_v51  ;;  %v3745_v40 = vrot.slane %v7382_v37, %v7316_v28  ;;  %v3749_v45 = vrot.slane %v7382_v37, %v7324_v30  ;;  %s5456_s10 = sshll.u32 %s7158_s13, 4  ;;  %s5457_s10 = int_to_ptr.vmem [resolvable:$true] %s5456_s10 }
 0x61a   :  { %5356 = vmatpush1.bf16.msra.mxu0 %v6072_v63  ;;  %5316 = vmatprep.subr.bf16.mxu1 %v5937_v0  ;;  %v6009_v63 = vcombine.high %v3583_v35, %v3587_v56  ;;  %v6137_v0 = vcombine.high %v3711_v57, %v3715_v61  ;;  %s7084_s4 = scalar_lea.vmem %s5457_s10, 256  ;;  %p7089_p0 = scmp.lt.s32.totalorder %s5457_s10, %s5457_s10 }
 0x61b   :  { %5357 = vmatprep.subr.bf16.mxu0 %v6065_v1  ;;  %v3575_v1 = vld [vmem:[#allocation19 + $0x2d8] sm:$0xff]  ;;  %p7085_p13 = scmp.ne.s32.totalorder %s5457_s10, %s7084_s4  ;;  %p7090_p1 = scmp.lt.s32.totalorder %s7084_s4, %s7084_s4 }
 0x61c   :  { %v6000_v15 = vcombine.low %v3575_v1, %v3579_v2 }
 0x61d   :  { %5317 = vmatpush1.bf16.msra.mxu1 %v5936_v6  ;;  %v6136_v6 = vcombine.low %v3711_v57, %v3715_v61  ;;  %p7091_p2 = por %p7090_p1, %p7089_p0 }
 0x61e   :  { %5358 = vmatpush1.bf16.msra.mxu0 %v6064_v7  ;;  %5318 = vmatprep.subr.bf16.mxu1 %v5929_v10  ;;  %v6001_v7 = vcombine.high %v3575_v1, %v3579_v2  ;;  %v6129_v10 = vcombine.high %v3703_v3, %v3707_v4 }
 0x61f   :  { %5359 = vmatprep.subr.bf16.mxu0 %v6057_v11  ;;  %v3567_v11 = vld [vmem:[#allocation19 + $0x298] sm:$0xff]  ;;  %p7092_p3 = pnand %p7091_p2, %p7085_p13 }
 0x620   :  { %v5992_v26 = vcombine.low %v3567_v11, %v3571_v12 }
 0x621   :  { %5319 = vmatpush1.bf16.msra.mxu1 %v5928_v16  ;;  %v6128_v16 = vcombine.low %v3703_v3, %v3707_v4 }
 0x622   :  { %5360 = vmatpush1.bf16.msra.mxu0 %v6056_v17  ;;  %5320 = vmatprep.subr.bf16.mxu1 %v5921_v18  ;;  %v5993_v17 = vcombine.high %v3567_v11, %v3571_v12  ;;  %v6121_v18 = vcombine.high %v3695_v13, %v3699_v14 }
 0x623   :  { %5361 = vmatprep.subr.bf16.mxu0 %v6049_v19  ;;  %v3559_v19 = vld [vmem:[#allocation19 + $0x258] sm:$0xff] }
 0x624   :  { %v5984_v41 = vcombine.low %v3559_v19, %v3563_v22 }
 0x625   :  { %5321 = vmatpush1.bf16.msra.mxu1 %v5920_v36  ;;  %v6120_v36 = vcombine.low %v3695_v13, %v3699_v14 }
 0x626   :  { %5362 = vmatpush1.bf16.msra.mxu0 %v6048_v38  ;;  %5322 = vmatprep.subr.bf16.mxu1 %v5913_v39  ;;  %v5985_v38 = vcombine.high %v3559_v19, %v3563_v22  ;;  %v6113_v39 = vcombine.high %v3687_v24, %v3691_v25 }
 0x627   :  { %5363 = vmatprep.subr.bf16.mxu0 %v6041_v8  ;;  %v3551_v8 = vld [vmem:[#allocation19 + $0x218] sm:$0xff] }
 0x629   :  { %5323 = vmatpush1.bf16.msra.mxu1 %v5912_v20  ;;  %v6112_v20 = vcombine.low %v3687_v24, %v3691_v25 }
 0x62a   :  { %5364 = vmatpush1.bf16.msra.mxu0 %v6040_v42  ;;  %5324 = vmatprep.subr.bf16.mxu1 %v6033_v21  ;;  %v5977_v42 = vcombine.high %v3551_v8, %v3555_v49  ;;  %v6105_v21 = vcombine.high %v3679_v9, %v3683_v52 }
 0x62b   :  { %5365 = vmatprep.subr.bf16.mxu0 %v6161_v43  ;;  %v5976_v43 = vcombine.low %v3551_v8, %v3555_v49 }
 0x62d   :  { %5325 = vmatpush2.bf16.msra.mxu1 %v6032_v46 }
 0x62e   :  { %5366 = vmatpush2.bf16.msra.mxu0 %v6160_v47  ;;  %5326 = vmatprep.subr.bf16.mxu1 %v6025_v29 }
 0x62f   :  { %5367 = vmatprep.subr.bf16.mxu0 %v6153_v48 }
 0x631   :  { %5327 = vmatpush2.bf16.msra.mxu1 %v6024_v32 }
 0x632   :  { %5368 = vmatpush2.bf16.msra.mxu0 %v6152_v53  ;;  %5328 = vmatprep.subr.bf16.mxu1 %v6017_v54 }
 0x633   :  { %5369 = vmatprep.subr.bf16.mxu0 %v6145_v55 }
 0x635   :  { %5329 = vmatpush2.bf16.msra.mxu1 %v6016_v62 }
 0x636   :  { %5370 = vmatpush2.bf16.msra.mxu0 %v6144_v58  ;;  %5330 = vmatprep.subr.bf16.mxu1 %v6009_v63  ;;  %v3753_v63 = vrot.slane %v7382_v37, %v7335_v27 }
 0x637   :  { %5371 = vmatprep.subr.bf16.mxu0 %v6137_v0  ;;  %v3757_v0 = vrot.slane %v7382_v37, %v7338_v33 }
 0x639   :  { %5331 = vmatpush2.bf16.msra.mxu1 %v6008_v5 }
 0x63a   :  { %5372 = vmatpush2.bf16.msra.mxu0 %v6136_v6  ;;  %5332 = vmatprep.subr.bf16.mxu1 %v6001_v7 }
 0x63b   :  { %5373 = vmatprep.subr.bf16.mxu0 %v6129_v10 }
 0x63d   :  { %5333 = vmatpush2.bf16.msra.mxu1 %v6000_v15 }
 0x63e   :  { %5374 = vmatpush2.bf16.msra.mxu0 %v6128_v16  ;;  %5334 = vmatprep.subr.bf16.mxu1 %v5993_v17 }
 0x63f   :  { %5375 = vmatprep.subr.bf16.mxu0 %v6121_v18 }
 0x641   :  { %5335 = vmatpush2.bf16.msra.mxu1 %v5992_v26 }
 0x642   :  { %5376 = vmatpush2.bf16.msra.mxu0 %v6120_v36  ;;  %5336 = vmatprep.subr.bf16.mxu1 %v5985_v38 }
 0x643   :  { %5377 = vmatprep.subr.bf16.mxu0 %v6113_v39 }
 0x645   :  { %5337 = vmatpush2.bf16.msra.mxu1 %v5984_v41 }
 0x646   :  { %5378 = vmatpush2.bf16.msra.mxu0 %v6112_v20  ;;  %5338 = vmatprep.subr.bf16.mxu1 %v5977_v42 }
 0x647   :  { %5379 = vmatprep.subr.bf16.mxu0 %v6105_v21 }
 0x649   :  { %5339 = vmatpush2.bf16.msra.mxu1 %v5976_v43 }
 0x64a   :  { %5380 = vmatpush2.bf16.msra.mxu0 %v6104_v44 }
 0x64c   :  { %5341 = vmatmul.mubr.bf16.vlgmr.msra.gmra.mxu1 %v7361_v59  ;;  %v5096_v46 = vpop.f32.mrf.mxu1  ;;  %v5137_v47 = vpop.f32.mrf.mxu0 }
 0x64d   :  { %5382 = vmatmul.mubr.bf16.vlgmr.msra.gmra.mxu0 %v7363_v60  ;;  %v5097_v29 = vadd.f32 %v5096_v46, %v3745_v40 }
 0x64e   :  { %v5098_v48 = vpop.f32.mrf.mxu1  ;;  %v5139_v31 = vpop.f32.mrf.mxu0 }
 0x64f   :  { %v5138_v50 = vadd.f32 %v5137_v47, %v5097_v29  ;;  %v5099_v34 = vadd.f32 %v5098_v48, %v3749_v45 }
 0x650   :  { %v5100_v51 = vpop.f32.mrf.mxu1  ;;  %v5141_v32 = vpop.f32.mrf.mxu0 }
 0x651   :  { %v5390_v53 = vsub.f32 0.0, %v5138_v50  ;;  %v5140_v54 = vadd.f32 %v5139_v31, %v5099_v34 }
 0x652   :  { %v5101_v28 = vpop.f32.mrf.mxu1  ;;  %v5142_v55 = vpop.f32.mrf.mxu0 }
 0x653   :  { %v5398_v35 = vmul.f32 1.442695, %v5390_v53  ;;  %v5391_v56 = vsub.f32 0.0, %v5140_v54 }
 0x655   :  { %6832 = vpow2.f32 %v5398_v35  ;;  %v5400_v30 = vmul.f32 1.442695, %v5391_v56 }
 0x657   :  { %6834 = vpow2.f32 %v5400_v30 }
 0x662   :  { %v6833_v59 = vpop.eup %6832 }
 0x663   :  { %v5414_v57 = vadd.f32 1.0, %v6833_v59 }
 0x664   :  { %v6835_v61 = vpop.eup %6834 }
 0x665   :  { %6836 = vrcp.f32 %v5414_v57  ;;  %v5415_v60 = vadd.f32 1.0, %v6835_v61 }
 0x667   :  { %6838 = vrcp.f32 %v5415_v60 }
 0x672   :  { %v6837_v62 = vpop.eup %6836 }
 0x673   :  { %5430 = vst [vmem:[#allocation20] sm:$0xff] %v6837_v62 }
 0x674   :  { %v6839_v58 = vpop.eup %6838 }
 0x675   :  { %5431 = vst [vmem:[#allocation20 + $0x8] sm:$0xff] %v6839_v58 }
 0x68c   :  { %v5178_v1 = vpop.f32.mrf.mxu1  ;;  %v5219_v2 = vpop.f32.mrf.mxu0 }
 0x68d   :  { %v5179_v3 = vadd.f32 %v5178_v1, %v3753_v63 }
 0x68e   :  { %v5180_v4 = vpop.f32.mrf.mxu1  ;;  %v5221_v5 = vpop.f32.mrf.mxu0 }
 0x68f   :  { %v5220_v6 = vadd.f32 %v5219_v2, %v5179_v3  ;;  %v5181_v7 = vadd.f32 %v5180_v4, %v3757_v0 }
 0x690   :  { %v5182_v10 = vpop.f32.mrf.mxu1  ;;  %v5223_v11 = vpop.f32.mrf.mxu0 }
 0x691   :  { %v5392_v12 = vsub.f32 0.0, %v5220_v6  ;;  %v5222_v13 = vadd.f32 %v5221_v5, %v5181_v7 }
 0x692   :  { %v5183_v14 = vpop.f32.mrf.mxu1  ;;  %v5224_v15 = vpop.f32.mrf.mxu0 }
 0x693   :  { %v5402_v16 = vmul.f32 1.442695, %v5392_v12  ;;  %v5393_v17 = vsub.f32 0.0, %v5222_v13 }
 0x695   :  { %6840 = vpow2.f32 %v5402_v16  ;;  %v5404_v27 = vmul.f32 1.442695, %v5393_v17 }
 0x697   :  { %6842 = vpow2.f32 %v5404_v27 }
 0x6a2   :  { %v6841_v18 = vpop.eup %6840 }
 0x6a3   :  { %v5416_v33 = vadd.f32 1.0, %v6841_v18 }
 0x6a4   :  { %v6843_v19 = vpop.eup %6842 }
 0x6a5   :  { %6844 = vrcp.f32 %v5416_v33  ;;  %v5417_v22 = vadd.f32 1.0, %v6843_v19 }
 0x6a7   :  { %6846 = vrcp.f32 %v5417_v22 }
 0x6b2   :  { %v6845_v24 = vpop.eup %6844 }
 0x6b3   :  { %5432 = vst [vmem:[#allocation20 + $0x10] sm:$0xff] %v6845_v24 }
 0x6b4   :  { %v6847_v25 = vpop.eup %6846 }
 0x6b5   :  { %5433 = vst [vmem:[#allocation20 + $0x18] sm:$0xff] %v6847_v25 }
 0x6b6   :  { %7095 = shalt.err (!%p7092_p3)
}
 0x6b7   :  { %5459 = dma.vmem_to_hbm [thread:$0]  %s5457_s10, 256, %s7423_s15, [#allocation22]   ;;  %v3760_v26 = vsub.s32 4, %v7313_v23  ;;  %v3764_v36 = vsub.s32 5, %v7313_v23  ;;  %v3768_v54 = vsub.s32 6, %v7313_v23  ;;  %v3772_v28 = vsub.s32 7, %v7313_v23 }
 0x6b8   :  { %s7159_s15 = smov [#allocation20]  }
 0x6b9   :  { %v3761_v38 = vrot.slane %v7382_v37, %v3760_v26  ;;  %v3765_v39 = vrot.slane %v7382_v37, %v3764_v36  ;;  %v3769_v55 = vrot.slane %v7382_v37, %v3768_v54  ;;  %v3773_v35 = vrot.slane %v7382_v37, %v3772_v28  ;;  %s5446_s23 = sshll.u32 %s7159_s15, 4  ;;  %s5447_s23 = int_to_ptr.vmem [resolvable:$true] %s5446_s23 }
 0x6ba   :  { %s7104_s24 = scalar_lea.vmem %s5447_s23, 1024  ;;  %p7109_p5 = scmp.lt.s32.totalorder %s5447_s23, %s5447_s23 }
 0x6bb   :  { %p7105_p4 = scmp.ne.s32.totalorder %s5447_s23, %s7104_s24  ;;  %p7110_p6 = scmp.lt.s32.totalorder %s7104_s24, %s7104_s24 }
 0x6bd   :  { %p7111_p7 = por %p7110_p6, %p7109_p5 }
 0x6bf   :  { %p7112_p8 = pnand %p7111_p7, %p7105_p4 }
 0x6cc   :  { %v5260_v8 = vpop.f32.mrf.mxu1 }
 0x6cd   :  { %v5261_v49 = vadd.f32 %v5260_v8, %v3761_v38  ;;  %v5301_v9 = vpop.f32.mrf.mxu0 }
 0x6ce   :  { %v5262_v52 = vpop.f32.mrf.mxu1 }
 0x6cf   :  { %v5302_v41 = vadd.f32 %v5301_v9, %v5261_v49  ;;  %v5263_v20 = vadd.f32 %v5262_v52, %v3765_v39  ;;  %v5303_v42 = vpop.f32.mrf.mxu0 }
 0x6d0   :  { %v5264_v21 = vpop.f32.mrf.mxu1 }
 0x6d1   :  { %v5394_v43 = vsub.f32 0.0, %v5302_v41  ;;  %v5304_v44 = vadd.f32 %v5303_v42, %v5263_v20  ;;  %v5305_v40 = vpop.f32.mrf.mxu0 }
 0x6d2   :  { %v5265_v45 = vpop.f32.mrf.mxu1 }
 0x6d3   :  { %v5406_v46 = vmul.f32 1.442695, %v5394_v43  ;;  %v5395_v47 = vsub.f32 0.0, %v5304_v44  ;;  %v5306_v29 = vpop.f32.mrf.mxu0 }
 0x6d5   :  { %6848 = vpow2.f32 %v5406_v46  ;;  %v5408_v48 = vmul.f32 1.442695, %v5395_v47 }
 0x6d7   :  { %6850 = vpow2.f32 %v5408_v48 }
 0x6e2   :  { %v6849_v31 = vpop.eup %6848 }
 0x6e3   :  { %v5418_v50 = vadd.f32 1.0, %v6849_v31 }
 0x6e4   :  { %v6851_v34 = vpop.eup %6850 }
 0x6e5   :  { %6852 = vrcp.f32 %v5418_v50  ;;  %v5419_v51 = vadd.f32 1.0, %v6851_v34 }
 0x6e7   :  { %6854 = vrcp.f32 %v5419_v51 }
 0x6f2   :  { %v6853_v32 = vpop.eup %6852 }
 0x6f3   :  { %5434 = vst [vmem:[#allocation20 + $0x20] sm:$0xff] %v6853_v32 }
 0x6f4   :  { %v6855_v53 = vpop.eup %6854 }
 0x6f5   :  { %5435 = vst [vmem:[#allocation20 + $0x28] sm:$0xff] %v6855_v53 }
 0x70c   :  { %v5342_v56 = vpop.f32.mrf.mxu1 }
 0x70d   :  { %v5343_v30 = vadd.f32 %v5342_v56, %v3769_v55  ;;  %v5383_v59 = vpop.f32.mrf.mxu0 }
 0x70e   :  { %v5344_v57 = vpop.f32.mrf.mxu1 }
 0x70f   :  { %v5384_v61 = vadd.f32 %v5383_v59, %v5343_v30  ;;  %v5345_v60 = vadd.f32 %v5344_v57, %v3773_v35  ;;  %v5385_v62 = vpop.f32.mrf.mxu0 }
 0x710   :  { %v5346_v58 = vpop.f32.mrf.mxu1 }
 0x711   :  { %v5396_v63 = vsub.f32 0.0, %v5384_v61  ;;  %v5386_v0 = vadd.f32 %v5385_v62, %v5345_v60  ;;  %v5387_v1 = vpop.f32.mrf.mxu0 }
 0x712   :  { %v5347_v2 = vpop.f32.mrf.mxu1 }
 0x713   :  { %v5410_v3 = vmul.f32 1.442695, %v5396_v63  ;;  %v5397_v4 = vsub.f32 0.0, %v5386_v0  ;;  %v5388_v5 = vpop.f32.mrf.mxu0 }
 0x715   :  { %6856 = vpow2.f32 %v5410_v3  ;;  %v5412_v23 = vmul.f32 1.442695, %v5397_v4 }
 0x717   :  { %6858 = vpow2.f32 %v5412_v23 }
 0x722   :  { %v6857_v6 = vpop.eup %6856 }
 0x723   :  { %v5420_v37 = vadd.f32 1.0, %v6857_v6 }
 0x724   :  { %v6859_v7 = vpop.eup %6858 }
 0x725   :  { %6860 = vrcp.f32 %v5420_v37  ;;  %v5421_v10 = vadd.f32 1.0, %v6859_v7 }
 0x727   :  { %6862 = vrcp.f32 %v5421_v10 }
 0x732   :  { %v6861_v11 = vpop.eup %6860 }
 0x733   :  { %5436 = vst [vmem:[#allocation20 + $0x30] sm:$0xff] %v6861_v11 }
 0x734   :  { %v6863_v12 = vpop.eup %6862 }
 0x735   :  { %5437 = vst [vmem:[#allocation20 + $0x38] sm:$0xff] %v6863_v12 }
 0x736   :  { %7115 = shalt.err (!%p7112_p8)
}
 0x737   :  { %5449 = dma.vmem_to_hbm [thread:$0]  %s5447_s23, 1024, %s7422_s14, [#allocation4]  }
 0x738   :  { %7136 = dma.done.wait [#allocation4], 1024  }
 0x739   :  { %7137 = vsyncadd [#allocation4], 4294966272 }
 0x73a   :  { %7138 = dma.done.wait [#allocation22], 256  }
 0x73b   :  { %7139 = vsyncadd [#allocation22], 4294967040 }
 0x73c   :  { %5466 = vsyncpa [#allocation3], 1 }
 0x73d   :  { %5467 = vsyncpa [#allocation6], 1 }
 0x73e   :  { %5468 = vsyncpa [#allocation9], 1 }
 0x73f   :  { %5469 = vsyncpa [#allocation12], 1 }
 0x740   :  { %5470 = vsyncpa [#allocation15], 1 }
 0x741   :  { %5471 = vsyncpa [#allocation18], 1 }
 0x742   :  { %5472 = vsyncpa [#allocation4], 1 }
 0x743   :  { %5473 = vsyncpa [#allocation22], 1 }

</bundles_post_ra>
